<compile_context>
chip_gen: v7x
topology: tpu7x:2x2x1
jax: 0.10.0
libtpu: 0.0.40
codegen_flags: <defaults>
</compile_context>

<pallas_src>
import math

import jax
import jax.numpy as jnp
from jax import lax
from jax.experimental import pallas as pl
from jax.experimental.pallas import tpu as pltpu

# Module hyper-parameters (from the PyTorch source).
IN_DIM = 4             # input_dim
D_MODEL = 32           # conv_archs[-1][-1]
N_HEADS = 4
HEAD_DIM = D_MODEL // N_HEADS
FFN_DIM = 64           # hidden_dim (dim_feedforward)
N_LAYERS = 2
OUT_DIM = 1
LN_EPS = 1e-5

COLS = 3 * IN_DIM + 1  # im2col width (+1 ones-column carrying the conv bias)
VEC_W = 128            # packed per-layer vector slab width (lane-aligned)

# MXU operand dtype for the dense matmuls; accumulation is always f32.
MM_DTYPE = jnp.bfloat16


def _mm(a, b):
    """2-D matmul on the MXU with bf16 operands and f32 accumulation."""
    return jnp.dot(a.astype(MM_DTYPE), b.astype(MM_DTYPE),
                   preferred_element_type=jnp.float32)


def _layer_norm(x, w, b):
    mu = jnp.mean(x, axis=-1, keepdims=True)
    xc = x - mu
    var = jnp.mean(xc * xc, axis=-1, keepdims=True)
    return xc * lax.rsqrt(var + LN_EPS) * w + b


def _make_kernel(BB, L):
    """Kernel processing one batch block of BB samples (BB*L folded rows)."""
    R = BB * L

    def kernel(
        x_ref,     # (BB*L, COLS)   bf16  im2col'd input (+ ones column)
        cw_ref,    # (COLS, D_MODEL) bf16 conv weight (bias folded as last row)
        ipw_ref,   # (N_LAYERS, D_MODEL, 3*D_MODEL) bf16 (Q part pre-scaled)
        opw_ref,   # (N_LAYERS, D_MODEL, D_MODEL)   bf16
        w1_ref,    # (N_LAYERS, D_MODEL, FFN_DIM)   bf16
        w2_ref,    # (N_LAYERS, FFN_DIM, D_MODEL)   bf16
        vec_ref,   # (N_LAYERS, 8, VEC_W) f32  packed [ipb,opb,b1,b2,ln1w,ln1b,ln2w,ln2b]
        lw_ref,    # (1, D_MODEL) f32  final linear weight (row layout)
        lb_ref,    # (1, 1) f32
        out_ref,   # (1, 1, BB) f32  lane-dense output row for this block
    ):
        # --- Conv1d(IN_DIM -> D_MODEL, k=3, p=1) + ReLU as one im2col matmul ----
        h = jnp.maximum(_mm(x_ref[...], cw_ref[...]), 0.0)          # (R, D_MODEL) f32

        # --- TransformerEncoder: N_LAYERS post-norm layers (dropout = identity) --
        # TODO(synk): nn.Dropout(p=0.55) is stochastic; implemented as eval-mode identity.
        for l in range(N_LAYERS):
            V = vec_ref[l]                                          # (8, VEC_W) f32
            ipb = V[0:1, 0:3 * D_MODEL]                             # (1, 96)
            opb = V[1:2, 0:D_MODEL]
            b1 = V[2:3, 0:FFN_DIM]
            b2 = V[3:4, 0:D_MODEL]
            ln1w, ln1b = V[4:5, 0:D_MODEL], V[5:6, 0:D_MODEL]
            ln2w, ln2b = V[6:7, 0:D_MODEL], V[7:8, 0:D_MODEL]

            # Fused QKV projection for all BB*L rows at once (softmax scale is
            # already folded into the Q columns of ipw and the Q part of ipb).
            qkv = _mm(h, ipw_ref[l]) + ipb                          # (R, 3*D_MODEL) f32
            q = qkv[:, 0:D_MODEL].reshape(BB, L, D_MODEL)
            k = qkv[:, D_MODEL:2 * D_MODEL].reshape(BB, L, D_MODEL)
            v = qkv[:, 2 * D_MODEL:3 * D_MODEL].reshape(BB, L, D_MODEL)

            # Per-head attention, batched across the BB samples.  Head outputs
            # are concatenated along the feature (lane) axis so the output
            # projection is a single K=32 matmul instead of four K=8 matmuls.
            head_outs = []
            for hh in range(N_HEADS):
                sl = slice(hh * HEAD_DIM, (hh + 1) * HEAD_DIM)
                qh, kh, vh = q[:, :, sl], k[:, :, sl], v[:, :, sl]  # (BB, L, Dh)
                s = jnp.einsum('bqd,bkd->bqk', qh, kh,
                               preferred_element_type=jnp.float32)  # (BB, L, L)
                s = s - jnp.max(s, axis=-1, keepdims=True)
                p = jnp.exp(s)
                p = p * pl.reciprocal(jnp.sum(p, axis=-1, keepdims=True), approx=True)
                oh = jnp.einsum('bqk,bkd->bqd', p, vh,
                                preferred_element_type=jnp.float32)  # (BB, L, Dh)
                head_outs.append(oh.reshape(R, HEAD_DIM))
            attn = jnp.concatenate(head_outs, axis=1)               # (R, D_MODEL)
            attn = _mm(attn, opw_ref[l])                            # one (R,32)@(32,32)

            h = _layer_norm(h + attn + opb, ln1w, ln1b)

            # Feed-forward block.
            ff = jnp.maximum(_mm(h, w1_ref[l]) + b1, 0.0)
            ff = _mm(ff, w2_ref[l]) + b2
            h = _layer_norm(h + ff, ln2w, ln2b)

        # --- AdaptiveAvgPool1d(1) over the sequence + final Linear ---------------
        pooled = jnp.mean(h.reshape(BB, L, D_MODEL), axis=1)         # (BB, D_MODEL) f32
        # Lane-dense (1, BB) output row: lw (1, D) contracted against pooled (BB, D).
        out_row = lax.dot_general(
            lw_ref[...], pooled, (((1,), (1,)), ((), ())),
            preferred_element_type=jnp.float32) + lb_ref[...]        # (1, BB)
        out_ref[...] = out_row[None]                                 # (1, 1, BB)

    return kernel


def cnn_transformer_forward(x, params, block_batch=None):
    """x: (B, L, IN_DIM) float32 -> (B, OUT_DIM) float32."""
    B, L, cin = x.shape
    assert cin == IN_DIM

    # im2col in the wrapper (tiny data): columns = [x[i-1], x[i], x[i+1], 1].
    xp = jnp.pad(x, ((0, 0), (1, 1), (0, 0)))
    xcol = jnp.concatenate(
        [xp[:, 0:L], xp[:, 1:L + 1], xp[:, 2:L + 2],
         jnp.ones((B, L, 1), x.dtype)], axis=-1)                     # (B, L, COLS)
    xcol = xcol.astype(MM_DTYPE)                                     # halve DMA / VMEM

    # Batch-block sizing: ~4K folded rows per grid step (fits comfortably in
    # v7x's 64 MiB / v5e's scoped VMEM; raise on v6e's 128 MiB if desired).
    if block_batch is None:
        block_batch = max(1, min(B, 4096 // max(L, 1)))
        # Keep >= 2 batch blocks for large batches so the "parallel" axis can be
        # sharded across both v7x TensorCores (single TC on v5e/v6e is unaffected).
        if block_batch >= B and B >= 2 and B * L >= 4096:
            block_batch = -(-B // 2)
    BB = block_batch
    nb = -(-B // BB)
    if nb > 1:
        while (BB * L) % 8 != 0:      # keep the folded row block sublane-aligned
            BB += 1
        nb = -(-B // BB)
    B_pad = nb * BB
    if B_pad > B:
        xcol = jnp.pad(xcol, ((0, B_pad - B), (0, 0), (0, 0)))
    xflat = xcol.reshape(B_pad * L, COLS)

    inputs = (xflat, params["cw2"], params["ipw"], params["opw"],
              params["w1"], params["w2"], params["vecs"], params["lw"], params["lb"])

    def full_spec(a):
        return pl.BlockSpec(a.shape, lambda b, _nd=a.ndim: (0,) * _nd)

    in_specs = [pl.BlockSpec((BB * L, COLS), lambda b: (b, 0))]
    in_specs += [full_spec(a) for a in inputs[1:]]

    out = pl.pallas_call(
        _make_kernel(BB, L),
        out_shape=jax.ShapeDtypeStruct((nb, 1, BB), jnp.float32),
        grid_spec=pltpu.PrefetchScalarGridSpec(
            num_scalar_prefetch=0,
            grid=(nb,),
            in_specs=in_specs,
            out_specs=pl.BlockSpec((1, 1, BB), lambda b: (b, 0, 0)),
        ),
        compiler_params=pltpu.CompilerParams(
            dimension_semantics=("parallel",),        # batch blocks are independent
            vmem_limit_bytes=48 * 1024 * 1024),       # lift v5e's 16 MiB scoped default
    )(*inputs)

    return out.reshape(B_pad)[:B].reshape(B, OUT_DIM)


def init_params(key):
    """Deterministic synthetic parameters, generated in PyTorch layout and
    converted to the kernel's (x @ W) layouts / packed slabs.  The softmax scale
    is folded into the Q rows of in_proj_weight / in_proj_bias; matmul weight
    slabs are stored in bf16 (shared by kernel and reference)."""
    keys = iter(jax.random.split(key, 40))

    def rnd(shape, scale=0.1):
        return scale * jax.random.normal(next(keys), shape, dtype=jnp.float32)

    conv_w = rnd((D_MODEL, IN_DIM, 3))          # PyTorch Conv1d: (out, in, k)
    conv_b = rnd((D_MODEL,))
    lin_w = rnd((OUT_DIM, D_MODEL))             # PyTorch Linear: (out, in)
    lin_b = rnd((OUT_DIM,))

    attn_scale = 1.0 / math.sqrt(HEAD_DIM)

    ipw, opw, w1, w2, vec_rows = [], [], [], [], []
    for _ in range(N_LAYERS):
        ipw_l = rnd((3 * D_MODEL, D_MODEL))     # in_proj_weight
        ipb_l = rnd((3 * D_MODEL,))
        # Fold the softmax scale into the Q projection (rows 0..D_MODEL-1).
        ipw_l = ipw_l.at[:D_MODEL].multiply(attn_scale)
        ipb_l = ipb_l.at[:D_MODEL].multiply(attn_scale)
        opw_l = rnd((D_MODEL, D_MODEL))         # out_proj.weight
        opb_l = rnd((D_MODEL,))
        w1_l = rnd((FFN_DIM, D_MODEL))          # linear1.weight
        b1_l = rnd((FFN_DIM,))
        w2_l = rnd((D_MODEL, FFN_DIM))          # linear2.weight
        b2_l = rnd((D_MODEL,))
        ln1w_l = 1.0 + rnd((D_MODEL,)); ln1b_l = rnd((D_MODEL,))
        ln2w_l = 1.0 + rnd((D_MODEL,)); ln2b_l = rnd((D_MODEL,))

        ipw.append(ipw_l.T); opw.append(opw_l.T)
        w1.append(w1_l.T); w2.append(w2_l.T)
        rows = [ipb_l, opb_l, b1_l, b2_l, ln1w_l, ln1b_l, ln2w_l, ln2b_l]
        vec_rows.append(jnp.stack(
            [jnp.pad(r, (0, VEC_W - r.shape[0])) for r in rows]))    # (8, VEC_W)

    # im2col conv weight: rows [tap0(4) | tap1(4) | tap2(4) | bias(1)].
    cw2 = jnp.concatenate(
        [conv_w[:, :, 0].T, conv_w[:, :, 1].T, conv_w[:, :, 2].T, conv_b[None, :]],
        axis=0)                                                      # (COLS, D_MODEL)

    return {
        "cw2": cw2.astype(MM_DTYPE),
        "ipw": jnp.stack(ipw).astype(MM_DTYPE),  # (N_LAYERS, D, 3D), Q pre-scaled
        "opw": jnp.stack(opw).astype(MM_DTYPE),  # (N_LAYERS, D, D)
        "w1": jnp.stack(w1).astype(MM_DTYPE),    # (N_LAYERS, D, FFN)
        "w2": jnp.stack(w2).astype(MM_DTYPE),    # (N_LAYERS, FFN, D)
        "vecs": jnp.stack(vec_rows),             # (N_LAYERS, 8, VEC_W) f32
        "lw": lin_w,                             # (1, D) f32 row layout
        "lb": lin_b.reshape(1, OUT_DIM),         # (1, 1) f32
    }


def reference_forward(x, params):
    """Pure-JAX f32 reference matching the PyTorch forward (eval mode).
    Uses the same (bf16-stored, upcast) weights; all math in f32."""
    B, L, _ = x.shape
    f32 = jnp.float32
    xp = jnp.pad(x, ((0, 0), (1, 1), (0, 0)))
    xcol = jnp.concatenate(
        [xp[:, 0:L], xp[:, 1:L + 1], xp[:, 2:L + 2],
         jnp.ones((B, L, 1), x.dtype)], axis=-1)
    h = jnp.maximum(xcol @ params["cw2"].astype(f32), 0.0)           # (B, L, D)

    for l in range(N_LAYERS):
        V = params["vecs"][l]
        ipb, opb = V[0, :3 * D_MODEL], V[1, :D_MODEL]
        b1, b2 = V[2, :FFN_DIM], V[3, :D_MODEL]
        ln1w, ln1b = V[4, :D_MODEL], V[5, :D_MODEL]
        ln2w, ln2b = V[6, :D_MODEL], V[7, :D_MODEL]

        qkv = h @ params["ipw"][l].astype(f32) + ipb
        q, k, v = (qkv[..., :D_MODEL], qkv[..., D_MODEL:2 * D_MODEL],
                   qkv[..., 2 * D_MODEL:])
        qh = q.reshape(B, L, N_HEADS, HEAD_DIM).transpose(0, 2, 1, 3)
        kh = k.reshape(B, L, N_HEADS, HEAD_DIM).transpose(0, 2, 1, 3)
        vh = v.reshape(B, L, N_HEADS, HEAD_DIM).transpose(0, 2, 1, 3)
        # Softmax scale already folded into the Q projection parameters.
        s = jnp.einsum("bhqd,bhkd->bhqk", qh, kh)
        p = jax.nn.softmax(s, axis=-1)
        a = jnp.einsum("bhqk,bhkd->bhqd", p, vh).transpose(0, 2, 1, 3)
        a = a.reshape(B, L, D_MODEL) @ params["opw"][l].astype(f32) + opb
        h = _layer_norm(h + a, ln1w, ln1b)
        ff = jnp.maximum(h @ params["w1"][l].astype(f32) + b1, 0.0)
        ff = ff @ params["w2"][l].astype(f32) + b2
        h = _layer_norm(h + ff, ln2w, ln2b)

    pooled = h.mean(axis=1)                                          # (B, D)
    return pooled @ params["lw"].T + params["lb"]                    # (B, OUT_DIM)


if __name__ == "__main__":
    key = jax.random.PRNGKey(0)
    kp, kx = jax.random.split(key)
    params = init_params(kp)

    B, L = 2, 16
    x = jax.random.normal(kx, (B, L, IN_DIM), dtype=jnp.float32)

    out = cnn_transformer_forward(x, params)
    out = jax.block_until_ready(out)

    ref = reference_forward(x, params).reshape(B, OUT_DIM)
    assert out.shape == (B, OUT_DIM)
    # Tolerance absorbs bf16 MXU operands (f32 accumulation) and the EUP
    # approximate reciprocal in the softmax normalization.
    if not jnp.allclose(out, ref, atol=3e-2, rtol=3e-2):
        raise AssertionError(f"mismatch: pallas={out} ref={ref}")
    print("KERNEL_OK")
</pallas_src>

<mosaic_0001>
module attributes {stable_mosaic.version = 11 : i64} {
  func.func @kernel(%arg0: i32, %arg1: memref<32x13xbf16, #tpu.memory_space<vmem>>, %arg2: memref<13x32xbf16, #tpu.memory_space<vmem>>, %arg3: memref<2x32x96xbf16, #tpu.memory_space<vmem>>, %arg4: memref<2x32x32xbf16, #tpu.memory_space<vmem>>, %arg5: memref<2x32x64xbf16, #tpu.memory_space<vmem>>, %arg6: memref<2x64x32xbf16, #tpu.memory_space<vmem>>, %arg7: memref<2x8x128xf32, #tpu.memory_space<vmem>>, %arg8: memref<1x32xf32, #tpu.memory_space<vmem>>, %arg9: memref<1x1xf32, #tpu.memory_space<vmem>>, %arg10: memref<1x1x2xf32, #tpu.memory_space<vmem>>) attributes {dimension_semantics = [#tpu.dimension_semantics<parallel>], iteration_bounds = array<i64: 1>, scalar_prefetch = 0 : i64, scratch_operands = 0 : i64, tpu.core_type = #tpu.core_type<tc>, window_params = [{transform_indices = @transform_0, window_bounds = array<i64: 32, 13>}, {pipeline_mode = #tpu.pipeline_mode<synchronous>, transform_indices = @transform_1, window_bounds = array<i64: 13, 32>}, {pipeline_mode = #tpu.pipeline_mode<synchronous>, transform_indices = @transform_2, window_bounds = array<i64: 2, 32, 96>}, {pipeline_mode = #tpu.pipeline_mode<synchronous>, transform_indices = @transform_3, window_bounds = array<i64: 2, 32, 32>}, {pipeline_mode = #tpu.pipeline_mode<synchronous>, transform_indices = @transform_4, window_bounds = array<i64: 2, 32, 64>}, {pipeline_mode = #tpu.pipeline_mode<synchronous>, transform_indices = @transform_5, window_bounds = array<i64: 2, 64, 32>}, {pipeline_mode = #tpu.pipeline_mode<synchronous>, transform_indices = @transform_6, window_bounds = array<i64: 2, 8, 128>}, {pipeline_mode = #tpu.pipeline_mode<synchronous>, transform_indices = @transform_7, window_bounds = array<i64: 1, 32>}, {pipeline_mode = #tpu.pipeline_mode<synchronous>, transform_indices = @transform_8, window_bounds = array<i64: 1, 1>}, {transform_indices = @transform_9, window_bounds = array<i64: 1, 1, 2>}]} {
    %c0 = arith.constant 0 : index
    %c0_0 = arith.constant 0 : index
    %0 = vector.load %arg1[%c0, %c0_0] : memref<32x13xbf16, #tpu.memory_space<vmem>>, vector<32x13xbf16>
    %c0_1 = arith.constant 0 : index
    %c0_2 = arith.constant 0 : index
    %1 = vector.load %arg2[%c0_1, %c0_2] : memref<13x32xbf16, #tpu.memory_space<vmem>>, vector<13x32xbf16>
    %cst = arith.constant dense<0.000000e+00> : vector<32x32xf32>
    %2 = tpu.matmul %0, %1, %cst {dimension_numbers = #tpu.dot_dimension_numbers<[1], [0], [0], [1], [0, 0, 1, 1], [], []>} : vector<32x13xbf16>, vector<13x32xbf16>, vector<32x32xf32> -> vector<32x32xf32>
    %cst_3 = arith.constant 0.000000e+00 : f32
    %3 = vector.broadcast %cst_3 : f32 to vector<32x32xf32>
    %4 = arith.maximumf %2, %3 : vector<32x32xf32>
    %c0_4 = arith.constant 0 : index
    %c0_5 = arith.constant 0 : index
    %c0_6 = arith.constant 0 : index
    %5 = vector.load %arg7[%c0_4, %c0_5, %c0_6] : memref<2x8x128xf32, #tpu.memory_space<vmem>>, vector<1x8x128xf32>
    %6 = vector.shape_cast %5 : vector<1x8x128xf32> to vector<8x128xf32>
    %7 = vector.extract_strided_slice %6 {offsets = [0, 0], sizes = [1, 96], strides = [1, 1]} : vector<8x128xf32> to vector<1x96xf32>
    %8 = vector.extract_strided_slice %6 {offsets = [1, 0], sizes = [1, 32], strides = [1, 1]} : vector<8x128xf32> to vector<1x32xf32>
    %9 = vector.extract_strided_slice %6 {offsets = [2, 0], sizes = [1, 64], strides = [1, 1]} : vector<8x128xf32> to vector<1x64xf32>
    %10 = vector.extract_strided_slice %6 {offsets = [3, 0], sizes = [1, 32], strides = [1, 1]} : vector<8x128xf32> to vector<1x32xf32>
    %11 = vector.extract_strided_slice %6 {offsets = [4, 0], sizes = [1, 32], strides = [1, 1]} : vector<8x128xf32> to vector<1x32xf32>
    %12 = vector.extract_strided_slice %6 {offsets = [5, 0], sizes = [1, 32], strides = [1, 1]} : vector<8x128xf32> to vector<1x32xf32>
    %13 = vector.extract_strided_slice %6 {offsets = [6, 0], sizes = [1, 32], strides = [1, 1]} : vector<8x128xf32> to vector<1x32xf32>
    %14 = vector.extract_strided_slice %6 {offsets = [7, 0], sizes = [1, 32], strides = [1, 1]} : vector<8x128xf32> to vector<1x32xf32>
    %c0_7 = arith.constant 0 : index
    %c0_8 = arith.constant 0 : index
    %c0_9 = arith.constant 0 : index
    %15 = vector.load %arg3[%c0_7, %c0_8, %c0_9] : memref<2x32x96xbf16, #tpu.memory_space<vmem>>, vector<1x32x96xbf16>
    %16 = vector.shape_cast %15 : vector<1x32x96xbf16> to vector<32x96xbf16>
    %17 = arith.truncf %4 : vector<32x32xf32> to vector<32x32xbf16>
    %cst_10 = arith.constant dense<0.000000e+00> : vector<32x96xf32>
    %18 = tpu.matmul %17, %16, %cst_10 {dimension_numbers = #tpu.dot_dimension_numbers<[1], [0], [0], [1], [0, 0, 1, 1], [], []>} : vector<32x32xbf16>, vector<32x96xbf16>, vector<32x96xf32> -> vector<32x96xf32>
    %19 = vector.broadcast %7 : vector<1x96xf32> to vector<32x96xf32>
    %20 = arith.addf %18, %19 : vector<32x96xf32>
    %21 = vector.extract_strided_slice %20 {offsets = [0, 0], sizes = [32, 32], strides = [1, 1]} : vector<32x96xf32> to vector<32x32xf32>
    %22 = vector.shape_cast %21 : vector<32x32xf32> to vector<2x16x32xf32>
    %23 = vector.extract_strided_slice %20 {offsets = [0, 32], sizes = [32, 32], strides = [1, 1]} : vector<32x96xf32> to vector<32x32xf32>
    %24 = vector.shape_cast %23 : vector<32x32xf32> to vector<2x16x32xf32>
    %25 = vector.extract_strided_slice %20 {offsets = [0, 64], sizes = [32, 32], strides = [1, 1]} : vector<32x96xf32> to vector<32x32xf32>
    %26 = vector.shape_cast %25 : vector<32x32xf32> to vector<2x16x32xf32>
    %27 = vector.extract_strided_slice %22 {offsets = [0, 0, 0], sizes = [2, 16, 8], strides = [1, 1, 1]} : vector<2x16x32xf32> to vector<2x16x8xf32>
    %28 = vector.extract_strided_slice %24 {offsets = [0, 0, 0], sizes = [2, 16, 8], strides = [1, 1, 1]} : vector<2x16x32xf32> to vector<2x16x8xf32>
    %29 = vector.extract_strided_slice %26 {offsets = [0, 0, 0], sizes = [2, 16, 8], strides = [1, 1, 1]} : vector<2x16x32xf32> to vector<2x16x8xf32>
    "tpu.trace_start"() <{level = 10 : i32, message = "bqd,bkd->bqk"}> : () -> ()
    %cst_11 = arith.constant dense<0.000000e+00> : vector<2x16x16xf32>
    %30 = tpu.matmul %27, %28, %cst_11 {dimension_numbers = #tpu.dot_dimension_numbers<[2], [2], [1], [1], [0, 0, 0, 1, 1, 1], [0], [0]>} : vector<2x16x8xf32>, vector<2x16x8xf32>, vector<2x16x16xf32> -> vector<2x16x16xf32>
    "tpu.trace_stop"() : () -> ()
    %cst_12 = arith.constant dense<0xFF800000> : vector<2x16xf32>
    %31 = vector.multi_reduction <maximumf>, %30, %cst_12 [2] : vector<2x16x16xf32> to vector<2x16xf32>
    %32 = vector.shape_cast %31 : vector<2x16xf32> to vector<2x16x1xf32>
    %33 = vector.broadcast %32 : vector<2x16x1xf32> to vector<2x16x16xf32>
    %34 = arith.subf %30, %33 : vector<2x16x16xf32>
    %35 = math.exp %34 : vector<2x16x16xf32>
    %cst_13 = arith.constant dense<0.000000e+00> : vector<2x16xf32>
    %36 = vector.multi_reduction <add>, %35, %cst_13 [2] : vector<2x16x16xf32> to vector<2x16xf32>
    %37 = vector.shape_cast %36 : vector<2x16xf32> to vector<2x16x1xf32>
    %38 = tpu.reciprocal %37 {approx = true} : vector<2x16x1xf32> -> vector<2x16x1xf32>
    %39 = vector.broadcast %38 : vector<2x16x1xf32> to vector<2x16x16xf32>
    %40 = arith.mulf %35, %39 : vector<2x16x16xf32>
    "tpu.trace_start"() <{level = 10 : i32, message = "bqk,bkd->bqd"}> : () -> ()
    %cst_14 = arith.constant dense<0.000000e+00> : vector<2x16x8xf32>
    %41 = tpu.matmul %40, %29, %cst_14 {dimension_numbers = #tpu.dot_dimension_numbers<[2], [1], [1], [2], [0, 0, 0, 1, 1, 2], [0], [0]>} : vector<2x16x16xf32>, vector<2x16x8xf32>, vector<2x16x8xf32> -> vector<2x16x8xf32>
    "tpu.trace_stop"() : () -> ()
    %42 = vector.shape_cast %41 : vector<2x16x8xf32> to vector<32x8xf32>
    %43 = vector.extract_strided_slice %22 {offsets = [0, 0, 8], sizes = [2, 16, 8], strides = [1, 1, 1]} : vector<2x16x32xf32> to vector<2x16x8xf32>
    %44 = vector.extract_strided_slice %24 {offsets = [0, 0, 8], sizes = [2, 16, 8], strides = [1, 1, 1]} : vector<2x16x32xf32> to vector<2x16x8xf32>
    %45 = vector.extract_strided_slice %26 {offsets = [0, 0, 8], sizes = [2, 16, 8], strides = [1, 1, 1]} : vector<2x16x32xf32> to vector<2x16x8xf32>
    "tpu.trace_start"() <{level = 10 : i32, message = "bqd,bkd->bqk"}> : () -> ()
    %cst_15 = arith.constant dense<0.000000e+00> : vector<2x16x16xf32>
    %46 = tpu.matmul %43, %44, %cst_15 {dimension_numbers = #tpu.dot_dimension_numbers<[2], [2], [1], [1], [0, 0, 0, 1, 1, 1], [0], [0]>} : vector<2x16x8xf32>, vector<2x16x8xf32>, vector<2x16x16xf32> -> vector<2x16x16xf32>
    "tpu.trace_stop"() : () -> ()
    %cst_16 = arith.constant dense<0xFF800000> : vector<2x16xf32>
    %47 = vector.multi_reduction <maximumf>, %46, %cst_16 [2] : vector<2x16x16xf32> to vector<2x16xf32>
    %48 = vector.shape_cast %47 : vector<2x16xf32> to vector<2x16x1xf32>
    %49 = vector.broadcast %48 : vector<2x16x1xf32> to vector<2x16x16xf32>
    %50 = arith.subf %46, %49 : vector<2x16x16xf32>
    %51 = math.exp %50 : vector<2x16x16xf32>
    %cst_17 = arith.constant dense<0.000000e+00> : vector<2x16xf32>
    %52 = vector.multi_reduction <add>, %51, %cst_17 [2] : vector<2x16x16xf32> to vector<2x16xf32>
    %53 = vector.shape_cast %52 : vector<2x16xf32> to vector<2x16x1xf32>
    %54 = tpu.reciprocal %53 {approx = true} : vector<2x16x1xf32> -> vector<2x16x1xf32>
    %55 = vector.broadcast %54 : vector<2x16x1xf32> to vector<2x16x16xf32>
    %56 = arith.mulf %51, %55 : vector<2x16x16xf32>
    "tpu.trace_start"() <{level = 10 : i32, message = "bqk,bkd->bqd"}> : () -> ()
    %cst_18 = arith.constant dense<0.000000e+00> : vector<2x16x8xf32>
    %57 = tpu.matmul %56, %45, %cst_18 {dimension_numbers = #tpu.dot_dimension_numbers<[2], [1], [1], [2], [0, 0, 0, 1, 1, 2], [0], [0]>} : vector<2x16x16xf32>, vector<2x16x8xf32>, vector<2x16x8xf32> -> vector<2x16x8xf32>
    "tpu.trace_stop"() : () -> ()
    %58 = vector.shape_cast %57 : vector<2x16x8xf32> to vector<32x8xf32>
    %59 = vector.extract_strided_slice %22 {offsets = [0, 0, 16], sizes = [2, 16, 8], strides = [1, 1, 1]} : vector<2x16x32xf32> to vector<2x16x8xf32>
    %60 = vector.extract_strided_slice %24 {offsets = [0, 0, 16], sizes = [2, 16, 8], strides = [1, 1, 1]} : vector<2x16x32xf32> to vector<2x16x8xf32>
    %61 = vector.extract_strided_slice %26 {offsets = [0, 0, 16], sizes = [2, 16, 8], strides = [1, 1, 1]} : vector<2x16x32xf32> to vector<2x16x8xf32>
    "tpu.trace_start"() <{level = 10 : i32, message = "bqd,bkd->bqk"}> : () -> ()
    %cst_19 = arith.constant dense<0.000000e+00> : vector<2x16x16xf32>
    %62 = tpu.matmul %59, %60, %cst_19 {dimension_numbers = #tpu.dot_dimension_numbers<[2], [2], [1], [1], [0, 0, 0, 1, 1, 1], [0], [0]>} : vector<2x16x8xf32>, vector<2x16x8xf32>, vector<2x16x16xf32> -> vector<2x16x16xf32>
    "tpu.trace_stop"() : () -> ()
    %cst_20 = arith.constant dense<0xFF800000> : vector<2x16xf32>
    %63 = vector.multi_reduction <maximumf>, %62, %cst_20 [2] : vector<2x16x16xf32> to vector<2x16xf32>
    %64 = vector.shape_cast %63 : vector<2x16xf32> to vector<2x16x1xf32>
    %65 = vector.broadcast %64 : vector<2x16x1xf32> to vector<2x16x16xf32>
    %66 = arith.subf %62, %65 : vector<2x16x16xf32>
    %67 = math.exp %66 : vector<2x16x16xf32>
    %cst_21 = arith.constant dense<0.000000e+00> : vector<2x16xf32>
    %68 = vector.multi_reduction <add>, %67, %cst_21 [2] : vector<2x16x16xf32> to vector<2x16xf32>
    %69 = vector.shape_cast %68 : vector<2x16xf32> to vector<2x16x1xf32>
    %70 = tpu.reciprocal %69 {approx = true} : vector<2x16x1xf32> -> vector<2x16x1xf32>
    %71 = vector.broadcast %70 : vector<2x16x1xf32> to vector<2x16x16xf32>
    %72 = arith.mulf %67, %71 : vector<2x16x16xf32>
    "tpu.trace_start"() <{level = 10 : i32, message = "bqk,bkd->bqd"}> : () -> ()
    %cst_22 = arith.constant dense<0.000000e+00> : vector<2x16x8xf32>
    %73 = tpu.matmul %72, %61, %cst_22 {dimension_numbers = #tpu.dot_dimension_numbers<[2], [1], [1], [2], [0, 0, 0, 1, 1, 2], [0], [0]>} : vector<2x16x16xf32>, vector<2x16x8xf32>, vector<2x16x8xf32> -> vector<2x16x8xf32>
    "tpu.trace_stop"() : () -> ()
    %74 = vector.shape_cast %73 : vector<2x16x8xf32> to vector<32x8xf32>
    %75 = vector.extract_strided_slice %22 {offsets = [0, 0, 24], sizes = [2, 16, 8], strides = [1, 1, 1]} : vector<2x16x32xf32> to vector<2x16x8xf32>
    %76 = vector.extract_strided_slice %24 {offsets = [0, 0, 24], sizes = [2, 16, 8], strides = [1, 1, 1]} : vector<2x16x32xf32> to vector<2x16x8xf32>
    %77 = vector.extract_strided_slice %26 {offsets = [0, 0, 24], sizes = [2, 16, 8], strides = [1, 1, 1]} : vector<2x16x32xf32> to vector<2x16x8xf32>
    "tpu.trace_start"() <{level = 10 : i32, message = "bqd,bkd->bqk"}> : () -> ()
    %cst_23 = arith.constant dense<0.000000e+00> : vector<2x16x16xf32>
    %78 = tpu.matmul %75, %76, %cst_23 {dimension_numbers = #tpu.dot_dimension_numbers<[2], [2], [1], [1], [0, 0, 0, 1, 1, 1], [0], [0]>} : vector<2x16x8xf32>, vector<2x16x8xf32>, vector<2x16x16xf32> -> vector<2x16x16xf32>
    "tpu.trace_stop"() : () -> ()
    %cst_24 = arith.constant dense<0xFF800000> : vector<2x16xf32>
    %79 = vector.multi_reduction <maximumf>, %78, %cst_24 [2] : vector<2x16x16xf32> to vector<2x16xf32>
    %80 = vector.shape_cast %79 : vector<2x16xf32> to vector<2x16x1xf32>
    %81 = vector.broadcast %80 : vector<2x16x1xf32> to vector<2x16x16xf32>
    %82 = arith.subf %78, %81 : vector<2x16x16xf32>
    %83 = math.exp %82 : vector<2x16x16xf32>
    %cst_25 = arith.constant dense<0.000000e+00> : vector<2x16xf32>
    %84 = vector.multi_reduction <add>, %83, %cst_25 [2] : vector<2x16x16xf32> to vector<2x16xf32>
    %85 = vector.shape_cast %84 : vector<2x16xf32> to vector<2x16x1xf32>
    %86 = tpu.reciprocal %85 {approx = true} : vector<2x16x1xf32> -> vector<2x16x1xf32>
    %87 = vector.broadcast %86 : vector<2x16x1xf32> to vector<2x16x16xf32>
    %88 = arith.mulf %83, %87 : vector<2x16x16xf32>
    "tpu.trace_start"() <{level = 10 : i32, message = "bqk,bkd->bqd"}> : () -> ()
    %cst_26 = arith.constant dense<0.000000e+00> : vector<2x16x8xf32>
    %89 = tpu.matmul %88, %77, %cst_26 {dimension_numbers = #tpu.dot_dimension_numbers<[2], [1], [1], [2], [0, 0, 0, 1, 1, 2], [0], [0]>} : vector<2x16x16xf32>, vector<2x16x8xf32>, vector<2x16x8xf32> -> vector<2x16x8xf32>
    "tpu.trace_stop"() : () -> ()
    %90 = vector.shape_cast %89 : vector<2x16x8xf32> to vector<32x8xf32>
    %91 = tpu.concatenate %42, %58, %74, %90 in 1 : vector<32x8xf32>, vector<32x8xf32>, vector<32x8xf32>, vector<32x8xf32> -> vector<32x32xf32>
    %c0_27 = arith.constant 0 : index
    %c0_28 = arith.constant 0 : index
    %c0_29 = arith.constant 0 : index
    %92 = vector.load %arg4[%c0_27, %c0_28, %c0_29] : memref<2x32x32xbf16, #tpu.memory_space<vmem>>, vector<1x32x32xbf16>
    %93 = vector.shape_cast %92 : vector<1x32x32xbf16> to vector<32x32xbf16>
    %94 = arith.truncf %91 : vector<32x32xf32> to vector<32x32xbf16>
    %cst_30 = arith.constant dense<0.000000e+00> : vector<32x32xf32>
    %95 = tpu.matmul %94, %93, %cst_30 {dimension_numbers = #tpu.dot_dimension_numbers<[1], [0], [0], [1], [0, 0, 1, 1], [], []>} : vector<32x32xbf16>, vector<32x32xbf16>, vector<32x32xf32> -> vector<32x32xf32>
    %96 = arith.addf %4, %95 : vector<32x32xf32>
    %97 = vector.broadcast %8 : vector<1x32xf32> to vector<32x32xf32>
    %98 = arith.addf %96, %97 : vector<32x32xf32>
    %cst_31 = arith.constant dense<0.000000e+00> : vector<32xf32>
    %99 = vector.multi_reduction <add>, %98, %cst_31 [1] : vector<32x32xf32> to vector<32xf32>
    %100 = vector.shape_cast %99 : vector<32xf32> to vector<32x1xf32>
    %cst_32 = arith.constant 3.200000e+01 : f32
    %101 = vector.broadcast %cst_32 : f32 to vector<32x1xf32>
    %102 = arith.divf %100, %101 : vector<32x1xf32>
    %103 = vector.broadcast %102 : vector<32x1xf32> to vector<32x32xf32>
    %104 = arith.subf %98, %103 : vector<32x32xf32>
    %105 = arith.mulf %104, %104 : vector<32x32xf32>
    %cst_33 = arith.constant dense<0.000000e+00> : vector<32xf32>
    %106 = vector.multi_reduction <add>, %105, %cst_33 [1] : vector<32x32xf32> to vector<32xf32>
    %107 = vector.shape_cast %106 : vector<32xf32> to vector<32x1xf32>
    %cst_34 = arith.constant 3.200000e+01 : f32
    %108 = vector.broadcast %cst_34 : f32 to vector<32x1xf32>
    %109 = arith.divf %107, %108 : vector<32x1xf32>
    %cst_35 = arith.constant 9.99999974E-6 : f32
    %110 = vector.broadcast %cst_35 : f32 to vector<32x1xf32>
    %111 = arith.addf %109, %110 : vector<32x1xf32>
    %112 = math.rsqrt %111 : vector<32x1xf32>
    %113 = vector.broadcast %112 : vector<32x1xf32> to vector<32x32xf32>
    %114 = arith.mulf %104, %113 : vector<32x32xf32>
    %115 = vector.broadcast %11 : vector<1x32xf32> to vector<32x32xf32>
    %116 = arith.mulf %114, %115 : vector<32x32xf32>
    %117 = vector.broadcast %12 : vector<1x32xf32> to vector<32x32xf32>
    %118 = arith.addf %116, %117 : vector<32x32xf32>
    %c0_36 = arith.constant 0 : index
    %c0_37 = arith.constant 0 : index
    %c0_38 = arith.constant 0 : index
    %119 = vector.load %arg5[%c0_36, %c0_37, %c0_38] : memref<2x32x64xbf16, #tpu.memory_space<vmem>>, vector<1x32x64xbf16>
    %120 = vector.shape_cast %119 : vector<1x32x64xbf16> to vector<32x64xbf16>
    %121 = arith.truncf %118 : vector<32x32xf32> to vector<32x32xbf16>
    %cst_39 = arith.constant dense<0.000000e+00> : vector<32x64xf32>
    %122 = tpu.matmul %121, %120, %cst_39 {dimension_numbers = #tpu.dot_dimension_numbers<[1], [0], [0], [1], [0, 0, 1, 1], [], []>} : vector<32x32xbf16>, vector<32x64xbf16>, vector<32x64xf32> -> vector<32x64xf32>
    %123 = vector.broadcast %9 : vector<1x64xf32> to vector<32x64xf32>
    %124 = arith.addf %122, %123 : vector<32x64xf32>
    %cst_40 = arith.constant 0.000000e+00 : f32
    %125 = vector.broadcast %cst_40 : f32 to vector<32x64xf32>
    %126 = arith.maximumf %124, %125 : vector<32x64xf32>
    %c0_41 = arith.constant 0 : index
    %c0_42 = arith.constant 0 : index
    %c0_43 = arith.constant 0 : index
    %127 = vector.load %arg6[%c0_41, %c0_42, %c0_43] : memref<2x64x32xbf16, #tpu.memory_space<vmem>>, vector<1x64x32xbf16>
    %128 = vector.shape_cast %127 : vector<1x64x32xbf16> to vector<64x32xbf16>
    %129 = arith.truncf %126 : vector<32x64xf32> to vector<32x64xbf16>
    %cst_44 = arith.constant dense<0.000000e+00> : vector<32x32xf32>
    %130 = tpu.matmul %129, %128, %cst_44 {dimension_numbers = #tpu.dot_dimension_numbers<[1], [0], [0], [1], [0, 0, 1, 1], [], []>} : vector<32x64xbf16>, vector<64x32xbf16>, vector<32x32xf32> -> vector<32x32xf32>
    %131 = vector.broadcast %10 : vector<1x32xf32> to vector<32x32xf32>
    %132 = arith.addf %130, %131 : vector<32x32xf32>
    %133 = arith.addf %118, %132 : vector<32x32xf32>
    %cst_45 = arith.constant dense<0.000000e+00> : vector<32xf32>
    %134 = vector.multi_reduction <add>, %133, %cst_45 [1] : vector<32x32xf32> to vector<32xf32>
    %135 = vector.shape_cast %134 : vector<32xf32> to vector<32x1xf32>
    %cst_46 = arith.constant 3.200000e+01 : f32
    %136 = vector.broadcast %cst_46 : f32 to vector<32x1xf32>
    %137 = arith.divf %135, %136 : vector<32x1xf32>
    %138 = vector.broadcast %137 : vector<32x1xf32> to vector<32x32xf32>
    %139 = arith.subf %133, %138 : vector<32x32xf32>
    %140 = arith.mulf %139, %139 : vector<32x32xf32>
    %cst_47 = arith.constant dense<0.000000e+00> : vector<32xf32>
    %141 = vector.multi_reduction <add>, %140, %cst_47 [1] : vector<32x32xf32> to vector<32xf32>
    %142 = vector.shape_cast %141 : vector<32xf32> to vector<32x1xf32>
    %cst_48 = arith.constant 3.200000e+01 : f32
    %143 = vector.broadcast %cst_48 : f32 to vector<32x1xf32>
    %144 = arith.divf %142, %143 : vector<32x1xf32>
    %cst_49 = arith.constant 9.99999974E-6 : f32
    %145 = vector.broadcast %cst_49 : f32 to vector<32x1xf32>
    %146 = arith.addf %144, %145 : vector<32x1xf32>
    %147 = math.rsqrt %146 : vector<32x1xf32>
    %148 = vector.broadcast %147 : vector<32x1xf32> to vector<32x32xf32>
    %149 = arith.mulf %139, %148 : vector<32x32xf32>
    %150 = vector.broadcast %13 : vector<1x32xf32> to vector<32x32xf32>
    %151 = arith.mulf %149, %150 : vector<32x32xf32>
    %152 = vector.broadcast %14 : vector<1x32xf32> to vector<32x32xf32>
    %153 = arith.addf %151, %152 : vector<32x32xf32>
    %c1 = arith.constant 1 : index
    %c0_50 = arith.constant 0 : index
    %c0_51 = arith.constant 0 : index
    %154 = vector.load %arg7[%c1, %c0_50, %c0_51] : memref<2x8x128xf32, #tpu.memory_space<vmem>>, vector<1x8x128xf32>
    %155 = vector.shape_cast %154 : vector<1x8x128xf32> to vector<8x128xf32>
    %156 = vector.extract_strided_slice %155 {offsets = [0, 0], sizes = [1, 96], strides = [1, 1]} : vector<8x128xf32> to vector<1x96xf32>
    %157 = vector.extract_strided_slice %155 {offsets = [1, 0], sizes = [1, 32], strides = [1, 1]} : vector<8x128xf32> to vector<1x32xf32>
    %158 = vector.extract_strided_slice %155 {offsets = [2, 0], sizes = [1, 64], strides = [1, 1]} : vector<8x128xf32> to vector<1x64xf32>
    %159 = vector.extract_strided_slice %155 {offsets = [3, 0], sizes = [1, 32], strides = [1, 1]} : vector<8x128xf32> to vector<1x32xf32>
    %160 = vector.extract_strided_slice %155 {offsets = [4, 0], sizes = [1, 32], strides = [1, 1]} : vector<8x128xf32> to vector<1x32xf32>
    %161 = vector.extract_strided_slice %155 {offsets = [5, 0], sizes = [1, 32], strides = [1, 1]} : vector<8x128xf32> to vector<1x32xf32>
    %162 = vector.extract_strided_slice %155 {offsets = [6, 0], sizes = [1, 32], strides = [1, 1]} : vector<8x128xf32> to vector<1x32xf32>
    %163 = vector.extract_strided_slice %155 {offsets = [7, 0], sizes = [1, 32], strides = [1, 1]} : vector<8x128xf32> to vector<1x32xf32>
    %c1_52 = arith.constant 1 : index
    %c0_53 = arith.constant 0 : index
    %c0_54 = arith.constant 0 : index
    %164 = vector.load %arg3[%c1_52, %c0_53, %c0_54] : memref<2x32x96xbf16, #tpu.memory_space<vmem>>, vector<1x32x96xbf16>
    %165 = vector.shape_cast %164 : vector<1x32x96xbf16> to vector<32x96xbf16>
    %166 = arith.truncf %153 : vector<32x32xf32> to vector<32x32xbf16>
    %cst_55 = arith.constant dense<0.000000e+00> : vector<32x96xf32>
    %167 = tpu.matmul %166, %165, %cst_55 {dimension_numbers = #tpu.dot_dimension_numbers<[1], [0], [0], [1], [0, 0, 1, 1], [], []>} : vector<32x32xbf16>, vector<32x96xbf16>, vector<32x96xf32> -> vector<32x96xf32>
    %168 = vector.broadcast %156 : vector<1x96xf32> to vector<32x96xf32>
    %169 = arith.addf %167, %168 : vector<32x96xf32>
    %170 = vector.extract_strided_slice %169 {offsets = [0, 0], sizes = [32, 32], strides = [1, 1]} : vector<32x96xf32> to vector<32x32xf32>
    %171 = vector.shape_cast %170 : vector<32x32xf32> to vector<2x16x32xf32>
    %172 = vector.extract_strided_slice %169 {offsets = [0, 32], sizes = [32, 32], strides = [1, 1]} : vector<32x96xf32> to vector<32x32xf32>
    %173 = vector.shape_cast %172 : vector<32x32xf32> to vector<2x16x32xf32>
    %174 = vector.extract_strided_slice %169 {offsets = [0, 64], sizes = [32, 32], strides = [1, 1]} : vector<32x96xf32> to vector<32x32xf32>
    %175 = vector.shape_cast %174 : vector<32x32xf32> to vector<2x16x32xf32>
    %176 = vector.extract_strided_slice %171 {offsets = [0, 0, 0], sizes = [2, 16, 8], strides = [1, 1, 1]} : vector<2x16x32xf32> to vector<2x16x8xf32>
    %177 = vector.extract_strided_slice %173 {offsets = [0, 0, 0], sizes = [2, 16, 8], strides = [1, 1, 1]} : vector<2x16x32xf32> to vector<2x16x8xf32>
    %178 = vector.extract_strided_slice %175 {offsets = [0, 0, 0], sizes = [2, 16, 8], strides = [1, 1, 1]} : vector<2x16x32xf32> to vector<2x16x8xf32>
    "tpu.trace_start"() <{level = 10 : i32, message = "bqd,bkd->bqk"}> : () -> ()
    %cst_56 = arith.constant dense<0.000000e+00> : vector<2x16x16xf32>
    %179 = tpu.matmul %176, %177, %cst_56 {dimension_numbers = #tpu.dot_dimension_numbers<[2], [2], [1], [1], [0, 0, 0, 1, 1, 1], [0], [0]>} : vector<2x16x8xf32>, vector<2x16x8xf32>, vector<2x16x16xf32> -> vector<2x16x16xf32>
    "tpu.trace_stop"() : () -> ()
    %cst_57 = arith.constant dense<0xFF800000> : vector<2x16xf32>
    %180 = vector.multi_reduction <maximumf>, %179, %cst_57 [2] : vector<2x16x16xf32> to vector<2x16xf32>
    %181 = vector.shape_cast %180 : vector<2x16xf32> to vector<2x16x1xf32>
    %182 = vector.broadcast %181 : vector<2x16x1xf32> to vector<2x16x16xf32>
    %183 = arith.subf %179, %182 : vector<2x16x16xf32>
    %184 = math.exp %183 : vector<2x16x16xf32>
    %cst_58 = arith.constant dense<0.000000e+00> : vector<2x16xf32>
    %185 = vector.multi_reduction <add>, %184, %cst_58 [2] : vector<2x16x16xf32> to vector<2x16xf32>
    %186 = vector.shape_cast %185 : vector<2x16xf32> to vector<2x16x1xf32>
    %187 = tpu.reciprocal %186 {approx = true} : vector<2x16x1xf32> -> vector<2x16x1xf32>
    %188 = vector.broadcast %187 : vector<2x16x1xf32> to vector<2x16x16xf32>
    %189 = arith.mulf %184, %188 : vector<2x16x16xf32>
    "tpu.trace_start"() <{level = 10 : i32, message = "bqk,bkd->bqd"}> : () -> ()
    %cst_59 = arith.constant dense<0.000000e+00> : vector<2x16x8xf32>
    %190 = tpu.matmul %189, %178, %cst_59 {dimension_numbers = #tpu.dot_dimension_numbers<[2], [1], [1], [2], [0, 0, 0, 1, 1, 2], [0], [0]>} : vector<2x16x16xf32>, vector<2x16x8xf32>, vector<2x16x8xf32> -> vector<2x16x8xf32>
    "tpu.trace_stop"() : () -> ()
    %191 = vector.shape_cast %190 : vector<2x16x8xf32> to vector<32x8xf32>
    %192 = vector.extract_strided_slice %171 {offsets = [0, 0, 8], sizes = [2, 16, 8], strides = [1, 1, 1]} : vector<2x16x32xf32> to vector<2x16x8xf32>
    %193 = vector.extract_strided_slice %173 {offsets = [0, 0, 8], sizes = [2, 16, 8], strides = [1, 1, 1]} : vector<2x16x32xf32> to vector<2x16x8xf32>
    %194 = vector.extract_strided_slice %175 {offsets = [0, 0, 8], sizes = [2, 16, 8], strides = [1, 1, 1]} : vector<2x16x32xf32> to vector<2x16x8xf32>
    "tpu.trace_start"() <{level = 10 : i32, message = "bqd,bkd->bqk"}> : () -> ()
    %cst_60 = arith.constant dense<0.000000e+00> : vector<2x16x16xf32>
    %195 = tpu.matmul %192, %193, %cst_60 {dimension_numbers = #tpu.dot_dimension_numbers<[2], [2], [1], [1], [0, 0, 0, 1, 1, 1], [0], [0]>} : vector<2x16x8xf32>, vector<2x16x8xf32>, vector<2x16x16xf32> -> vector<2x16x16xf32>
    "tpu.trace_stop"() : () -> ()
    %cst_61 = arith.constant dense<0xFF800000> : vector<2x16xf32>
    %196 = vector.multi_reduction <maximumf>, %195, %cst_61 [2] : vector<2x16x16xf32> to vector<2x16xf32>
    %197 = vector.shape_cast %196 : vector<2x16xf32> to vector<2x16x1xf32>
    %198 = vector.broadcast %197 : vector<2x16x1xf32> to vector<2x16x16xf32>
    %199 = arith.subf %195, %198 : vector<2x16x16xf32>
    %200 = math.exp %199 : vector<2x16x16xf32>
    %cst_62 = arith.constant dense<0.000000e+00> : vector<2x16xf32>
    %201 = vector.multi_reduction <add>, %200, %cst_62 [2] : vector<2x16x16xf32> to vector<2x16xf32>
    %202 = vector.shape_cast %201 : vector<2x16xf32> to vector<2x16x1xf32>
    %203 = tpu.reciprocal %202 {approx = true} : vector<2x16x1xf32> -> vector<2x16x1xf32>
    %204 = vector.broadcast %203 : vector<2x16x1xf32> to vector<2x16x16xf32>
    %205 = arith.mulf %200, %204 : vector<2x16x16xf32>
    "tpu.trace_start"() <{level = 10 : i32, message = "bqk,bkd->bqd"}> : () -> ()
    %cst_63 = arith.constant dense<0.000000e+00> : vector<2x16x8xf32>
    %206 = tpu.matmul %205, %194, %cst_63 {dimension_numbers = #tpu.dot_dimension_numbers<[2], [1], [1], [2], [0, 0, 0, 1, 1, 2], [0], [0]>} : vector<2x16x16xf32>, vector<2x16x8xf32>, vector<2x16x8xf32> -> vector<2x16x8xf32>
    "tpu.trace_stop"() : () -> ()
    %207 = vector.shape_cast %206 : vector<2x16x8xf32> to vector<32x8xf32>
    %208 = vector.extract_strided_slice %171 {offsets = [0, 0, 16], sizes = [2, 16, 8], strides = [1, 1, 1]} : vector<2x16x32xf32> to vector<2x16x8xf32>
    %209 = vector.extract_strided_slice %173 {offsets = [0, 0, 16], sizes = [2, 16, 8], strides = [1, 1, 1]} : vector<2x16x32xf32> to vector<2x16x8xf32>
    %210 = vector.extract_strided_slice %175 {offsets = [0, 0, 16], sizes = [2, 16, 8], strides = [1, 1, 1]} : vector<2x16x32xf32> to vector<2x16x8xf32>
    "tpu.trace_start"() <{level = 10 : i32, message = "bqd,bkd->bqk"}> : () -> ()
    %cst_64 = arith.constant dense<0.000000e+00> : vector<2x16x16xf32>
    %211 = tpu.matmul %208, %209, %cst_64 {dimension_numbers = #tpu.dot_dimension_numbers<[2], [2], [1], [1], [0, 0, 0, 1, 1, 1], [0], [0]>} : vector<2x16x8xf32>, vector<2x16x8xf32>, vector<2x16x16xf32> -> vector<2x16x16xf32>
    "tpu.trace_stop"() : () -> ()
    %cst_65 = arith.constant dense<0xFF800000> : vector<2x16xf32>
    %212 = vector.multi_reduction <maximumf>, %211, %cst_65 [2] : vector<2x16x16xf32> to vector<2x16xf32>
    %213 = vector.shape_cast %212 : vector<2x16xf32> to vector<2x16x1xf32>
    %214 = vector.broadcast %213 : vector<2x16x1xf32> to vector<2x16x16xf32>
    %215 = arith.subf %211, %214 : vector<2x16x16xf32>
    %216 = math.exp %215 : vector<2x16x16xf32>
    %cst_66 = arith.constant dense<0.000000e+00> : vector<2x16xf32>
    %217 = vector.multi_reduction <add>, %216, %cst_66 [2] : vector<2x16x16xf32> to vector<2x16xf32>
    %218 = vector.shape_cast %217 : vector<2x16xf32> to vector<2x16x1xf32>
    %219 = tpu.reciprocal %218 {approx = true} : vector<2x16x1xf32> -> vector<2x16x1xf32>
    %220 = vector.broadcast %219 : vector<2x16x1xf32> to vector<2x16x16xf32>
    %221 = arith.mulf %216, %220 : vector<2x16x16xf32>
    "tpu.trace_start"() <{level = 10 : i32, message = "bqk,bkd->bqd"}> : () -> ()
    %cst_67 = arith.constant dense<0.000000e+00> : vector<2x16x8xf32>
    %222 = tpu.matmul %221, %210, %cst_67 {dimension_numbers = #tpu.dot_dimension_numbers<[2], [1], [1], [2], [0, 0, 0, 1, 1, 2], [0], [0]>} : vector<2x16x16xf32>, vector<2x16x8xf32>, vector<2x16x8xf32> -> vector<2x16x8xf32>
    "tpu.trace_stop"() : () -> ()
    %223 = vector.shape_cast %222 : vector<2x16x8xf32> to vector<32x8xf32>
    %224 = vector.extract_strided_slice %171 {offsets = [0, 0, 24], sizes = [2, 16, 8], strides = [1, 1, 1]} : vector<2x16x32xf32> to vector<2x16x8xf32>
    %225 = vector.extract_strided_slice %173 {offsets = [0, 0, 24], sizes = [2, 16, 8], strides = [1, 1, 1]} : vector<2x16x32xf32> to vector<2x16x8xf32>
    %226 = vector.extract_strided_slice %175 {offsets = [0, 0, 24], sizes = [2, 16, 8], strides = [1, 1, 1]} : vector<2x16x32xf32> to vector<2x16x8xf32>
    "tpu.trace_start"() <{level = 10 : i32, message = "bqd,bkd->bqk"}> : () -> ()
    %cst_68 = arith.constant dense<0.000000e+00> : vector<2x16x16xf32>
    %227 = tpu.matmul %224, %225, %cst_68 {dimension_numbers = #tpu.dot_dimension_numbers<[2], [2], [1], [1], [0, 0, 0, 1, 1, 1], [0], [0]>} : vector<2x16x8xf32>, vector<2x16x8xf32>, vector<2x16x16xf32> -> vector<2x16x16xf32>
    "tpu.trace_stop"() : () -> ()
    %cst_69 = arith.constant dense<0xFF800000> : vector<2x16xf32>
    %228 = vector.multi_reduction <maximumf>, %227, %cst_69 [2] : vector<2x16x16xf32> to vector<2x16xf32>
    %229 = vector.shape_cast %228 : vector<2x16xf32> to vector<2x16x1xf32>
    %230 = vector.broadcast %229 : vector<2x16x1xf32> to vector<2x16x16xf32>
    %231 = arith.subf %227, %230 : vector<2x16x16xf32>
    %232 = math.exp %231 : vector<2x16x16xf32>
    %cst_70 = arith.constant dense<0.000000e+00> : vector<2x16xf32>
    %233 = vector.multi_reduction <add>, %232, %cst_70 [2] : vector<2x16x16xf32> to vector<2x16xf32>
    %234 = vector.shape_cast %233 : vector<2x16xf32> to vector<2x16x1xf32>
    %235 = tpu.reciprocal %234 {approx = true} : vector<2x16x1xf32> -> vector<2x16x1xf32>
    %236 = vector.broadcast %235 : vector<2x16x1xf32> to vector<2x16x16xf32>
    %237 = arith.mulf %232, %236 : vector<2x16x16xf32>
    "tpu.trace_start"() <{level = 10 : i32, message = "bqk,bkd->bqd"}> : () -> ()
    %cst_71 = arith.constant dense<0.000000e+00> : vector<2x16x8xf32>
    %238 = tpu.matmul %237, %226, %cst_71 {dimension_numbers = #tpu.dot_dimension_numbers<[2], [1], [1], [2], [0, 0, 0, 1, 1, 2], [0], [0]>} : vector<2x16x16xf32>, vector<2x16x8xf32>, vector<2x16x8xf32> -> vector<2x16x8xf32>
    "tpu.trace_stop"() : () -> ()
    %239 = vector.shape_cast %238 : vector<2x16x8xf32> to vector<32x8xf32>
    %240 = tpu.concatenate %191, %207, %223, %239 in 1 : vector<32x8xf32>, vector<32x8xf32>, vector<32x8xf32>, vector<32x8xf32> -> vector<32x32xf32>
    %c1_72 = arith.constant 1 : index
    %c0_73 = arith.constant 0 : index
    %c0_74 = arith.constant 0 : index
    %241 = vector.load %arg4[%c1_72, %c0_73, %c0_74] : memref<2x32x32xbf16, #tpu.memory_space<vmem>>, vector<1x32x32xbf16>
    %242 = vector.shape_cast %241 : vector<1x32x32xbf16> to vector<32x32xbf16>
    %243 = arith.truncf %240 : vector<32x32xf32> to vector<32x32xbf16>
    %cst_75 = arith.constant dense<0.000000e+00> : vector<32x32xf32>
    %244 = tpu.matmul %243, %242, %cst_75 {dimension_numbers = #tpu.dot_dimension_numbers<[1], [0], [0], [1], [0, 0, 1, 1], [], []>} : vector<32x32xbf16>, vector<32x32xbf16>, vector<32x32xf32> -> vector<32x32xf32>
    %245 = arith.addf %153, %244 : vector<32x32xf32>
    %246 = vector.broadcast %157 : vector<1x32xf32> to vector<32x32xf32>
    %247 = arith.addf %245, %246 : vector<32x32xf32>
    %cst_76 = arith.constant dense<0.000000e+00> : vector<32xf32>
    %248 = vector.multi_reduction <add>, %247, %cst_76 [1] : vector<32x32xf32> to vector<32xf32>
    %249 = vector.shape_cast %248 : vector<32xf32> to vector<32x1xf32>
    %cst_77 = arith.constant 3.200000e+01 : f32
    %250 = vector.broadcast %cst_77 : f32 to vector<32x1xf32>
    %251 = arith.divf %249, %250 : vector<32x1xf32>
    %252 = vector.broadcast %251 : vector<32x1xf32> to vector<32x32xf32>
    %253 = arith.subf %247, %252 : vector<32x32xf32>
    %254 = arith.mulf %253, %253 : vector<32x32xf32>
    %cst_78 = arith.constant dense<0.000000e+00> : vector<32xf32>
    %255 = vector.multi_reduction <add>, %254, %cst_78 [1] : vector<32x32xf32> to vector<32xf32>
    %256 = vector.shape_cast %255 : vector<32xf32> to vector<32x1xf32>
    %cst_79 = arith.constant 3.200000e+01 : f32
    %257 = vector.broadcast %cst_79 : f32 to vector<32x1xf32>
    %258 = arith.divf %256, %257 : vector<32x1xf32>
    %cst_80 = arith.constant 9.99999974E-6 : f32
    %259 = vector.broadcast %cst_80 : f32 to vector<32x1xf32>
    %260 = arith.addf %258, %259 : vector<32x1xf32>
    %261 = math.rsqrt %260 : vector<32x1xf32>
    %262 = vector.broadcast %261 : vector<32x1xf32> to vector<32x32xf32>
    %263 = arith.mulf %253, %262 : vector<32x32xf32>
    %264 = vector.broadcast %160 : vector<1x32xf32> to vector<32x32xf32>
    %265 = arith.mulf %263, %264 : vector<32x32xf32>
    %266 = vector.broadcast %161 : vector<1x32xf32> to vector<32x32xf32>
    %267 = arith.addf %265, %266 : vector<32x32xf32>
    %c1_81 = arith.constant 1 : index
    %c0_82 = arith.constant 0 : index
    %c0_83 = arith.constant 0 : index
    %268 = vector.load %arg5[%c1_81, %c0_82, %c0_83] : memref<2x32x64xbf16, #tpu.memory_space<vmem>>, vector<1x32x64xbf16>
    %269 = vector.shape_cast %268 : vector<1x32x64xbf16> to vector<32x64xbf16>
    %270 = arith.truncf %267 : vector<32x32xf32> to vector<32x32xbf16>
    %cst_84 = arith.constant dense<0.000000e+00> : vector<32x64xf32>
    %271 = tpu.matmul %270, %269, %cst_84 {dimension_numbers = #tpu.dot_dimension_numbers<[1], [0], [0], [1], [0, 0, 1, 1], [], []>} : vector<32x32xbf16>, vector<32x64xbf16>, vector<32x64xf32> -> vector<32x64xf32>
    %272 = vector.broadcast %158 : vector<1x64xf32> to vector<32x64xf32>
    %273 = arith.addf %271, %272 : vector<32x64xf32>
    %cst_85 = arith.constant 0.000000e+00 : f32
    %274 = vector.broadcast %cst_85 : f32 to vector<32x64xf32>
    %275 = arith.maximumf %273, %274 : vector<32x64xf32>
    %c1_86 = arith.constant 1 : index
    %c0_87 = arith.constant 0 : index
    %c0_88 = arith.constant 0 : index
    %276 = vector.load %arg6[%c1_86, %c0_87, %c0_88] : memref<2x64x32xbf16, #tpu.memory_space<vmem>>, vector<1x64x32xbf16>
    %277 = vector.shape_cast %276 : vector<1x64x32xbf16> to vector<64x32xbf16>
    %278 = arith.truncf %275 : vector<32x64xf32> to vector<32x64xbf16>
    %cst_89 = arith.constant dense<0.000000e+00> : vector<32x32xf32>
    %279 = tpu.matmul %278, %277, %cst_89 {dimension_numbers = #tpu.dot_dimension_numbers<[1], [0], [0], [1], [0, 0, 1, 1], [], []>} : vector<32x64xbf16>, vector<64x32xbf16>, vector<32x32xf32> -> vector<32x32xf32>
    %280 = vector.broadcast %159 : vector<1x32xf32> to vector<32x32xf32>
    %281 = arith.addf %279, %280 : vector<32x32xf32>
    %282 = arith.addf %267, %281 : vector<32x32xf32>
    %cst_90 = arith.constant dense<0.000000e+00> : vector<32xf32>
    %283 = vector.multi_reduction <add>, %282, %cst_90 [1] : vector<32x32xf32> to vector<32xf32>
    %284 = vector.shape_cast %283 : vector<32xf32> to vector<32x1xf32>
    %cst_91 = arith.constant 3.200000e+01 : f32
    %285 = vector.broadcast %cst_91 : f32 to vector<32x1xf32>
    %286 = arith.divf %284, %285 : vector<32x1xf32>
    %287 = vector.broadcast %286 : vector<32x1xf32> to vector<32x32xf32>
    %288 = arith.subf %282, %287 : vector<32x32xf32>
    %289 = arith.mulf %288, %288 : vector<32x32xf32>
    %cst_92 = arith.constant dense<0.000000e+00> : vector<32xf32>
    %290 = vector.multi_reduction <add>, %289, %cst_92 [1] : vector<32x32xf32> to vector<32xf32>
    %291 = vector.shape_cast %290 : vector<32xf32> to vector<32x1xf32>
    %cst_93 = arith.constant 3.200000e+01 : f32
    %292 = vector.broadcast %cst_93 : f32 to vector<32x1xf32>
    %293 = arith.divf %291, %292 : vector<32x1xf32>
    %cst_94 = arith.constant 9.99999974E-6 : f32
    %294 = vector.broadcast %cst_94 : f32 to vector<32x1xf32>
    %295 = arith.addf %293, %294 : vector<32x1xf32>
    %296 = math.rsqrt %295 : vector<32x1xf32>
    %297 = vector.broadcast %296 : vector<32x1xf32> to vector<32x32xf32>
    %298 = arith.mulf %288, %297 : vector<32x32xf32>
    %299 = vector.broadcast %162 : vector<1x32xf32> to vector<32x32xf32>
    %300 = arith.mulf %298, %299 : vector<32x32xf32>
    %301 = vector.broadcast %163 : vector<1x32xf32> to vector<32x32xf32>
    %302 = arith.addf %300, %301 : vector<32x32xf32>
    %303 = vector.shape_cast %302 : vector<32x32xf32> to vector<2x16x32xf32>
    %cst_95 = arith.constant dense<0.000000e+00> : vector<2x32xf32>
    %304 = vector.multi_reduction <add>, %303, %cst_95 [1] : vector<2x16x32xf32> to vector<2x32xf32>
    %cst_96 = arith.constant 1.600000e+01 : f32
    %305 = vector.broadcast %cst_96 : f32 to vector<2x32xf32>
    %306 = arith.divf %304, %305 : vector<2x32xf32>
    %c0_97 = arith.constant 0 : index
    %c0_98 = arith.constant 0 : index
    %307 = vector.load %arg8[%c0_97, %c0_98] : memref<1x32xf32, #tpu.memory_space<vmem>>, vector<1x32xf32>
    %cst_99 = arith.constant dense<0.000000e+00> : vector<1x2xf32>
    %308 = tpu.matmul %307, %306, %cst_99 {dimension_numbers = #tpu.dot_dimension_numbers<[1], [1], [0], [0], [0, 0, 1, 0], [], []>} : vector<1x32xf32>, vector<2x32xf32>, vector<1x2xf32> -> vector<1x2xf32>
    %c0_100 = arith.constant 0 : index
    %c0_101 = arith.constant 0 : index
    %309 = vector.load %arg9[%c0_100, %c0_101] : memref<1x1xf32, #tpu.memory_space<vmem>>, vector<1x1xf32>
    %310 = vector.broadcast %309 : vector<1x1xf32> to vector<1x2xf32>
    %311 = arith.addf %308, %310 : vector<1x2xf32>
    %312 = vector.shape_cast %311 : vector<1x2xf32> to vector<1x1x2xf32>
    %c0_102 = arith.constant 0 : index
    %c0_103 = arith.constant 0 : index
    %c0_104 = arith.constant 0 : index
    %313 = vector.load %arg10[%c0_102, %c0_103, %c0_104] : memref<1x1x2xf32, #tpu.memory_space<vmem>>, vector<1x1x2xf32>
    tpu.vector_store %arg10[%c0_102, %c0_103, %c0_104], %312 {strides = array<i32>} : memref<1x1x2xf32, #tpu.memory_space<vmem>>, vector<1x1x2xf32>,
    return
  }
  func.func @transform_0(%arg0: i32) -> (i32, i32) {
    %c0_i32 = arith.constant 0 : i32
    %c0_i32_0 = arith.constant 0 : i32
    return %arg0, %c0_i32 : i32, i32
  }
  func.func @transform_1(%arg0: i32) -> (i32, i32) {
    %c0_i32 = arith.constant 0 : i32
    %c0_i32_0 = arith.constant 0 : i32
    %c0_i32_1 = arith.constant 0 : i32
    return %c0_i32, %c0_i32_0 : i32, i32
  }
  func.func @transform_2(%arg0: i32) -> (i32, i32, i32) {
    %c0_i32 = arith.constant 0 : i32
    %c0_i32_0 = arith.constant 0 : i32
    %c0_i32_1 = arith.constant 0 : i32
    %c0_i32_2 = arith.constant 0 : i32
    return %c0_i32, %c0_i32_0, %c0_i32_1 : i32, i32, i32
  }
  func.func @transform_3(%arg0: i32) -> (i32, i32, i32) {
    %c0_i32 = arith.constant 0 : i32
    %c0_i32_0 = arith.constant 0 : i32
    %c0_i32_1 = arith.constant 0 : i32
    %c0_i32_2 = arith.constant 0 : i32
    return %c0_i32, %c0_i32_0, %c0_i32_1 : i32, i32, i32
  }
  func.func @transform_4(%arg0: i32) -> (i32, i32, i32) {
    %c0_i32 = arith.constant 0 : i32
    %c0_i32_0 = arith.constant 0 : i32
    %c0_i32_1 = arith.constant 0 : i32
    %c0_i32_2 = arith.constant 0 : i32
    return %c0_i32, %c0_i32_0, %c0_i32_1 : i32, i32, i32
  }
  func.func @transform_5(%arg0: i32) -> (i32, i32, i32) {
    %c0_i32 = arith.constant 0 : i32
    %c0_i32_0 = arith.constant 0 : i32
    %c0_i32_1 = arith.constant 0 : i32
    %c0_i32_2 = arith.constant 0 : i32
    return %c0_i32, %c0_i32_0, %c0_i32_1 : i32, i32, i32
  }
  func.func @transform_6(%arg0: i32) -> (i32, i32, i32) {
    %c0_i32 = arith.constant 0 : i32
    %c0_i32_0 = arith.constant 0 : i32
    %c0_i32_1 = arith.constant 0 : i32
    %c0_i32_2 = arith.constant 0 : i32
    return %c0_i32, %c0_i32_0, %c0_i32_1 : i32, i32, i32
  }
  func.func @transform_7(%arg0: i32) -> (i32, i32) {
    %c0_i32 = arith.constant 0 : i32
    %c0_i32_0 = arith.constant 0 : i32
    %c0_i32_1 = arith.constant 0 : i32
    return %c0_i32, %c0_i32_0 : i32, i32
  }
  func.func @transform_8(%arg0: i32) -> (i32, i32) {
    %c0_i32 = arith.constant 0 : i32
    %c0_i32_0 = arith.constant 0 : i32
    %c0_i32_1 = arith.constant 0 : i32
    return %c0_i32, %c0_i32_0 : i32, i32
  }
  func.func @transform_9(%arg0: i32) -> (i32, i32, i32) {
    %c0_i32 = arith.constant 0 : i32
    %c0_i32_0 = arith.constant 0 : i32
    %c0_i32_1 = arith.constant 0 : i32
    return %arg0, %c0_i32, %c0_i32_0 : i32, i32, i32
  }
}

</mosaic_0001>

<bundles_post_ra>
// kernel: tpu_custom_call.1
= control target key start
LH: loop header
LB: loop body
LE: loop exit
PB: predicated region body
PF: predicated region fallthrough
CT: control target
= control target key end

     0   :  { %s6607_s0 = inlined_call_operand.vmem [shape: bf16[32,13], index: 0, kind: input, shape index: {}]   ;;  %s6608_s1 = inlined_call_operand.hbm [shape: bf16[13,32], index: 1, kind: input, shape index: {}]   ;;  %s6609_s2 = inlined_call_operand.vmem [shape: bf16[2,32,96], index: 2, kind: input, shape index: {}]   ;;  %s6610_s3 = inlined_call_operand.vmem [shape: bf16[2,32,32], index: 3, kind: input, shape index: {}]   ;;  %s6611_s4 = inlined_call_operand.vmem [shape: bf16[2,32,64], index: 4, kind: input, shape index: {}]   ;;  %s6612_s5 = inlined_call_operand.vmem [shape: bf16[2,64,32], index: 5, kind: input, shape index: {}]   ;;  %s6613_s6 = inlined_call_operand.vmem [shape: f32[2,8,128], index: 6, kind: input, shape index: {}]   ;;  %s6614_s7 = inlined_call_operand.vmem [shape: f32[1,32], index: 7, kind: input, shape index: {}]   ;;  %s6615_s8 = inlined_call_operand.<no memory space> [shape: f32[1,1], index: 8, kind: input, shape index: {}]   ;;  %s6616_s9 = inlined_call_operand.hbm [shape: f32[1,1,2], index: 9, kind: output, shape index: {}]  }
   0x1   :  { %v14_v0 = vstv %s6615_s8 }
   0x2   :  { %15 = vst [vmem:[#allocation2] sm:$0x1] %v14_v0 }
   0x3   :  { %16 = vsyncpa [#allocation4], 0 }
   0x4   :  { %17 = vsyncpa [#allocation5], 0  ;;  %s5815_s11 = smov [#allocation3]   ;;  %s5767_s15 = scalar_lea.hbm %s6608_s1, 128 }
   0x5   :  { %s25_s12 = sshll.u32 %s5815_s11, 4  ;;  %p5768_p0 = scmp.ne.s32.totalorder %s6608_s1, %s5767_s15  ;;  %s26_s12 = int_to_ptr.vmem [resolvable:$true] %s25_s12 }
   0x6   :  { %p5771_p1 = scmp.lt.u32.totalorder %s5767_s15, %s6608_s1 }
   0x8   :  { %p5773_p2 = pnand %p5771_p1, %p5768_p0 }
   0xa   :  { %5776 = shalt.err (!%p5773_p2)
}
   0xb   :  { %s5777_s8 = scalar_lea.vmem %s26_s12, 128  ;;  %p5782_p4 = scmp.lt.s32.totalorder %s26_s12, %s26_s12 }
   0xc   :  { %p5778_p3 = scmp.ne.s32.totalorder %s26_s12, %s5777_s8  ;;  %p5783_p5 = scmp.lt.s32.totalorder %s5777_s8, %s5777_s8 }
   0xe   :  { %p5784_p6 = por %p5783_p5, %p5782_p4 }
  0x10   :  { %p5785_p7 = pnand %p5784_p6, %p5778_p3 }
  0x12   :  { %5788 = shalt.err (!%p5785_p7)
}
  0x13   :  { %s5816_s20 = smov 64   ;;  %s5817_s21 = smov 4  }
  0x14   :  { %31 = dma.hbm_to_vmem [thread:$0]  %s6608_s1, 128, %s26_s12, [#allocation4], %s5816_s20, %s5816_s20, %s5817_s21  }
  0x15   :  { %5811 = dma.done.wait [#allocation4], 128  }
  0x16   :  { %5812 = vsyncadd [#allocation4], 4294967168  ;;  %vm78_vm0 = vcmask 1045504   ;;  %vm79_vm1 = vcmask 1046528   ;;  %v5818_v1 = vmov 65535   ;;  %vm71_vm2 = vcmask 105472  }
  0x17   :  { %v80_v2 = vsel %vm78_vm0, 4294967295, %v5818_v1  ;;  %v5582_v4 = vld [vmem:[#allocation3] sm:$0x7f]   ;;  %v5584_v7 = vld [vmem:[%s6607_s0 + $0x8] sm:$0xff]   ;;  %vm161_vm3 = vcmask 261120   ;;  %v145_v20 = vlaneseq  ;;  %vm223_vm4 = vcmask 64512  }
  0x18   :  { %v81_v3 = vsel %vm79_vm1, %v80_v2, 0  ;;  %v5583_v5 = vld [vmem:[%s6607_s0] sm:$0xff]   ;;  %v5586_v9 = vld [vmem:[%s6609_s2 + $0x8] sm:$0xff]   ;;  %s5819_s11 = smov 96   ;;  %vm5975_vm5 = vmpackc.low %vm223_vm4, %vm223_vm4  ;;  %vm396_vm6 = vcmask 130048   ;;  %s5820_s12 = smov 88  }
  0x19   :  { %v83_v6 = vand.u32 %v5582_v4, %v81_v3  ;;  %4874 = vmatprep.mubr.msk.bf16.mxu0 %vm71_vm2, %v5583_v5  ;;  %v5585_v8 = vld [vmem:[%s6609_s2] sm:$0xff]   ;;  %v5937_v21 = vshrl.u32 %v145_v20, 7  ;;  %s5821_s13 = smov 120   ;;  %s5822_s14 = smov 56   ;;  %vm1871_vm7 = vcmask 195584   ;;  %vm2149_vm8 = vcmask 523264  }
  0x1a   :  { %4878 = vmatprep.subr.bf16.mxu1 %v5585_v8  ;;  %v5945_v23 = vld [vmem:[%s6613_s6] sm:$0xff]  ;;  %s5823_s15 = smov 80   ;;  %s5824_s16 = smov 112   ;;  %vm5833_vm9 = vmmov 0   ;;  %vm4449_vm10 = vcmask 1041409   ;;  %vm4526_vm11 = vcmask 8192  }
  0x1b   :  { %4872 = vmatprep.subr.bf16.mxu0 %v83_v6  ;;  %4879 = vmatpush3.bf16.msra.mxu1 %v5585_v8  ;;  %v5940_v22 = vsub.s32 0, %v5937_v21  ;;  %s5825_s17 = smov 48   ;;  %s5826_s18 = smov 72  }
  0x1c   :  { %4873 = vmatpush3.bf16.msra.mxu0 %v83_v6  ;;  %4880 = vmatprep.subr.bf16.mxu1 %v5586_v9  ;;  %s5827_s19 = smov 104   ;;  %s5828_s8 = smov 40  }
  0x1d   :  { %v148_v24 = vrot.slane %v5945_v23, %v5940_v22  ;;  %s5829_s21 = smov 8   ;;  %s5830_s22 = smov 16  }
  0x1e   :  { %s5831_s27 = smov 24   ;;  %s5835_s28 = smov [#allocation6]  }
  0x1f   :  { %4875 = vmatmul.mubr.msk.bf16.vlgmr.msra.gmra.mrb[0].mxu0 %vm71_vm2, %v5584_v7  ;;  %4881 = vmatpush3.bf16.msra.mxu1 %v5586_v9  ;;  %s4534_s29 = sshll.u32 %s5835_s28, 4  ;;  %s4535_s29 = int_to_ptr.vmem [resolvable:$true] %s4534_s29 }
  0x20   :  { %s5789_s30 = scalar_lea.vmem %s4535_s29, 16  ;;  %s5793_s0 = scalar_lea.vmem %s4535_s29, 32 }
  0x21   :  { %p5790_p8 = scmp.ne.s32.totalorder %s4535_s29, %s5789_s30  ;;  %p5794_p9 = scmp.lt.s32.totalorder %s4535_s29, %s4535_s29 }
  0x22   :  { %p5795_p10 = scmp.lt.s32.totalorder %s5793_s0, %s5789_s30 }
  0x24   :  { %p5796_p11 = por %p5795_p10, %p5794_p9 }
  0x26   :  { %p5797_p12 = pnand %p5796_p11, %p5790_p8 }
  0xf2   :  { %v5915_v10 = vpop.f32.mrb[0].mxu0 }
  0xf3   :  { %v5917_v11 = vpop.f32.mrb[1].mxu0  ;;  %v136_v17 = vmax.f32 %v5915_v10, 0.0 }
  0xf4   :  { %v5919_v12 = vpop.f32.mrb[2].mxu0  ;;  %v134_v15 = vmax.f32 %v5917_v11, 0.0 }
  0xf5   :  { %v137_v13 = vmax.f32 %v5919_v12, 0.0  ;;  %v5922_v14 = vpop.f32.mrb[3].mxu0 }
  0xf6   :  { %v135_v16 = vmax.f32 %v5922_v14, 0.0 }
  0xf7   :  { %v144_v19 = vpack.c.bf16 %v137_v13, %v136_v17 }
  0xf8   :  { %v143_v18 = vpack.c.bf16 %v135_v16, %v134_v15 }
  0xfa   :  { %4882 = vmatprep.mubr.msk.bf16.mxu1 %vm161_vm3, %v143_v18 }
  0xfb   :  { %4883 = vmatmul.mubr.msk.bf16.vlgmr.msra.gmra.mrb[0].mxu1 %vm161_vm3, %v144_v19 }
 0x1ce   :  { %v4884_v25 = vpop.f32.mrb[0].mxu1 }
 0x1cf   :  { %v5949_v26 = vadd.f32 %v4884_v25, %v148_v24  ;;  %v202_v27 = vpop.f32.mrb[1].mxu1 }
 0x1d0   :  { %v5951_v28 = vadd.f32 %v202_v27, %v148_v24  ;;  %v4885_v29 = vpop.f32.mrb[2].mxu1 }
 0x1d1   :  { %v205_v30 = vpop.f32.mrb[3].mxu1  ;;  %4897 = vmatprep.mubr.msk.f32.mxu1 %vm223_vm4, %v5949_v26  ;;  %v5959_v32 = vadd.f32 %v4885_v29, %v148_v24 }
 0x1d2   :  { %v5955_v31 = vadd.f32 %v205_v30, %v148_v24  ;;  %4890 = vmatprep.mubr.msk.f32.mxu0 %vm223_vm4, %v5951_v28 }
 0x1d3   :  { %v5969_v34 = vpack.i.bf16 %v5959_v32, %v5949_v26 }
 0x1d4   :  { %v5963_v33 = vpack.i.bf16 %v5955_v31, %v5951_v28 }
 0x1d6   :  { %5361 = vrot.lane.b32.xlu0 %v5963_v33, %s5819_s11 }
 0x1da   :  { %5366 = vrot.lane.b32.xlu0 %v5969_v34, %s5819_s11 }
 0x248   :  { %v5362_v35 = vpop.permute.xlu0 %5361 }
 0x249   :  { %v5364_v36 = vunpack.i.h.bf16 %v5362_v35  ;;  %v5363_v37 = vunpack.i.l.bf16 %v5362_v35 }
 0x24b   :  { %v5179_v39 = vpack.c.bf16 %v5364_v36, %v5363_v37 }
 0x24c   :  { %v5367_v40 = vpop.permute.xlu0 %5366 }
 0x24d   :  { %v5369_v41 = vunpack.i.h.bf16 %v5367_v40  ;;  %v5368_v42 = vunpack.i.l.bf16 %v5367_v40  ;;  %5181 = vmatprep.subr.msk.bf16.mxu0 %vm5975_vm5, %v5179_v39 }
 0x24e   :  { %5184 = vmatpush3.bf16.xpose.msk.msra.mxu0 %vm5975_vm5, %v5179_v39 }
 0x24f   :  { %v5185_v43 = vpack.c.bf16 %v5369_v41, %v5368_v42 }
 0x251   :  { %5187 = vmatprep.subr.msk.bf16.mxu1 %vm5975_vm5, %v5185_v43 }
 0x252   :  { %5190 = vmatpush3.bf16.xpose.msk.msra.mxu1 %vm5975_vm5, %v5185_v43 }
 0x255   :  { %4891 = vmatmul.mubr.msk.f32.vlgmr.msra.gmra.mrb[4].mxu0 %vm223_vm4, %v5955_v31 }
 0x259   :  { %4898 = vmatmul.mubr.msk.f32.vlgmr.msra.gmra.mrb[4].mxu1 %vm223_vm4, %v5959_v32 }
 0x328   :  { %v4892_v44 = vpop.f32.mrb[4].mxu0 }
 0x329   :  { %v298_v45 = vpop.f32.mrb[5].mxu0  ;;  %v400_v50 = vsel %vm396_vm6, %v4892_v44, -inf }
 0x32a   :  { %v397_v46 = vsel %vm396_vm6, %v298_v45, -inf }
 0x32b   :  { %398 = vmax.xlane.f32.xlu1 %v397_v46 }
 0x32c   :  { %v4899_v47 = vpop.f32.mrb[4].mxu1 }
 0x32d   :  { %v387_v48 = vpop.f32.mrb[5].mxu1  ;;  %v406_v51 = vsel %vm396_vm6, %v4899_v47, -inf }
 0x32e   :  { %v403_v49 = vsel %vm396_vm6, %v387_v48, -inf }
 0x32f   :  { %404 = vmax.xlane.f32.xlu0 %v403_v49  ;;  %401 = vmax.xlane.f32.xlu1 %v400_v50 }
 0x333   :  { %407 = vmax.xlane.f32.xlu1 %v406_v51 }
 0x344   :  { %5371 = vrot.lane.b32.xlu1 %v5963_v33, %s5816_s20 }
 0x345   :  { %5376 = vrot.lane.b32.xlu0 %v5969_v34, %s5816_s20 }
 0x348   :  { %5381 = vrot.lane.b32.xlu1 %v5963_v33, %s5820_s12 }
 0x349   :  { %706 = vrot.lane.b32.xlu0 %v5949_v26, %s5821_s13 }
 0x34c   :  { %615 = vrot.lane.b32.xlu1 %v5951_v28, %s5821_s13 }
 0x350   :  { %5386 = vrot.lane.b32.xlu1 %v5969_v34, %s5820_s12 }
 0x3b8   :  { %v399_v52 = vpop.xlane.xlu1 %398 }
 0x3b9   :  { %v409_v3 = vsub.f32 %v298_v45, %v399_v52 }
 0x3bb   :  { %v413_v18 = vmul.f32 1.442695, %v409_v3 }
 0x3bc   :  { %v405_v53 = vpop.xlane.xlu0 %404  ;;  %v402_v54 = vpop.xlane.xlu1 %401 }
 0x3bd   :  { %v410_v55 = vsub.f32 %v4892_v44, %v402_v54  ;;  %v411_v59 = vsub.f32 %v387_v48, %v405_v53 }
 0x3bf   :  { %v415_v60 = vmul.f32 1.442695, %v410_v55  ;;  %v417_v4 = vmul.f32 1.442695, %v411_v59 }
 0x3c0   :  { %v408_v56 = vpop.xlane.xlu1 %407  ;;  %v5377_v57 = vpop.permute.xlu0 %5376 }
 0x3c1   :  { %v412_v58 = vsub.f32 %v4899_v47, %v408_v56  ;;  %v5379_v62 = vunpack.i.h.bf16 %v5377_v57  ;;  %v5378_v0 = vunpack.i.l.bf16 %v5377_v57 }
 0x3c3   :  { %v419_v61 = vmul.f32 1.442695, %v412_v58  ;;  %v5195_v9 = vpack.c.bf16 %v5379_v62, %v5378_v0 }
 0x3c4   :  { %v5372_v63 = vpop.permute.xlu1 %5371  ;;  %v707_v56 = vpop.permute.xlu0 %706 }
 0x3c5   :  { %5605 = vpow2.f32 %v419_v61  ;;  %v5374_v1 = vunpack.i.h.bf16 %v5372_v63  ;;  %v5373_v2 = vunpack.i.l.bf16 %v5372_v63 }
 0x3c6   :  { %5607 = vpow2.f32 %v415_v60 }
 0x3c7   :  { %v5191_v5 = vpack.c.bf16 %v5374_v1, %v5373_v2  ;;  %5609 = vpow2.f32 %v417_v4 }
 0x3c8   :  { %v5382_v6 = vpop.permute.xlu1 %5381  ;;  %5611 = vpow2.f32 %v413_v18 }
 0x3c9   :  { %v5384_v7 = vunpack.i.h.bf16 %v5382_v6  ;;  %v5383_v8 = vunpack.i.l.bf16 %v5382_v6  ;;  %5192 = vmatprep.subr.bf16.mxu0 %v5191_v5 }
 0x3ca   :  { %5194 = vmatpush3.bf16.msra.mxu0 %v5191_v5 }
 0x3cb   :  { %v5199_v19 = vpack.c.bf16 %v5384_v7, %v5383_v8  ;;  %5196 = vmatprep.subr.bf16.mxu0 %v5195_v9 }
 0x3cc   :  { %v616_v20 = vpop.permute.xlu1 %615 }
 0x3cd   :  { %5201 = vmatprep.subr.msk.bf16.mxu1 %vm5975_vm5, %v5199_v19  ;;  %4918 = vmatprep.mubr.msk.f32.mxu1 %vm223_vm4, %v616_v20 }
 0x3ce   :  { %5204 = vmatpush3.bf16.xpose.msk.msra.mxu1 %vm5975_vm5, %v5199_v19 }
 0x3cf   :  { %v5606_v24 = vpop.eup %5605 }
 0x3d0   :  { %v430_v25 = vsel %vm396_vm6, %v5606_v24, 0.0  ;;  %v5608_v27 = vpop.eup %5607  ;;  %v5387_v39 = vpop.permute.xlu1 %5386 }
 0x3d1   :  { %431 = vadd.xlane.f32.xlu1 %v430_v25  ;;  %v424_v29 = vsel %vm396_vm6, %v5608_v27, 0.0  ;;  %v5610_v30 = vpop.eup %5609  ;;  %v5389_v48 = vunpack.i.h.bf16 %v5387_v39  ;;  %v5388_v49 = vunpack.i.l.bf16 %v5387_v39 }
 0x3d2   :  { %v427_v35 = vsel %vm396_vm6, %v5610_v30, 0.0  ;;  %v5612_v36 = vpop.eup %5611 }
 0x3d3   :  { %v421_v37 = vsel %vm396_vm6, %v5612_v36, 0.0  ;;  %v5205_v54 = vpack.c.bf16 %v5389_v48, %v5388_v49 }
 0x3d5   :  { %425 = vadd.xlane.f32.xlu1 %v424_v29 }
 0x3d9   :  { %428 = vadd.xlane.f32.xlu1 %v427_v35 }
 0x3dd   :  { %422 = vadd.xlane.f32.xlu1 %v421_v37 }
 0x3ee   :  { %617 = vrot.lane.b32.xlu1 %v5955_v31, %s5821_s13 }
 0x3f2   :  { %708 = vrot.lane.b32.xlu1 %v5959_v32, %s5821_s13 }
 0x45e   :  { %v432_v40 = vpop.xlane.xlu1 %431 }
 0x462   :  { %v426_v41 = vpop.xlane.xlu1 %425 }
 0x463   :  { %5613 = vrcp.f32 %v426_v41 }
 0x466   :  { %v429_v42 = vpop.xlane.xlu1 %428 }
 0x467   :  { %5615 = vrcp.f32 %v429_v42 }
 0x46a   :  { %v423_v43 = vpop.xlane.xlu1 %422 }
 0x46b   :  { %5617 = vrcp.f32 %v423_v43 }
 0x46c   :  { %5619 = vrcp.f32 %v432_v40 }
 0x46d   :  { %v5614_v45 = vpop.eup %5613 }
 0x46e   :  { %v618_v44 = vpop.permute.xlu1 %617  ;;  %v438_v51 = vmul.f32 %v5614_v45, %v5608_v27 }
 0x46f   :  { %4919 = vmatmul.mubr.msk.f32.vlgmr.msra.gmra.mrb[6].mxu1 %vm223_vm4, %v618_v44 }
 0x471   :  { %v5616_v46 = vpop.eup %5615 }
 0x472   :  { %v439_v53 = vmul.f32 %v5616_v46, %v5610_v30  ;;  %v709_v57 = vpop.permute.xlu1 %708 }
 0x475   :  { %v5618_v47 = vpop.eup %5617 }
 0x476   :  { %v437_v50 = vmul.f32 %v5618_v47, %v5612_v36  ;;  %v5620_v52 = vpop.eup %5619 }
 0x477   :  { %v440_v55 = vmul.f32 %v5620_v52, %v5606_v24 }
 0x478   :  { %4904 = vmatprep.mubr.msk.f32.mxu0 %vm396_vm6, %v437_v50 }
 0x479   :  { %4905 = vmatmul.mubr.msk.f32.vlgmr.msra.gmra.mrb[6].mxu0 %vm396_vm6, %v438_v51 }
 0x47a   :  { %5198 = vmatpush3.bf16.msra.mxu0 %v5195_v9  ;;  %4911 = vmatprep.mubr.msk.f32.mxu0 %vm396_vm6, %v439_v53 }
 0x47b   :  { %5207 = vmatprep.subr.msk.bf16.mxu0 %vm5975_vm5, %v5205_v54 }
 0x47d   :  { %4912 = vmatmul.mubr.msk.f32.vlgmr.msra.gmra.mrb[8].mxu0 %vm396_vm6, %v440_v55 }
 0x47e   :  { %4925 = vmatprep.mubr.msk.f32.mxu0 %vm223_vm4, %v707_v56 }
 0x483   :  { %5210 = vmatpush3.bf16.xpose.msk.msra.mxu0 %vm5975_vm5, %v5205_v54 }
 0x48a   :  { %4926 = vmatmul.mubr.msk.f32.vlgmr.msra.gmra.mrb[10].mxu0 %vm223_vm4, %v709_v57 }
 0x542   :  { %v4920_v58 = vpop.f32.mrb[6].mxu1 }
 0x543   :  { %v697_v59 = vpop.f32.mrb[7].mxu1  ;;  %v800_v60 = vsel %vm396_vm6, %v4920_v58, -inf }
 0x544   :  { %801 = vmax.xlane.f32.xlu1 %v800_v60  ;;  %v797_v61 = vsel %vm396_vm6, %v697_v59, -inf }
 0x545   :  { %798 = vmax.xlane.f32.xlu0 %v797_v61 }
 0x54c   :  { %v6033_v62 = vpop.f32.mrb[6].mxu0 }
 0x54d   :  { %v6035_v63 = vpop.f32.mrb[7].mxu0 }
 0x550   :  { %v6037_v0 = vpop.f32.mrb[8].mxu0 }
 0x551   :  { %v6039_v1 = vpop.f32.mrb[9].mxu0 }
 0x55d   :  { %v4927_v2 = vpop.f32.mrb[10].mxu0 }
 0x55e   :  { %v788_v3 = vpop.f32.mrb[11].mxu0  ;;  %v806_v5 = vsel %vm396_vm6, %v4927_v2, -inf }
 0x55f   :  { %v803_v4 = vsel %vm396_vm6, %v788_v3, -inf }
 0x560   :  { %804 = vmax.xlane.f32.xlu0 %v803_v4 }
 0x564   :  { %807 = vmax.xlane.f32.xlu0 %v806_v5 }
 0x5d1   :  { %v802_v6 = vpop.xlane.xlu1 %801 }
 0x5d2   :  { %v810_v7 = vsub.f32 %v4920_v58, %v802_v6  ;;  %v799_v8 = vpop.xlane.xlu0 %798 }
 0x5d3   :  { %v809_v9 = vsub.f32 %v697_v59, %v799_v8 }
 0x5d4   :  { %v815_v18 = vmul.f32 1.442695, %v810_v7 }
 0x5d5   :  { %v813_v19 = vmul.f32 1.442695, %v809_v9 }
 0x5d6   :  { %5621 = vpow2.f32 %v815_v18 }
 0x5d7   :  { %5623 = vpow2.f32 %v813_v19 }
 0x5e0   :  { %v5622_v20 = vpop.eup %5621 }
 0x5e1   :  { %v5624_v24 = vpop.eup %5623  ;;  %v824_v25 = vsel %vm396_vm6, %v5622_v20, 0.0 }
 0x5e2   :  { %825 = vadd.xlane.f32.xlu0 %v824_v25  ;;  %v821_v27 = vsel %vm396_vm6, %v5624_v24, 0.0 }
 0x5e3   :  { %822 = vadd.xlane.f32.xlu1 %v821_v27 }
 0x5ed   :  { %v805_v29 = vpop.xlane.xlu0 %804 }
 0x5ee   :  { %v811_v37 = vsub.f32 %v788_v3, %v805_v29 }
 0x5f0   :  { %v817_v39 = vmul.f32 1.442695, %v811_v37 }
 0x5f1   :  { %v808_v30 = vpop.xlane.xlu0 %807 }
 0x5f2   :  { %v812_v35 = vsub.f32 %v4927_v2, %v808_v30 }
 0x5f4   :  { %5391 = vrot.lane.b32.xlu1 %v5963_v33, %s5822_s14  ;;  %v819_v36 = vmul.f32 1.442695, %v812_v35 }
 0x5f6   :  { %5625 = vpow2.f32 %v819_v36 }
 0x5f7   :  { %5627 = vpow2.f32 %v817_v39 }
 0x5f8   :  { %5401 = vrot.lane.b32.xlu1 %v5963_v33, %s5823_s15  ;;  %5396 = vrot.lane.b32.xlu0 %v5969_v34, %s5822_s14 }
 0x5fc   :  { %5406 = vrot.lane.b32.xlu1 %v5969_v34, %s5823_s15 }
 0x600   :  { %1017 = vrot.lane.b32.xlu1 %v5955_v31, %s5824_s16  ;;  %v5626_v40 = vpop.eup %5625 }
 0x601   :  { %v830_v41 = vsel %vm396_vm6, %v5626_v40, 0.0  ;;  %v5628_v42 = vpop.eup %5627 }
 0x602   :  { %v827_v43 = vsel %vm396_vm6, %v5628_v42, 0.0 }
 0x617   :  { %831 = vadd.xlane.f32.xlu0 %v830_v41 }
 0x624   :  { %828 = vadd.xlane.f32.xlu1 %v827_v43 }
 0x62d   :  { %1015 = vrot.lane.b32.xlu0 %v5951_v28, %s5824_s16 }
 0x631   :  { %1106 = vrot.lane.b32.xlu0 %v5949_v26, %s5824_s16 }
 0x635   :  { %1108 = vrot.lane.b32.xlu1 %v5959_v32, %s5824_s16 }
 0x66f   :  { %v826_v44 = vpop.xlane.xlu0 %825 }
 0x670   :  { %5629 = vrcp.f32 %v826_v44  ;;  %v823_v45 = vpop.xlane.xlu1 %822 }
 0x671   :  { %5631 = vrcp.f32 %v823_v45 }
 0x673   :  { %v5397_v46 = vpop.permute.xlu0 %5396 }
 0x674   :  { %v5392_v47 = vpop.permute.xlu1 %5391  ;;  %v5399_v48 = vunpack.i.h.bf16 %v5397_v46  ;;  %v5398_v49 = vunpack.i.l.bf16 %v5397_v46 }
 0x675   :  { %v5394_v50 = vunpack.i.h.bf16 %v5392_v47  ;;  %v5393_v51 = vunpack.i.l.bf16 %v5392_v47 }
 0x676   :  { %v5215_v56 = vpack.c.bf16 %v5399_v48, %v5398_v49 }
 0x677   :  { %v5211_v52 = vpack.c.bf16 %v5394_v50, %v5393_v51 }
 0x678   :  { %v5402_v53 = vpop.permute.xlu1 %5401 }
 0x679   :  { %v5404_v54 = vunpack.i.h.bf16 %v5402_v53  ;;  %v5403_v55 = vunpack.i.l.bf16 %v5402_v53  ;;  %5212 = vmatprep.subr.bf16.mxu0 %v5211_v52 }
 0x67a   :  { %v5630_v57 = vpop.eup %5629  ;;  %5214 = vmatpush3.bf16.msra.mxu0 %v5211_v52 }
 0x67b   :  { %v5632_v58 = vpop.eup %5631  ;;  %v5219_v59 = vpack.c.bf16 %v5404_v54, %v5403_v55  ;;  %5216 = vmatprep.subr.bf16.mxu0 %v5215_v56  ;;  %v838_v4 = vmul.f32 %v5630_v57, %v5622_v20 }
 0x67c   :  { %v5407_v60 = vpop.permute.xlu1 %5406  ;;  %v837_v61 = vmul.f32 %v5632_v58, %v5624_v24 }
 0x67d   :  { %v5409_v2 = vunpack.i.h.bf16 %v5407_v60  ;;  %v5408_v3 = vunpack.i.l.bf16 %v5407_v60  ;;  %5221 = vmatprep.subr.msk.bf16.mxu1 %vm5975_vm5, %v5219_v59 }
 0x67e   :  { %4932 = vmatprep.mubr.msk.f32.mxu0 %vm396_vm6, %v837_v61  ;;  %5224 = vmatpush3.bf16.xpose.msk.msra.mxu1 %vm5975_vm5, %v5219_v59 }
 0x67f   :  { %v5225_v5 = vpack.c.bf16 %v5409_v2, %v5408_v3  ;;  %4933 = vmatmul.mubr.msk.f32.vlgmr.msra.gmra.mrb[12].mxu0 %vm396_vm6, %v838_v4 }
 0x680   :  { %5218 = vmatpush3.bf16.msra.mxu0 %v5215_v56  ;;  %v1018_v8 = vpop.permute.xlu1 %1017 }
 0x681   :  { %5227 = vmatprep.subr.msk.bf16.mxu0 %vm5975_vm5, %v5225_v5 }
 0x6a4   :  { %v832_v6 = vpop.xlane.xlu0 %831 }
 0x6a5   :  { %5633 = vrcp.f32 %v832_v6 }
 0x6a8   :  { %v1016_v7 = vpop.permute.xlu0 %1015 }
 0x6a9   :  { %4946 = vmatprep.mubr.msk.f32.mxu1 %vm223_vm4, %v1016_v7 }
 0x6aa   :  { %4947 = vmatmul.mubr.msk.f32.vlgmr.msra.gmra.mrb[8].mxu1 %vm223_vm4, %v1018_v8 }
 0x6ac   :  { %v1107_v25 = vpop.permute.xlu0 %1106 }
 0x6af   :  { %v5634_v18 = vpop.eup %5633 }
 0x6b0   :  { %v840_v24 = vmul.f32 %v5634_v18, %v5626_v40 }
 0x6b1   :  { %v829_v9 = vpop.xlane.xlu1 %828 }
 0x6b2   :  { %5635 = vrcp.f32 %v829_v9 }
 0x6b5   :  { %v1109_v27 = vpop.permute.xlu1 %1108 }
 0x6bc   :  { %v5636_v19 = vpop.eup %5635 }
 0x6bd   :  { %v839_v20 = vmul.f32 %v5636_v19, %v5628_v42 }
 0x6bf   :  { %4939 = vmatprep.mubr.msk.f32.mxu0 %vm396_vm6, %v839_v20 }
 0x6c0   :  { %4940 = vmatmul.mubr.msk.f32.vlgmr.msra.gmra.mrb[14].mxu0 %vm396_vm6, %v840_v24 }
 0x6c1   :  { %5230 = vmatpush3.bf16.xpose.msk.msra.mxu0 %vm5975_vm5, %v5225_v5  ;;  %4953 = vmatprep.mubr.msk.f32.mxu0 %vm223_vm4, %v1107_v25 }
 0x6c8   :  { %4954 = vmatmul.mubr.msk.f32.vlgmr.msra.gmra.mrb[16].mxu0 %vm223_vm4, %v1109_v27 }
 0x752   :  { %v6079_v29 = vpop.f32.mrb[12].mxu0 }
 0x753   :  { %v6081_v30 = vpop.f32.mrb[13].mxu0 }
 0x754   :  { %v5440_v35 = vpack.i.bf16 %v6079_v29, %v6081_v30 }
 0x77d   :  { %v4948_v36 = vpop.f32.mrb[8].mxu1 }
 0x77e   :  { %v1097_v37 = vpop.f32.mrb[9].mxu1  ;;  %v1200_v39 = vsel %vm396_vm6, %v4948_v36, -inf }
 0x77f   :  { %1201 = vmax.xlane.f32.xlu1 %v1200_v39  ;;  %v1197_v40 = vsel %vm396_vm6, %v1097_v37, -inf }
 0x780   :  { %1198 = vmax.xlane.f32.xlu0 %v1197_v40 }
 0x793   :  { %v6087_v41 = vpop.f32.mrb[14].mxu0 }
 0x794   :  { %v6089_v42 = vpop.f32.mrb[15].mxu0 }
 0x795   :  { %v5445_v43 = vpack.i.bf16 %v6087_v41, %v6089_v42 }
 0x79b   :  { %v4955_v44 = vpop.f32.mrb[16].mxu0 }
 0x79c   :  { %v1188_v45 = vpop.f32.mrb[17].mxu0  ;;  %v1206_v47 = vsel %vm396_vm6, %v4955_v44, -inf }
 0x79d   :  { %v1203_v46 = vsel %vm396_vm6, %v1188_v45, -inf }
 0x79e   :  { %1204 = vmax.xlane.f32.xlu0 %v1203_v46 }
 0x7a2   :  { %1207 = vmax.xlane.f32.xlu0 %v1206_v47 }
 0x80c   :  { %v1202_v48 = vpop.xlane.xlu1 %1201 }
 0x80d   :  { %v1210_v49 = vsub.f32 %v4948_v36, %v1202_v48  ;;  %v1199_v50 = vpop.xlane.xlu0 %1198 }
 0x80e   :  { %v1209_v51 = vsub.f32 %v1097_v37, %v1199_v50 }
 0x80f   :  { %v1215_v52 = vmul.f32 1.442695, %v1210_v49 }
 0x810   :  { %v1213_v53 = vmul.f32 1.442695, %v1209_v51 }
 0x811   :  { %5637 = vpow2.f32 %v1215_v52 }
 0x812   :  { %5639 = vpow2.f32 %v1213_v53 }
 0x81b   :  { %v5638_v54 = vpop.eup %5637 }
 0x81c   :  { %v5640_v55 = vpop.eup %5639  ;;  %v1224_v56 = vsel %vm396_vm6, %v5638_v54, 0.0 }
 0x81d   :  { %1225 = vadd.xlane.f32.xlu0 %v1224_v56  ;;  %v1221_v57 = vsel %vm396_vm6, %v5640_v55, 0.0 }
 0x81e   :  { %1222 = vadd.xlane.f32.xlu1 %v1221_v57 }
 0x82b   :  { %v1205_v58 = vpop.xlane.xlu0 %1204 }
 0x82c   :  { %v1211_v2 = vsub.f32 %v1188_v45, %v1205_v58 }
 0x82e   :  { %v1217_v3 = vmul.f32 1.442695, %v1211_v2 }
 0x82f   :  { %5411 = vrot.lane.b32.xlu1 %v5963_v33, %s5825_s17  ;;  %v1208_v59 = vpop.xlane.xlu0 %1207 }
 0x830   :  { %v1212_v60 = vsub.f32 %v4955_v44, %v1208_v59 }
 0x832   :  { %v1219_v61 = vmul.f32 1.442695, %v1212_v60 }
 0x833   :  { %5421 = vrot.lane.b32.xlu1 %v5963_v33, %s5826_s18  ;;  %5416 = vrot.lane.b32.xlu0 %v5969_v34, %s5825_s17 }
 0x834   :  { %5641 = vpow2.f32 %v1219_v61 }
 0x835   :  { %5643 = vpow2.f32 %v1217_v3 }
 0x837   :  { %5426 = vrot.lane.b32.xlu1 %v5969_v34, %s5826_s18 }
 0x83b   :  { %1417 = vrot.lane.b32.xlu1 %v5955_v31, %s5827_s19 }
 0x83e   :  { %v5642_v4 = vpop.eup %5641 }
 0x83f   :  { %v1230_v5 = vsel %vm396_vm6, %v5642_v4, 0.0  ;;  %v5644_v6 = vpop.eup %5643 }
 0x840   :  { %v1227_v7 = vsel %vm396_vm6, %v5644_v6, 0.0 }
 0x852   :  { %1231 = vadd.xlane.f32.xlu0 %v1230_v5 }
 0x85f   :  { %1228 = vadd.xlane.f32.xlu1 %v1227_v7 }
 0x868   :  { %1415 = vrot.lane.b32.xlu0 %v5951_v28, %s5827_s19 }
 0x86c   :  { %1506 = vrot.lane.b32.xlu0 %v5949_v26, %s5827_s19 }
 0x870   :  { %1508 = vrot.lane.b32.xlu1 %v5959_v32, %s5827_s19 }
 0x8aa   :  { %v1226_v31 = vpop.xlane.xlu0 %1225 }
 0x8ab   :  { %5645 = vrcp.f32 %v1226_v31  ;;  %v1223_v8 = vpop.xlane.xlu1 %1222 }
 0x8ac   :  { %5647 = vrcp.f32 %v1223_v8 }
 0x8ae   :  { %v5417_v9 = vpop.permute.xlu0 %5416 }
 0x8af   :  { %v5419_v18 = vunpack.i.h.bf16 %v5417_v9  ;;  %v5418_v19 = vunpack.i.l.bf16 %v5417_v9  ;;  %v5412_v20 = vpop.permute.xlu1 %5411 }
 0x8b0   :  { %v5414_v24 = vunpack.i.h.bf16 %v5412_v20  ;;  %v5413_v25 = vunpack.i.l.bf16 %v5412_v20 }
 0x8b1   :  { %v5235_v27 = vpack.c.bf16 %v5419_v18, %v5418_v19 }
 0x8b2   :  { %v5231_v36 = vpack.c.bf16 %v5414_v24, %v5413_v25 }
 0x8b3   :  { %v5422_v37 = vpop.permute.xlu1 %5421  ;;  %5236 = vmatprep.subr.bf16.mxu0 %v5235_v27 }
 0x8b4   :  { %v5424_v28 = vunpack.i.h.bf16 %v5422_v37  ;;  %v5423_v39 = vunpack.i.l.bf16 %v5422_v37  ;;  %5232 = vmatprep.subr.bf16.mxu1 %v5231_v36  ;;  %5238 = vmatpush3.bf16.msra.mxu0 %v5235_v27 }
 0x8b5   :  { %v5646_v26 = vpop.eup %5645  ;;  %5234 = vmatpush3.bf16.msra.mxu1 %v5231_v36 }
 0x8b6   :  { %v5648_v32 = vpop.eup %5647  ;;  %v5239_v40 = vpack.c.bf16 %v5424_v28, %v5423_v39  ;;  %v1238_v48 = vmul.f32 %v5646_v26, %v5638_v54 }
 0x8b7   :  { %v5427_v44 = vpop.permute.xlu1 %5426  ;;  %v1237_v45 = vmul.f32 %v5648_v32, %v5640_v55 }
 0x8b8   :  { %v5429_v46 = vunpack.i.h.bf16 %v5427_v44  ;;  %v5428_v47 = vunpack.i.l.bf16 %v5427_v44  ;;  %5241 = vmatprep.subr.msk.bf16.mxu1 %vm5975_vm5, %v5239_v40 }
 0x8b9   :  { %4960 = vmatprep.mubr.msk.f32.mxu1 %vm396_vm6, %v1237_v45 }
 0x8ba   :  { %v5245_v49 = vpack.c.bf16 %v5429_v46, %v5428_v47  ;;  %4961 = vmatmul.mubr.msk.f32.vlgmr.msra.gmra.mrb[10].mxu1 %vm396_vm6, %v1238_v48 }
 0x8bb   :  { %v1418_v52 = vpop.permute.xlu1 %1417 }
 0x8bc   :  { %5247 = vmatprep.subr.msk.bf16.mxu0 %vm5975_vm5, %v5245_v49 }
 0x8be   :  { %5244 = vmatpush3.bf16.xpose.msk.msra.mxu1 %vm5975_vm5, %v5239_v40 }
 0x8df   :  { %v1232_v50 = vpop.xlane.xlu0 %1231 }
 0x8e0   :  { %5649 = vrcp.f32 %v1232_v50 }
 0x8e3   :  { %v1416_v51 = vpop.permute.xlu0 %1415 }
 0x8e4   :  { %4974 = vmatprep.mubr.msk.f32.mxu1 %vm223_vm4, %v1416_v51 }
 0x8e5   :  { %4975 = vmatmul.mubr.msk.f32.vlgmr.msra.gmra.mrb[12].mxu1 %vm223_vm4, %v1418_v52 }
 0x8e7   :  { %v1507_v58 = vpop.permute.xlu0 %1506 }
 0x8ea   :  { %v5650_v54 = vpop.eup %5649 }
 0x8eb   :  { %v1240_v57 = vmul.f32 %v5650_v54, %v5642_v4 }
 0x8ec   :  { %v1229_v53 = vpop.xlane.xlu1 %1228 }
 0x8ed   :  { %5651 = vrcp.f32 %v1229_v53 }
 0x8f0   :  { %v1509_v59 = vpop.permute.xlu1 %1508 }
 0x8f7   :  { %v5652_v55 = vpop.eup %5651 }
 0x8f8   :  { %v1239_v56 = vmul.f32 %v5652_v55, %v5644_v6 }
 0x8fa   :  { %4967 = vmatprep.mubr.msk.f32.mxu0 %vm396_vm6, %v1239_v56 }
 0x8fb   :  { %4968 = vmatmul.mubr.msk.f32.vlgmr.msra.gmra.mrb[18].mxu0 %vm396_vm6, %v1240_v57 }
 0x8fc   :  { %5250 = vmatpush3.bf16.xpose.msk.msra.mxu0 %vm5975_vm5, %v5245_v49  ;;  %4981 = vmatprep.mubr.msk.f32.mxu0 %vm223_vm4, %v1507_v58 }
 0x903   :  { %4982 = vmatmul.mubr.msk.f32.vlgmr.msra.gmra.mrb[20].mxu0 %vm223_vm4, %v1509_v59 }
 0x98d   :  { %v4962_v60 = vpop.f32.mrb[10].mxu1 }
 0x98e   :  { %v1319_v61 = vpop.f32.mrb[11].mxu1 }
 0x98f   :  { %v5450_v2 = vpack.i.bf16 %v4962_v60, %v1319_v61 }
 0x9b8   :  { %v4976_v3 = vpop.f32.mrb[12].mxu1 }
 0x9b9   :  { %v1497_v5 = vpop.f32.mrb[13].mxu1  ;;  %v1600_v4 = vsel %vm396_vm6, %v4976_v3, -inf }
 0x9ba   :  { %1601 = vmax.xlane.f32.xlu1 %v1600_v4  ;;  %v1597_v6 = vsel %vm396_vm6, %v1497_v5, -inf }
 0x9bb   :  { %1598 = vmax.xlane.f32.xlu0 %v1597_v6  ;;  %v5587_v6 = vld [vmem:[%s6610_s3] sm:$0xff]  }
 0x9ce   :  { %v4969_v7 = vpop.f32.mrb[18].mxu0 }
 0x9cf   :  { %v1406_v31 = vpop.f32.mrb[19].mxu0 }
 0x9d0   :  { %v5455_v8 = vpack.i.bf16 %v4969_v7, %v1406_v31  ;;  %v5588_v7 = vld [vmem:[%s6610_s3 + $0x8] sm:$0xff]  }
 0x9d6   :  { %v4983_v9 = vpop.f32.mrb[20].mxu0 }
 0x9d7   :  { %v1588_v18 = vpop.f32.mrb[21].mxu0  ;;  %v1606_v20 = vsel %vm396_vm6, %v4983_v9, -inf }
 0x9d8   :  { %v1603_v19 = vsel %vm396_vm6, %v1588_v18, -inf }
 0x9d9   :  { %1604 = vmax.xlane.f32.xlu0 %v1603_v19 }
 0x9dd   :  { %1607 = vmax.xlane.f32.xlu0 %v1606_v20 }
 0xa47   :  { %v1602_v24 = vpop.xlane.xlu1 %1601 }
 0xa48   :  { %v1610_v25 = vsub.f32 %v4976_v3, %v1602_v24  ;;  %v1599_v27 = vpop.xlane.xlu0 %1598 }
 0xa49   :  { %v1609_v36 = vsub.f32 %v1497_v5, %v1599_v27 }
 0xa4a   :  { %v1615_v37 = vmul.f32 1.442695, %v1610_v25 }
 0xa4b   :  { %v1613_v28 = vmul.f32 1.442695, %v1609_v36 }
 0xa4c   :  { %5653 = vpow2.f32 %v1615_v37 }
 0xa4d   :  { %5655 = vpow2.f32 %v1613_v28 }
 0xa56   :  { %v5654_v39 = vpop.eup %5653 }
 0xa57   :  { %v5656_v26 = vpop.eup %5655  ;;  %v1624_v32 = vsel %vm396_vm6, %v5654_v39, 0.0 }
 0xa58   :  { %1625 = vadd.xlane.f32.xlu0 %v1624_v32  ;;  %v1621_v40 = vsel %vm396_vm6, %v5656_v26, 0.0 }
 0xa59   :  { %1622 = vadd.xlane.f32.xlu1 %v1621_v40 }
 0xa66   :  { %v1605_v44 = vpop.xlane.xlu0 %1604 }
 0xa67   :  { %v1611_v45 = vsub.f32 %v1588_v18, %v1605_v44 }
 0xa69   :  { %v1617_v46 = vmul.f32 1.442695, %v1611_v45 }
 0xa6a   :  { %v1608_v47 = vpop.xlane.xlu0 %1607 }
 0xa6b   :  { %5657 = vpow2.f32 %v1617_v46  ;;  %v1612_v48 = vsub.f32 %v4983_v9, %v1608_v47 }
 0xa6d   :  { %v1619_v49 = vmul.f32 1.442695, %v1612_v48 }
 0xa6f   :  { %5659 = vpow2.f32 %v1619_v49 }
 0xa75   :  { %v5658_v50 = vpop.eup %5657 }
 0xa76   :  { %v1627_v51 = vsel %vm396_vm6, %v5658_v50, 0.0 }
 0xa77   :  { %1628 = vadd.xlane.f32.xlu1 %v1627_v51 }
 0xa79   :  { %v5660_v52 = vpop.eup %5659 }
 0xa7a   :  { %v1630_v53 = vsel %vm396_vm6, %v5660_v52, 0.0 }
 0xa7b   :  { %1631 = vadd.xlane.f32.xlu0 %v1630_v53 }
 0xa88   :  { %5431 = vrot.lane.b32.xlu1 %v5963_v33, %s5828_s8 }
 0xa8c   :  { %5441 = vrot.lane.b32.xlu1 %v5440_v35, %s5829_s21 }
 0xa90   :  { %5446 = vrot.lane.b32.xlu1 %v5445_v43, %s5829_s21 }
 0xa91   :  { %5436 = vrot.lane.b32.xlu0 %v5969_v34, %s5828_s8 }
 0xa94   :  { %5456 = vrot.lane.b32.xlu1 %v5455_v8, %s5830_s22 }
 0xa95   :  { %5451 = vrot.lane.b32.xlu0 %v5450_v2, %s5830_s22 }
 0xae5   :  { %v1626_v29 = vpop.xlane.xlu0 %1625 }
 0xae6   :  { %v1623_v33 = vpop.xlane.xlu1 %1622 }
 0xae7   :  { %5661 = vrcp.f32 %v1623_v33 }
 0xae8   :  { %5663 = vrcp.f32 %v1626_v29 }
 0xaf1   :  { %v5662_v54 = vpop.eup %5661 }
 0xaf2   :  { %v1637_v55 = vmul.f32 %v5662_v54, %v5656_v26  ;;  %v5664_v56 = vpop.eup %5663 }
 0xaf3   :  { %v1638_v61 = vmul.f32 %v5664_v56, %v5654_v39 }
 0xaf4   :  { %4988 = vmatprep.mubr.msk.f32.mxu1 %vm396_vm6, %v1637_v55 }
 0xb04   :  { %v1629_v30 = vpop.xlane.xlu1 %1628 }
 0xb05   :  { %5665 = vrcp.f32 %v1629_v30 }
 0xb08   :  { %v5432_v35 = vpop.permute.xlu1 %5431  ;;  %v1632_v41 = vpop.xlane.xlu0 %1631 }
 0xb09   :  { %v5434_v42 = vunpack.i.h.bf16 %v5432_v35  ;;  %v5433_v43 = vunpack.i.l.bf16 %v5432_v35  ;;  %5667 = vrcp.f32 %v1632_v41 }
 0xb0b   :  { %v5251_v34 = vpack.c.bf16 %v5434_v42, %v5433_v43 }
 0xb0c   :  { %v5437_v57 = vpop.permute.xlu0 %5436  ;;  %v5442_v24 = vpop.permute.xlu1 %5441 }
 0xb0d   :  { %v5439_v58 = vunpack.i.h.bf16 %v5437_v57  ;;  %v5438_v59 = vunpack.i.l.bf16 %v5437_v57  ;;  %5252 = vmatprep.subr.bf16.mxu1 %v5251_v34  ;;  %v5444_v36 = vunpack.i.h.bf16 %v5442_v24  ;;  %v5443_v37 = vunpack.i.l.bf16 %v5442_v24 }
 0xb0e   :  { %5254 = vmatpush3.bf16.msra.mxu1 %v5251_v34 }
 0xb0f   :  { %v5666_v60 = vpop.eup %5665  ;;  %v5255_v2 = vpack.c.bf16 %v5439_v58, %v5438_v59  ;;  %4998 = vmatprep.subr.bf16.mxu1 %v5587_v6  ;;  %v1864_v40 = vsel %vm223_vm4, %v6033_v62, %v5444_v36  ;;  %v1863_v44 = vsel %vm223_vm4, %v6035_v63, %v5443_v37 }
 0xb10   :  { %v1639_v3 = vmul.f32 %v5666_v60, %v5658_v50  ;;  %v5447_v25 = vpop.permute.xlu1 %5446  ;;  %v5452_v27 = vpop.permute.xlu0 %5451 }
 0xb11   :  { %4989 = vmatmul.mubr.msk.f32.vlgmr.msra.gmra.mrb[14].mxu1 %vm396_vm6, %v1638_v61  ;;  %5256 = vmatprep.subr.bf16.mxu0 %v5255_v2  ;;  %v5454_v28 = vunpack.i.h.bf16 %v5452_v27  ;;  %v5453_v39 = vunpack.i.l.bf16 %v5452_v27  ;;  %v5449_v47 = vunpack.i.h.bf16 %v5447_v25  ;;  %v5448_v48 = vunpack.i.l.bf16 %v5447_v25 }
 0xb12   :  { %5258 = vmatpush3.bf16.msra.mxu0 %v5255_v2  ;;  %4995 = vmatprep.mubr.msk.f32.mxu0 %vm396_vm6, %v1639_v3 }
 0xb13   :  { %v5668_v5 = vpop.eup %5667  ;;  %4999 = vmatpush3.bf16.msra.mxu1 %v5587_v6  ;;  %v1868_v49 = vsel %vm396_vm6, %v1864_v40, %v5454_v28  ;;  %v1867_v50 = vsel %vm396_vm6, %v1863_v44, %v5453_v39  ;;  %v1866_v62 = vsel %vm223_vm4, %v6037_v0, %v5449_v47  ;;  %v1865_v63 = vsel %vm223_vm4, %v6039_v1, %v5448_v48  ;;  %v5589_v40 = vld [vmem:[%s6611_s4] sm:$0xff]   ;;  %v5590_v44 = vld [vmem:[%s6611_s4 + $0x8] sm:$0xff]  }
 0xb14   :  { %v1640_v4 = vmul.f32 %v5668_v5, %v5660_v52  ;;  %5000 = vmatprep.subr.bf16.mxu1 %v5588_v7  ;;  %v5457_v26 = vpop.permute.xlu1 %5456  ;;  %v1955_v0 = vsub.s32 1, %v5937_v21  ;;  %5006 = vmatprep.subr.bf16.mxu0 %v5589_v40 }
 0xb15   :  { %v5459_v51 = vunpack.i.h.bf16 %v5457_v26  ;;  %v5458_v52 = vunpack.i.l.bf16 %v5457_v26 }
 0xb16   :  { %4996 = vmatmul.mubr.msk.f32.vlgmr.msra.gmra.mrb[22].mxu0 %vm396_vm6, %v1640_v4  ;;  %v1956_v1 = vrot.slane %v5945_v23, %v1955_v0 }
 0xb17   :  { %5001 = vmatpush3.bf16.msra.mxu1 %v5588_v7  ;;  %v1869_v35 = vsel %vm396_vm6, %v1865_v63, %v5458_v52  ;;  %v1870_v41 = vsel %vm396_vm6, %v1866_v62, %v5459_v51  ;;  %5007 = vmatpush3.bf16.msra.mxu0 %v5589_v40  ;;  %v2016_v63 = vsub.s32 4, %v5937_v21 }
 0xb18   :  { %5008 = vmatprep.subr.bf16.mxu0 %v5590_v44 }
 0xb1b   :  { %5009 = vmatpush3.bf16.msra.mxu0 %v5590_v44 }
 0xbe4   :  { %v4990_v31 = vpop.f32.mrb[14].mxu1 }
 0xbe5   :  { %v1719_v8 = vpop.f32.mrb[15].mxu1 }
 0xbe6   :  { %v5460_v9 = vpack.i.bf16 %v4990_v31, %v1719_v8 }
 0xbe8   :  { %5461 = vrot.lane.b32.xlu0 %v5460_v9, %s5831_s27 }
 0xbe9   :  { %v4997_v18 = vpop.f32.mrb[22].mxu0 }
 0xbea   :  { %v1806_v19 = vpop.f32.mrb[23].mxu0 }
 0xbeb   :  { %v5465_v20 = vpack.i.bf16 %v4997_v18, %v1806_v19 }
 0xbed   :  { %5466 = vrot.lane.b32.xlu1 %v5465_v20, %s5831_s27 }
 0xc5a   :  { %v5462_v32 = vpop.permute.xlu0 %5461 }
 0xc5b   :  { %v5464_v45 = vunpack.i.h.bf16 %v5462_v32  ;;  %v5463_v46 = vunpack.i.l.bf16 %v5462_v32 }
 0xc5d   :  { %v1872_v53 = vsel %vm1871_vm7, %v1867_v50, %v5463_v46  ;;  %v1873_v33 = vsel %vm1871_vm7, %v1868_v49, %v5464_v45  ;;  %v5591_v45 = vld [vmem:[%s6612_s5] sm:$0xff]   ;;  %v5592_v46 = vld [vmem:[%s6612_s5 + $0x8] sm:$0xff]  }
 0xc5e   :  { %v1880_v54 = vpack.c.bf16 %v1873_v33, %v1872_v53  ;;  %5014 = vmatprep.subr.bf16.mxu1 %v5591_v45 }
 0xc5f   :  { %v5467_v55 = vpop.permute.xlu1 %5466 }
 0xc60   :  { %v5469_v29 = vunpack.i.h.bf16 %v5467_v55  ;;  %v5468_v30 = vunpack.i.l.bf16 %v5467_v55  ;;  %5002 = vmatprep.mubr.msk.bf16.mxu1 %vm161_vm3, %v1880_v54 }
 0xc62   :  { %v1875_v42 = vsel %vm1871_vm7, %v1870_v41, %v5469_v29  ;;  %v1874_v43 = vsel %vm1871_vm7, %v1869_v35, %v5468_v30  ;;  %v6219_v30 = vld [vmem:[%s6613_s6] sm:$0xff]  ;;  %v2024_v41 = vsub.s32 5, %v5937_v21 }
 0xc63   :  { %v1881_v34 = vpack.c.bf16 %v1875_v42, %v1874_v43  ;;  %v2017_v35 = vrot.slane %v6219_v30, %v2016_v63 }
 0xc65   :  { %5003 = vmatmul.mubr.msk.bf16.vlgmr.msra.gmra.mrb[16].mxu1 %vm161_vm3, %v1881_v34 }
 0xc66   :  { %5015 = vmatpush3.bf16.msra.mxu1 %v5591_v45 }
 0xc67   :  { %5016 = vmatprep.subr.bf16.mxu1 %v5592_v46 }
 0xc6a   :  { %5017 = vmatpush3.bf16.msra.mxu1 %v5592_v46 }
 0xd38   :  { %v5004_v56 = vpop.f32.mrb[16].mxu1 }
 0xd39   :  { %v1934_v57 = vpop.f32.mrb[17].mxu1  ;;  %v1951_v58 = vadd.f32 %v5004_v56, %v136_v17 }
 0xd3a   :  { %v1949_v59 = vadd.f32 %v1934_v57, %v134_v15  ;;  %v5005_v60 = vpop.f32.mrb[18].mxu1  ;;  %v2025_v57 = vrot.slane %v6219_v30, %v2024_v41 }
 0xd3b   :  { %v1937_v61 = vpop.f32.mrb[19].mxu1  ;;  %v1952_v5 = vadd.f32 %v5005_v60, %v137_v13  ;;  %v1959_v23 = vadd.f32 %v1956_v1, %v1951_v58 }
 0xd3c   :  { %v1950_v2 = vadd.f32 %v1937_v61, %v135_v16  ;;  %v1957_v3 = vadd.f32 %v1956_v1, %v1949_v59 }
 0xd3d   :  { %v1967_v11 = vsel %vm161_vm3, %v1959_v23, 0.0  ;;  %v1960_v15 = vadd.f32 %v1956_v1, %v1952_v5 }
 0xd3e   :  { %v1961_v4 = vsel %vm161_vm3, %v1957_v3, 0.0  ;;  %v1958_v6 = vadd.f32 %v1956_v1, %v1950_v2 }
 0xd3f   :  { %1962 = vadd.xlane.f32.xlu0 %v1961_v4  ;;  %v1970_v17 = vsel %vm161_vm3, %v1960_v15, 0.0 }
 0xd40   :  { %v1964_v10 = vsel %vm161_vm3, %v1958_v6, 0.0 }
 0xd41   :  { %1965 = vadd.xlane.f32.xlu1 %v1964_v10 }
 0xd43   :  { %1968 = vadd.xlane.f32.xlu0 %v1967_v11 }
 0xd47   :  { %1971 = vadd.xlane.f32.xlu0 %v1970_v17  ;;  %v5593_v17 = vld [vmem:[%s6612_s5 + $0x10] sm:$0xff]  }
 0xd48   :  { %5018 = vmatprep.subr.bf16.mxu1 %v5593_v17 }
 0xd49   :  { %5019 = vmatpush3.bf16.msra.mxu1 %v5593_v17  ;;  %v5596_v17 = vld [vmem:[%s6609_s2 + $0x18] sm:$0xff]  }
 0xdcc   :  { %v1963_v14 = vpop.xlane.xlu0 %1962 }
 0xdcd   :  { %v1974_v16 = vmul.f32 0.03125, %v1963_v14  ;;  %v5594_v14 = vld [vmem:[%s6612_s5 + $0x18] sm:$0xff]  }
 0xdce   :  { %v1966_v7 = vpop.xlane.xlu1 %1965  ;;  %5020 = vmatprep.subr.bf16.mxu1 %v5594_v14 }
 0xdcf   :  { %v1978_v12 = vsub.f32 %v1957_v3, %v1974_v16  ;;  %v1975_v13 = vmul.f32 0.03125, %v1966_v7  ;;  %5021 = vmatpush3.bf16.msra.mxu1 %v5594_v14  ;;  %v2038_v16 = vsub.s32 2, %v5937_v21 }
 0xdd0   :  { %v1969_v31 = vpop.xlane.xlu0 %1968 }
 0xdd1   :  { %v1979_v8 = vsub.f32 %v1958_v6, %v1975_v13  ;;  %v1976_v9 = vmul.f32 0.03125, %v1969_v31  ;;  %v1982_v18 = vmul.f32 %v1978_v12, %v1978_v12  ;;  %v2039_v7 = vrot.slane %v6219_v30, %v2038_v16 }
 0xdd3   :  { %v1980_v19 = vsub.f32 %v1959_v23, %v1976_v9  ;;  %v1986_v20 = vsel %vm161_vm3, %v1982_v18, 0.0  ;;  %v1983_v24 = vmul.f32 %v1979_v8, %v1979_v8 }
 0xdd4   :  { %v1972_v25 = vpop.xlane.xlu0 %1971  ;;  %1987 = vadd.xlane.f32.xlu1 %v1986_v20 }
 0xdd5   :  { %v1977_v27 = vmul.f32 0.03125, %v1972_v25  ;;  %v1989_v36 = vsel %vm161_vm3, %v1983_v24, 0.0  ;;  %v1984_v37 = vmul.f32 %v1980_v19, %v1980_v19 }
 0xdd6   :  { %1990 = vadd.xlane.f32.xlu0 %v1989_v36 }
 0xdd7   :  { %v1981_v28 = vsub.f32 %v1960_v15, %v1977_v27  ;;  %v1992_v39 = vsel %vm161_vm3, %v1984_v37, 0.0 }
 0xdd8   :  { %1993 = vadd.xlane.f32.xlu1 %v1992_v39  ;;  %v2123_v39 = vsub.s32 3, %v5937_v21 }
 0xdd9   :  { %v1985_v26 = vmul.f32 %v1981_v28, %v1981_v28 }
 0xddb   :  { %v1995_v32 = vsel %vm161_vm3, %v1985_v26, 0.0  ;;  %v2124_v26 = vrot.slane %v6219_v30, %v2123_v39 }
 0xddc   :  { %1996 = vadd.xlane.f32.xlu0 %v1995_v32 }
 0xe61   :  { %v1988_v47 = vpop.xlane.xlu1 %1987 }
 0xe62   :  { %v1998_v48 = vmul.f32 0.03125, %v1988_v47 }
 0xe63   :  { %v1991_v49 = vpop.xlane.xlu0 %1990 }
 0xe64   :  { %v2002_v50 = vadd.f32 1e-05, %v1998_v48  ;;  %v1999_v51 = vmul.f32 0.03125, %v1991_v49 }
 0xe65   :  { %v1994_v52 = vpop.xlane.xlu1 %1993 }
 0xe66   :  { %5669 = vrsqrt.f32 %v2002_v50  ;;  %v2003_v53 = vadd.f32 1e-05, %v1999_v51  ;;  %v2000_v33 = vmul.f32 0.03125, %v1994_v52 }
 0xe68   :  { %5671 = vrsqrt.f32 %v2003_v53  ;;  %v2004_v54 = vadd.f32 1e-05, %v2000_v33 }
 0xe69   :  { %v1997_v55 = vpop.xlane.xlu0 %1996 }
 0xe6a   :  { %5673 = vrsqrt.f32 %v2004_v54  ;;  %v2001_v62 = vmul.f32 0.03125, %v1997_v55 }
 0xe6c   :  { %v2005_v29 = vadd.f32 1e-05, %v2001_v62 }
 0xe6e   :  { %5675 = vrsqrt.f32 %v2005_v29 }
 0xe70   :  { %v5670_v42 = vpop.eup %5669 }
 0xe71   :  { %v2010_v43 = vmul.f32 %v5670_v42, %v1978_v12 }
 0xe72   :  { %v5672_v34 = vpop.eup %5671 }
 0xe73   :  { %v2011_v56 = vmul.f32 %v5672_v34, %v1979_v8  ;;  %v2018_v1 = vmul.f32 %v2017_v35, %v2010_v43 }
 0xe74   :  { %v5674_v58 = vpop.eup %5673 }
 0xe75   :  { %v2012_v59 = vmul.f32 %v5674_v58, %v1980_v19  ;;  %v2019_v60 = vmul.f32 %v2017_v35, %v2011_v56  ;;  %v2026_v61 = vadd.f32 %v2025_v57, %v2018_v1 }
 0xe77   :  { %v2027_v2 = vadd.f32 %v2025_v57, %v2019_v60  ;;  %v2020_v5 = vmul.f32 %v2017_v35, %v2012_v59 }
 0xe78   :  { %v5676_v3 = vpop.eup %5675 }
 0xe79   :  { %v2013_v4 = vmul.f32 %v5676_v3, %v1981_v28  ;;  %v2034_v6 = vpack.c.bf16 %v2027_v2, %v2026_v61  ;;  %v2028_v10 = vadd.f32 %v2025_v57, %v2020_v5 }
 0xe7b   :  { %v2021_v23 = vmul.f32 %v2017_v35, %v2013_v4  ;;  %5010 = vmatprep.mubr.msk.bf16.mxu0 %vm161_vm3, %v2034_v6 }
 0xe7d   :  { %v2029_v11 = vadd.f32 %v2025_v57, %v2021_v23 }
 0xe7f   :  { %v2035_v15 = vpack.c.bf16 %v2029_v11, %v2028_v10 }
 0xe81   :  { %5011 = vmatmul.mubr.msk.bf16.vlgmr.msra.gmra.mrb[24].mxu0 %vm161_vm3, %v2035_v15  ;;  %v5595_v15 = vld [vmem:[%s6609_s2 + $0x10] sm:$0xff]  }
 0xe82   :  { %5026 = vmatprep.subr.bf16.mxu0 %v5595_v15 }
 0xe83   :  { %5027 = vmatpush3.bf16.msra.mxu0 %v5595_v15 }
 0xe84   :  { %5028 = vmatprep.subr.bf16.mxu0 %v5596_v17 }
 0xe87   :  { %5029 = vmatpush3.bf16.msra.mxu0 %v5596_v17 }
 0xf54   :  { %v5012_v12 = vpop.f32.mrb[24].mxu0 }
 0xf55   :  { %v2101_v13 = vadd.f32 %v5012_v12, %v2039_v7  ;;  %v2092_v31 = vpop.f32.mrb[25].mxu0 }
 0xf56   :  { %v2093_v8 = vadd.f32 %v2092_v31, %v2039_v7  ;;  %v5013_v9 = vpop.f32.mrb[26].mxu0 }
 0xf57   :  { %v2104_v18 = vadd.f32 %v5013_v9, %v2039_v7  ;;  %v2095_v19 = vpop.f32.mrb[27].mxu0  ;;  %v2109_v24 = vmax.f32 %v2101_v13, 0.0 }
 0xf58   :  { %v2096_v20 = vadd.f32 %v2095_v19, %v2039_v7  ;;  %v2107_v27 = vmax.f32 %v2093_v8, 0.0 }
 0xf59   :  { %v2110_v25 = vmax.f32 %v2104_v18, 0.0 }
 0xf5a   :  { %v2108_v36 = vmax.f32 %v2096_v20, 0.0 }
 0xf5b   :  { %v2120_v37 = vpack.c.bf16 %v2110_v25, %v2109_v24 }
 0xf5c   :  { %v2119_v28 = vpack.c.bf16 %v2108_v36, %v2107_v27  ;;  %v2263_v27 = vsub.s32 6, %v5937_v21 }
 0xf5e   :  { %5022 = vmatprep.mubr.msk.bf16.mxu1 %vm2149_vm8, %v2119_v28  ;;  %v2264_v36 = vrot.slane %v6219_v30, %v2263_v27 }
 0xf5f   :  { %5023 = vmatmul.mubr.msk.bf16.vlgmr.msra.gmra.mrb[20].mxu1 %vm2149_vm8, %v2120_v37  ;;  %v2271_v37 = vsub.s32 7, %v5937_v21 }
0x1032   :  { %v5024_v32 = vpop.f32.mrb[20].mxu1 }
0x1033   :  { %v2190_v40 = vpop.f32.mrb[21].mxu1  ;;  %v2199_v44 = vadd.f32 %v5024_v32, %v2124_v26 }
0x1034   :  { %v2191_v45 = vadd.f32 %v2190_v40, %v2124_v26  ;;  %v5025_v46 = vpop.f32.mrb[22].mxu1 }
0x1035   :  { %v2193_v47 = vpop.f32.mrb[23].mxu1  ;;  %v2202_v48 = vadd.f32 %v5025_v46, %v2124_v26  ;;  %v2207_v53 = vadd.f32 %v2199_v44, %v2028_v10 }
0x1036   :  { %v2194_v49 = vadd.f32 %v2193_v47, %v2124_v26  ;;  %v2205_v50 = vadd.f32 %v2191_v45, %v2026_v61  ;;  %v2272_v45 = vrot.slane %v6219_v30, %v2271_v37 }
0x1037   :  { %v2208_v54 = vadd.f32 %v2202_v48, %v2029_v11  ;;  %v2215_v55 = vsel %vm161_vm3, %v2207_v53, 0.0 }
0x1038   :  { %v2209_v51 = vsel %vm161_vm3, %v2205_v50, 0.0  ;;  %v2206_v52 = vadd.f32 %v2194_v49, %v2027_v2 }
0x1039   :  { %2210 = vadd.xlane.f32.xlu1 %v2209_v51  ;;  %v2218_v62 = vsel %vm161_vm3, %v2208_v54, 0.0 }
0x103a   :  { %v2212_v33 = vsel %vm161_vm3, %v2206_v52, 0.0 }
0x103b   :  { %2213 = vadd.xlane.f32.xlu0 %v2212_v33 }
0x103d   :  { %2216 = vadd.xlane.f32.xlu1 %v2215_v55 }
0x103f   :  { %2219 = vadd.xlane.f32.xlu0 %v2218_v62 }
0x10c6   :  { %v2211_v29 = vpop.xlane.xlu1 %2210 }
0x10c7   :  { %v2221_v35 = vmul.f32 0.03125, %v2211_v29  ;;  %v6285_v29 = vld [vmem:[%s6613_s6 + $0x8] sm:$0xff] }
0x10c8   :  { %v2214_v42 = vpop.xlane.xlu0 %2213 }
0x10c9   :  { %v2225_v43 = vsub.f32 %v2205_v50, %v2221_v35  ;;  %v2222_v34 = vmul.f32 0.03125, %v2214_v42  ;;  %v2289_v35 = vrot.slane %v6285_v29, %v5940_v22 }
0x10ca   :  { %v2217_v56 = vpop.xlane.xlu1 %2216 }
0x10cb   :  { %v2226_v1 = vsub.f32 %v2206_v52, %v2222_v34  ;;  %v2223_v57 = vmul.f32 0.03125, %v2217_v56  ;;  %v2229_v58 = vmul.f32 %v2225_v43, %v2225_v43 }
0x10cc   :  { %v2220_v59 = vpop.xlane.xlu0 %2219 }
0x10cd   :  { %v2227_v60 = vsub.f32 %v2207_v53, %v2223_v57  ;;  %v2224_v61 = vmul.f32 0.03125, %v2220_v59  ;;  %v2233_v2 = vsel %vm161_vm3, %v2229_v58, 0.0  ;;  %v2230_v3 = vmul.f32 %v2226_v1, %v2226_v1 }
0x10ce   :  { %2234 = vadd.xlane.f32.xlu1 %v2233_v2 }
0x10cf   :  { %v2228_v5 = vsub.f32 %v2208_v54, %v2224_v61  ;;  %v2236_v4 = vsel %vm161_vm3, %v2230_v3, 0.0  ;;  %v2231_v6 = vmul.f32 %v2227_v60, %v2227_v60 }
0x10d0   :  { %2237 = vadd.xlane.f32.xlu0 %v2236_v4 }
0x10d1   :  { %v2239_v23 = vsel %vm161_vm3, %v2231_v6, 0.0  ;;  %v2232_v10 = vmul.f32 %v2228_v5, %v2228_v5 }
0x10d2   :  { %2240 = vadd.xlane.f32.xlu1 %v2239_v23 }
0x10d3   :  { %v2242_v11 = vsel %vm161_vm3, %v2232_v10, 0.0 }
0x10d4   :  { %2243 = vadd.xlane.f32.xlu0 %v2242_v11 }
0x115b   :  { %v2235_v14 = vpop.xlane.xlu1 %2234 }
0x115c   :  { %v2245_v7 = vmul.f32 0.03125, %v2235_v14 }
0x115d   :  { %v2238_v12 = vpop.xlane.xlu0 %2237 }
0x115e   :  { %v2249_v13 = vadd.f32 1e-05, %v2245_v7  ;;  %v2246_v31 = vmul.f32 0.03125, %v2238_v12 }
0x115f   :  { %v2241_v8 = vpop.xlane.xlu1 %2240 }
0x1160   :  { %5677 = vrsqrt.f32 %v2249_v13  ;;  %v2250_v9 = vadd.f32 1e-05, %v2246_v31  ;;  %v2247_v18 = vmul.f32 0.03125, %v2241_v8 }
0x1161   :  { %v2244_v19 = vpop.xlane.xlu0 %2243 }
0x1162   :  { %5679 = vrsqrt.f32 %v2250_v9  ;;  %v2251_v20 = vadd.f32 1e-05, %v2247_v18  ;;  %v2248_v24 = vmul.f32 0.03125, %v2244_v19 }
0x1164   :  { %5681 = vrsqrt.f32 %v2251_v20  ;;  %v2252_v25 = vadd.f32 1e-05, %v2248_v24 }
0x1166   :  { %5683 = vrsqrt.f32 %v2252_v25 }
0x116a   :  { %v5678_v28 = vpop.eup %5677 }
0x116b   :  { %v2257_v26 = vmul.f32 %v5678_v28, %v2225_v43 }
0x116c   :  { %v5680_v32 = vpop.eup %5679 }
0x116d   :  { %v2258_v40 = vmul.f32 %v5680_v32, %v2226_v1  ;;  %v2265_v44 = vmul.f32 %v2264_v36, %v2257_v26 }
0x116e   :  { %v5682_v46 = vpop.eup %5681 }
0x116f   :  { %v2259_v47 = vmul.f32 %v5682_v46, %v2227_v60  ;;  %v2266_v48 = vmul.f32 %v2264_v36, %v2258_v40  ;;  %v6268_v52 = vadd.f32 %v2272_v45, %v2265_v44 }
0x1170   :  { %v5684_v49 = vpop.eup %5683 }
0x1171   :  { %v2267_v50 = vmul.f32 %v2264_v36, %v2259_v47  ;;  %v2260_v51 = vmul.f32 %v5684_v49, %v2228_v5  ;;  %v6270_v53 = vadd.f32 %v2272_v45, %v2266_v48 }
0x1173   :  { %v2268_v33 = vmul.f32 %v2264_v36, %v2260_v51  ;;  %v2284_v54 = vpack.c.bf16 %v6270_v53, %v6268_v52  ;;  %v6275_v55 = vadd.f32 %v2272_v45, %v2267_v50 }
0x1175   :  { %5030 = vmatprep.mubr.msk.bf16.mxu0 %vm161_vm3, %v2284_v54  ;;  %v6277_v62 = vadd.f32 %v2272_v45, %v2268_v33 }
0x1177   :  { %v2285_v30 = vpack.c.bf16 %v6277_v62, %v6275_v55 }
0x1179   :  { %5031 = vmatmul.mubr.msk.bf16.vlgmr.msra.gmra.mrb[28].mxu0 %vm161_vm3, %v2285_v30 }
0x124c   :  { %v5032_v42 = vpop.f32.mrb[28].mxu0 }
0x124d   :  { %v6289_v43 = vadd.f32 %v5032_v42, %v2289_v35  ;;  %v2342_v34 = vpop.f32.mrb[29].mxu0 }
0x124e   :  { %v6291_v56 = vadd.f32 %v2342_v34, %v2289_v35  ;;  %v5033_v1 = vpop.f32.mrb[30].mxu0 }
0x124f   :  { %v6293_v57 = vadd.f32 %v5033_v1, %v2289_v35  ;;  %v2345_v58 = vpop.f32.mrb[31].mxu0  ;;  %5045 = vmatprep.mubr.msk.f32.mxu1 %vm223_vm4, %v6289_v43 }
0x1250   :  { %v6297_v59 = vadd.f32 %v2345_v58, %v2289_v35  ;;  %5038 = vmatprep.mubr.msk.f32.mxu0 %vm223_vm4, %v6291_v56 }
0x1251   :  { %v6303_v60 = vpack.i.bf16 %v6293_v57, %v6289_v43 }
0x1252   :  { %v6307_v61 = vpack.i.bf16 %v6297_v59, %v6291_v56 }
0x1253   :  { %5476 = vrot.lane.b32.xlu0 %v6303_v60, %s5819_s11 }
0x1254   :  { %5471 = vrot.lane.b32.xlu1 %v6307_v61, %s5819_s11 }
0x12c5   :  { %v5477_v2 = vpop.permute.xlu0 %5476 }
0x12c6   :  { %v5479_v3 = vunpack.i.h.bf16 %v5477_v2  ;;  %v5478_v5 = vunpack.i.l.bf16 %v5477_v2  ;;  %v5472_v4 = vpop.permute.xlu1 %5471 }
0x12c7   :  { %v5474_v6 = vunpack.i.h.bf16 %v5472_v4  ;;  %v5473_v23 = vunpack.i.l.bf16 %v5472_v4 }
0x12c8   :  { %v5265_v10 = vpack.c.bf16 %v5479_v3, %v5478_v5 }
0x12c9   :  { %v5259_v11 = vpack.c.bf16 %v5474_v6, %v5473_v23 }
0x12ca   :  { %5267 = vmatprep.subr.msk.bf16.mxu1 %vm5975_vm5, %v5265_v10 }
0x12cb   :  { %5261 = vmatprep.subr.msk.bf16.mxu0 %vm5975_vm5, %v5259_v11  ;;  %5270 = vmatpush3.bf16.xpose.msk.msra.mxu1 %vm5975_vm5, %v5265_v10 }
0x12cc   :  { %5264 = vmatpush3.bf16.xpose.msk.msra.mxu0 %vm5975_vm5, %v5259_v11 }
0x12d2   :  { %5046 = vmatmul.mubr.msk.f32.vlgmr.msra.gmra.mrb[24].mxu1 %vm223_vm4, %v6293_v57 }
0x12d3   :  { %5039 = vmatmul.mubr.msk.f32.vlgmr.msra.gmra.mrb[32].mxu0 %vm223_vm4, %v6297_v59 }
0x13a5   :  { %v5047_v15 = vpop.f32.mrb[24].mxu1 }
0x13a6   :  { %v5040_v17 = vpop.f32.mrb[32].mxu0  ;;  %v2526_v14 = vpop.f32.mrb[25].mxu1  ;;  %v2544_v31 = vsel %vm396_vm6, %v5047_v15, -inf }
0x13a7   :  { %v2437_v7 = vpop.f32.mrb[33].mxu0  ;;  %v2538_v12 = vsel %vm396_vm6, %v5040_v17, -inf  ;;  %v2541_v8 = vsel %vm396_vm6, %v2526_v14, -inf }
0x13a8   :  { %2539 = vmax.xlane.f32.xlu0 %v2538_v12  ;;  %v2535_v13 = vsel %vm396_vm6, %v2437_v7, -inf }
0x13a9   :  { %2536 = vmax.xlane.f32.xlu1 %v2535_v13 }
0x13ac   :  { %2545 = vmax.xlane.f32.xlu0 %v2544_v31 }
0x13ad   :  { %2542 = vmax.xlane.f32.xlu1 %v2541_v8 }
0x13be   :  { %5481 = vrot.lane.b32.xlu1 %v6307_v61, %s5816_s20 }
0x13c2   :  { %5491 = vrot.lane.b32.xlu1 %v6307_v61, %s5820_s12 }
0x1435   :  { %v2540_v9 = vpop.xlane.xlu0 %2539 }
0x1436   :  { %v2537_v18 = vpop.xlane.xlu1 %2536  ;;  %v2548_v19 = vsub.f32 %v5040_v17, %v2540_v9 }
0x1437   :  { %v2547_v20 = vsub.f32 %v2437_v7, %v2537_v18 }
0x1438   :  { %v2553_v26 = vmul.f32 1.442695, %v2548_v19 }
0x1439   :  { %v2546_v24 = vpop.xlane.xlu0 %2545  ;;  %v2551_v40 = vmul.f32 1.442695, %v2547_v20 }
0x143a   :  { %v2550_v25 = vsub.f32 %v5047_v15, %v2546_v24  ;;  %v2543_v36 = vpop.xlane.xlu1 %2542 }
0x143b   :  { %v2549_v28 = vsub.f32 %v2526_v14, %v2543_v36 }
0x143c   :  { %v2557_v32 = vmul.f32 1.442695, %v2550_v25 }
0x143d   :  { %v2555_v44 = vmul.f32 1.442695, %v2549_v28 }
0x143e   :  { %5685 = vpow2.f32 %v2557_v32  ;;  %v5482_v45 = vpop.permute.xlu1 %5481 }
0x143f   :  { %5687 = vpow2.f32 %v2555_v44  ;;  %v5484_v46 = vunpack.i.h.bf16 %v5482_v45  ;;  %v5483_v47 = vunpack.i.l.bf16 %v5482_v45 }
0x1440   :  { %5689 = vpow2.f32 %v2553_v26 }
0x1441   :  { %5691 = vpow2.f32 %v2551_v40  ;;  %v5271_v48 = vpack.c.bf16 %v5484_v46, %v5483_v47 }
0x1442   :  { %v5492_v49 = vpop.permute.xlu1 %5491 }
0x1443   :  { %v5494_v50 = vunpack.i.h.bf16 %v5492_v49  ;;  %v5493_v51 = vunpack.i.l.bf16 %v5492_v49  ;;  %5272 = vmatprep.subr.bf16.mxu0 %v5271_v48 }
0x1444   :  { %5274 = vmatpush3.bf16.msra.mxu0 %v5271_v48 }
0x1445   :  { %v5279_v33 = vpack.c.bf16 %v5494_v50, %v5493_v51 }
0x1447   :  { %5281 = vmatprep.subr.msk.bf16.mxu1 %vm5975_vm5, %v5279_v33 }
0x1448   :  { %v5686_v54 = vpop.eup %5685  ;;  %5284 = vmatpush3.bf16.xpose.msk.msra.mxu1 %vm5975_vm5, %v5279_v33 }
0x1449   :  { %v5688_v30 = vpop.eup %5687  ;;  %v2568_v35 = vsel %vm396_vm6, %v5686_v54, 0.0 }
0x144a   :  { %v5690_v42 = vpop.eup %5689  ;;  %2569 = vadd.xlane.f32.xlu0 %v2568_v35  ;;  %v2565_v34 = vsel %vm396_vm6, %v5688_v30, 0.0 }
0x144b   :  { %v5692_v1 = vpop.eup %5691  ;;  %2566 = vadd.xlane.f32.xlu1 %v2565_v34  ;;  %v2562_v58 = vsel %vm396_vm6, %v5690_v42, 0.0 }
0x144c   :  { %v2559_v2 = vsel %vm396_vm6, %v5692_v1, 0.0 }
0x144e   :  { %2563 = vadd.xlane.f32.xlu0 %v2562_v58 }
0x144f   :  { %2560 = vadd.xlane.f32.xlu1 %v2559_v2 }
0x1460   :  { %5496 = vrot.lane.b32.xlu1 %v6303_v60, %s5820_s12 }
0x1464   :  { %5486 = vrot.lane.b32.xlu0 %v6303_v60, %s5816_s20  ;;  %2755 = vrot.lane.b32.xlu1 %v6297_v59, %s5821_s13 }
0x1468   :  { %2753 = vrot.lane.b32.xlu0 %v6291_v56, %s5821_s13  ;;  %2846 = vrot.lane.b32.xlu1 %v6293_v57, %s5821_s13 }
0x146c   :  { %2844 = vrot.lane.b32.xlu0 %v6289_v43, %s5821_s13 }
0x14d7   :  { %v2570_v3 = vpop.xlane.xlu0 %2569 }
0x14d8   :  { %v2567_v5 = vpop.xlane.xlu1 %2566 }
0x14d9   :  { %5693 = vrcp.f32 %v2567_v5 }
0x14db   :  { %v2564_v4 = vpop.xlane.xlu0 %2563 }
0x14dc   :  { %5695 = vrcp.f32 %v2564_v4  ;;  %v2561_v6 = vpop.xlane.xlu1 %2560 }
0x14dd   :  { %5697 = vrcp.f32 %v2561_v6 }
0x14de   :  { %5699 = vrcp.f32 %v2570_v3 }
0x14df   :  { %v5487_v23 = vpop.permute.xlu0 %5486 }
0x14e0   :  { %v5489_v10 = vunpack.i.h.bf16 %v5487_v23  ;;  %v5488_v11 = vunpack.i.l.bf16 %v5487_v23  ;;  %v5497_v15 = vpop.permute.xlu1 %5496 }
0x14e1   :  { %v5499_v8 = vunpack.i.h.bf16 %v5497_v15  ;;  %v5498_v9 = vunpack.i.l.bf16 %v5497_v15 }
0x14e2   :  { %v5275_v17 = vpack.c.bf16 %v5489_v10, %v5488_v11 }
0x14e3   :  { %v2754_v14 = vpop.permute.xlu0 %2753  ;;  %v5694_v12 = vpop.eup %5693  ;;  %v5285_v25 = vpack.c.bf16 %v5499_v8, %v5498_v9 }
0x14e4   :  { %5066 = vmatprep.mubr.msk.f32.mxu1 %vm223_vm4, %v2754_v14  ;;  %v2756_v7 = vpop.permute.xlu1 %2755  ;;  %5276 = vmatprep.subr.bf16.mxu0 %v5275_v17  ;;  %v2577_v24 = vmul.f32 %v5694_v12, %v5688_v30 }
0x14e5   :  { %5067 = vmatmul.mubr.msk.f32.vlgmr.msra.gmra.mrb[26].mxu1 %vm223_vm4, %v2756_v7 }
0x14e6   :  { %v5696_v13 = vpop.eup %5695 }
0x14e7   :  { %v5698_v31 = vpop.eup %5697  ;;  %v2576_v19 = vmul.f32 %v5696_v13, %v5690_v42  ;;  %v2845_v28 = vpop.permute.xlu0 %2844 }
0x14e8   :  { %v2575_v18 = vmul.f32 %v5698_v31, %v5692_v1  ;;  %v5700_v20 = vpop.eup %5699  ;;  %v2847_v26 = vpop.permute.xlu1 %2846 }
0x14e9   :  { %v2578_v36 = vmul.f32 %v5700_v20, %v5686_v54 }
0x14ea   :  { %5052 = vmatprep.mubr.msk.f32.mxu0 %vm396_vm6, %v2575_v18 }
0x14eb   :  { %5053 = vmatmul.mubr.msk.f32.vlgmr.msra.gmra.mrb[34].mxu0 %vm396_vm6, %v2576_v19 }
0x14ec   :  { %5278 = vmatpush3.bf16.msra.mxu0 %v5275_v17  ;;  %5059 = vmatprep.mubr.msk.f32.mxu0 %vm396_vm6, %v2577_v24 }
0x14ed   :  { %5287 = vmatprep.subr.msk.bf16.mxu0 %vm5975_vm5, %v5285_v25 }
0x14ef   :  { %5060 = vmatmul.mubr.msk.f32.vlgmr.msra.gmra.mrb[36].mxu0 %vm396_vm6, %v2578_v36 }
0x14f0   :  { %5073 = vmatprep.mubr.msk.f32.mxu0 %vm223_vm4, %v2845_v28 }
0x14f5   :  { %5290 = vmatpush3.bf16.xpose.msk.msra.mxu0 %vm5975_vm5, %v5285_v25 }
0x14fc   :  { %5074 = vmatmul.mubr.msk.f32.vlgmr.msra.gmra.mrb[38].mxu0 %vm223_vm4, %v2847_v26 }
0x15b8   :  { %v5068_v32 = vpop.f32.mrb[26].mxu1 }
0x15b9   :  { %v2835_v40 = vpop.f32.mrb[27].mxu1  ;;  %v2938_v44 = vsel %vm396_vm6, %v5068_v32, -inf }
0x15ba   :  { %2939 = vmax.xlane.f32.xlu1 %v2938_v44  ;;  %v2935_v45 = vsel %vm396_vm6, %v2835_v40, -inf }
0x15bb   :  { %2936 = vmax.xlane.f32.xlu0 %v2935_v45 }
0x15be   :  { %v6367_v46 = vpop.f32.mrb[34].mxu0 }
0x15bf   :  { %v6369_v47 = vpop.f32.mrb[35].mxu0 }
0x15c2   :  { %v6371_v48 = vpop.f32.mrb[36].mxu0 }
0x15c3   :  { %v6373_v49 = vpop.f32.mrb[37].mxu0 }
0x15cf   :  { %v5075_v50 = vpop.f32.mrb[38].mxu0 }
0x15d0   :  { %v2926_v51 = vpop.f32.mrb[39].mxu0  ;;  %v2944_v54 = vsel %vm396_vm6, %v5075_v50, -inf }
0x15d1   :  { %v2941_v33 = vsel %vm396_vm6, %v2926_v51, -inf }
0x15d2   :  { %2942 = vmax.xlane.f32.xlu0 %v2941_v33 }
0x15d6   :  { %2945 = vmax.xlane.f32.xlu0 %v2944_v54 }
0x1647   :  { %v2940_v30 = vpop.xlane.xlu1 %2939 }
0x1648   :  { %v2948_v35 = vsub.f32 %v5068_v32, %v2940_v30  ;;  %v2937_v42 = vpop.xlane.xlu0 %2936 }
0x1649   :  { %v2947_v34 = vsub.f32 %v2835_v40, %v2937_v42 }
0x164a   :  { %v2953_v1 = vmul.f32 1.442695, %v2948_v35 }
0x164b   :  { %v2951_v58 = vmul.f32 1.442695, %v2947_v34 }
0x164c   :  { %5701 = vpow2.f32 %v2953_v1 }
0x164d   :  { %5703 = vpow2.f32 %v2951_v58 }
0x1656   :  { %v5702_v2 = vpop.eup %5701 }
0x1657   :  { %v5704_v3 = vpop.eup %5703  ;;  %v2962_v5 = vsel %vm396_vm6, %v5702_v2, 0.0 }
0x1658   :  { %2963 = vadd.xlane.f32.xlu0 %v2962_v5  ;;  %v2959_v4 = vsel %vm396_vm6, %v5704_v3, 0.0 }
0x1659   :  { %2960 = vadd.xlane.f32.xlu1 %v2959_v4 }
0x165f   :  { %v2943_v6 = vpop.xlane.xlu0 %2942 }
0x1660   :  { %v2949_v15 = vsub.f32 %v2926_v51, %v2943_v6 }
0x1662   :  { %v2955_v17 = vmul.f32 1.442695, %v2949_v15 }
0x1663   :  { %v2946_v23 = vpop.xlane.xlu0 %2945 }
0x1664   :  { %v2950_v10 = vsub.f32 %v5075_v50, %v2946_v23 }
0x1666   :  { %v2957_v11 = vmul.f32 1.442695, %v2950_v10 }
0x1668   :  { %5705 = vpow2.f32 %v2957_v11 }
0x1669   :  { %5707 = vpow2.f32 %v2955_v17 }
0x166a   :  { %5501 = vrot.lane.b32.xlu1 %v6307_v61, %s5822_s14 }
0x166e   :  { %5511 = vrot.lane.b32.xlu1 %v6307_v61, %s5823_s15  ;;  %5506 = vrot.lane.b32.xlu0 %v6303_v60, %s5822_s14 }
0x1672   :  { %5516 = vrot.lane.b32.xlu1 %v6303_v60, %s5823_s15  ;;  %v5706_v14 = vpop.eup %5705 }
0x1673   :  { %v2968_v7 = vsel %vm396_vm6, %v5706_v14, 0.0  ;;  %v5708_v12 = vpop.eup %5707 }
0x1674   :  { %v2965_v13 = vsel %vm396_vm6, %v5708_v12, 0.0 }
0x1676   :  { %3155 = vrot.lane.b32.xlu1 %v6297_v59, %s5824_s16 }
0x168d   :  { %2969 = vadd.xlane.f32.xlu0 %v2968_v7 }
0x169a   :  { %2966 = vadd.xlane.f32.xlu1 %v2965_v13 }
0x16a3   :  { %3153 = vrot.lane.b32.xlu0 %v6291_v56, %s5824_s16 }
0x16a7   :  { %3244 = vrot.lane.b32.xlu0 %v6289_v43, %s5824_s16 }
0x16ab   :  { %3246 = vrot.lane.b32.xlu1 %v6293_v57, %s5824_s16 }
0x16e5   :  { %v2964_v31 = vpop.xlane.xlu0 %2963 }
0x16e6   :  { %5709 = vrcp.f32 %v2964_v31  ;;  %v2961_v8 = vpop.xlane.xlu1 %2960 }
0x16e7   :  { %5711 = vrcp.f32 %v2961_v8 }
0x16e9   :  { %v5507_v9 = vpop.permute.xlu0 %5506 }
0x16ea   :  { %v5509_v18 = vunpack.i.h.bf16 %v5507_v9  ;;  %v5508_v19 = vunpack.i.l.bf16 %v5507_v9  ;;  %v5502_v20 = vpop.permute.xlu1 %5501 }
0x16eb   :  { %v5504_v24 = vunpack.i.h.bf16 %v5502_v20  ;;  %v5503_v25 = vunpack.i.l.bf16 %v5502_v20 }
0x16ec   :  { %v5295_v36 = vpack.c.bf16 %v5509_v18, %v5508_v19 }
0x16ed   :  { %v5291_v28 = vpack.c.bf16 %v5504_v24, %v5503_v25 }
0x16ee   :  { %v5512_v26 = vpop.permute.xlu1 %5511  ;;  %5296 = vmatprep.subr.bf16.mxu0 %v5295_v36 }
0x16ef   :  { %v5514_v32 = vunpack.i.h.bf16 %v5512_v26  ;;  %v5513_v40 = vunpack.i.l.bf16 %v5512_v26  ;;  %5292 = vmatprep.subr.bf16.mxu1 %v5291_v28  ;;  %5298 = vmatpush3.bf16.msra.mxu0 %v5295_v36 }
0x16f0   :  { %v5710_v44 = vpop.eup %5709  ;;  %5294 = vmatpush3.bf16.msra.mxu1 %v5291_v28 }
0x16f1   :  { %v5712_v45 = vpop.eup %5711  ;;  %v5299_v50 = vpack.c.bf16 %v5514_v32, %v5513_v40  ;;  %v2976_v54 = vmul.f32 %v5710_v44, %v5702_v2 }
0x16f2   :  { %v5517_v51 = vpop.permute.xlu1 %5516  ;;  %v2975_v33 = vmul.f32 %v5712_v45, %v5704_v3 }
0x16f3   :  { %v5519_v30 = vunpack.i.h.bf16 %v5517_v51  ;;  %v5518_v35 = vunpack.i.l.bf16 %v5517_v51  ;;  %5301 = vmatprep.subr.msk.bf16.mxu1 %vm5975_vm5, %v5299_v50 }
0x16f4   :  { %5080 = vmatprep.mubr.msk.f32.mxu1 %vm396_vm6, %v2975_v33 }
0x16f5   :  { %v5305_v42 = vpack.c.bf16 %v5519_v30, %v5518_v35  ;;  %5081 = vmatmul.mubr.msk.f32.vlgmr.msra.gmra.mrb[28].mxu1 %vm396_vm6, %v2976_v54 }
0x16f6   :  { %v3156_v58 = vpop.permute.xlu1 %3155 }
0x16f7   :  { %5307 = vmatprep.subr.msk.bf16.mxu0 %vm5975_vm5, %v5305_v42 }
0x16f9   :  { %5304 = vmatpush3.bf16.xpose.msk.msra.mxu1 %vm5975_vm5, %v5299_v50 }
0x171a   :  { %v2970_v34 = vpop.xlane.xlu0 %2969 }
0x171b   :  { %5713 = vrcp.f32 %v2970_v34 }
0x171e   :  { %v3154_v1 = vpop.permute.xlu0 %3153 }
0x171f   :  { %5094 = vmatprep.mubr.msk.f32.mxu1 %vm223_vm4, %v3154_v1 }
0x1720   :  { %5095 = vmatmul.mubr.msk.f32.vlgmr.msra.gmra.mrb[30].mxu1 %vm223_vm4, %v3156_v58 }
0x1722   :  { %v3245_v23 = vpop.permute.xlu0 %3244 }
0x1725   :  { %v5714_v3 = vpop.eup %5713 }
0x1726   :  { %v2978_v6 = vmul.f32 %v5714_v3, %v5706_v14 }
0x1727   :  { %v2967_v2 = vpop.xlane.xlu1 %2966 }
0x1728   :  { %5715 = vrcp.f32 %v2967_v2 }
0x172b   :  { %v3247_v10 = vpop.permute.xlu1 %3246 }
0x1732   :  { %v5716_v5 = vpop.eup %5715 }
0x1733   :  { %v2977_v4 = vmul.f32 %v5716_v5, %v5708_v12 }
0x1735   :  { %5087 = vmatprep.mubr.msk.f32.mxu0 %vm396_vm6, %v2977_v4 }
0x1736   :  { %5088 = vmatmul.mubr.msk.f32.vlgmr.msra.gmra.mrb[40].mxu0 %vm396_vm6, %v2978_v6 }
0x1737   :  { %5310 = vmatpush3.bf16.xpose.msk.msra.mxu0 %vm5975_vm5, %v5305_v42  ;;  %5101 = vmatprep.mubr.msk.f32.mxu0 %vm223_vm4, %v3245_v23 }
0x173e   :  { %5102 = vmatmul.mubr.msk.f32.vlgmr.msra.gmra.mrb[42].mxu0 %vm223_vm4, %v3247_v10 }
0x17c8   :  { %v6413_v11 = vpop.f32.mrb[28].mxu1 }
0x17c9   :  { %v6415_v15 = vpop.f32.mrb[29].mxu1 }
0x17ca   :  { %v5550_v17 = vpack.i.bf16 %v6413_v11, %v6415_v15 }
0x17f3   :  { %v5096_v14 = vpop.f32.mrb[30].mxu1 }
0x17f4   :  { %v3235_v7 = vpop.f32.mrb[31].mxu1  ;;  %v3338_v12 = vsel %vm396_vm6, %v5096_v14, -inf }
0x17f5   :  { %3339 = vmax.xlane.f32.xlu1 %v3338_v12  ;;  %v3335_v13 = vsel %vm396_vm6, %v3235_v7, -inf }
0x17f6   :  { %3336 = vmax.xlane.f32.xlu0 %v3335_v13 }
0x1809   :  { %v6421_v31 = vpop.f32.mrb[40].mxu0 }
0x180a   :  { %v6423_v8 = vpop.f32.mrb[41].mxu0 }
0x180b   :  { %v5555_v9 = vpack.i.bf16 %v6421_v31, %v6423_v8 }
0x1811   :  { %v5103_v18 = vpop.f32.mrb[42].mxu0 }
0x1812   :  { %v3326_v19 = vpop.f32.mrb[43].mxu0  ;;  %v3344_v24 = vsel %vm396_vm6, %v5103_v18, -inf }
0x1813   :  { %v3341_v20 = vsel %vm396_vm6, %v3326_v19, -inf }
0x1814   :  { %3342 = vmax.xlane.f32.xlu0 %v3341_v20 }
0x1818   :  { %3345 = vmax.xlane.f32.xlu0 %v3344_v24 }
0x1882   :  { %v3340_v25 = vpop.xlane.xlu1 %3339 }
0x1883   :  { %v3348_v36 = vsub.f32 %v5096_v14, %v3340_v25  ;;  %v3337_v28 = vpop.xlane.xlu0 %3336 }
0x1884   :  { %v3347_v26 = vsub.f32 %v3235_v7, %v3337_v28 }
0x1885   :  { %v3353_v32 = vmul.f32 1.442695, %v3348_v36 }
0x1886   :  { %v3351_v40 = vmul.f32 1.442695, %v3347_v26 }
0x1887   :  { %5717 = vpow2.f32 %v3353_v32 }
0x1888   :  { %5719 = vpow2.f32 %v3351_v40 }
0x1891   :  { %v5718_v44 = vpop.eup %5717 }
0x1892   :  { %v5720_v45 = vpop.eup %5719  ;;  %v3362_v50 = vsel %vm396_vm6, %v5718_v44, 0.0 }
0x1893   :  { %3363 = vadd.xlane.f32.xlu0 %v3362_v50  ;;  %v3359_v51 = vsel %vm396_vm6, %v5720_v45, 0.0 }
0x1894   :  { %3360 = vadd.xlane.f32.xlu1 %v3359_v51 }
0x18a1   :  { %v3343_v33 = vpop.xlane.xlu0 %3342 }
0x18a2   :  { %v3349_v42 = vsub.f32 %v3326_v19, %v3343_v33 }
0x18a4   :  { %v3355_v34 = vmul.f32 1.442695, %v3349_v42 }
0x18a5   :  { %5521 = vrot.lane.b32.xlu1 %v6307_v61, %s5825_s17  ;;  %v3346_v54 = vpop.xlane.xlu0 %3345 }
0x18a6   :  { %v3350_v30 = vsub.f32 %v5103_v18, %v3346_v54 }
0x18a8   :  { %v3357_v35 = vmul.f32 1.442695, %v3350_v30 }
0x18a9   :  { %5531 = vrot.lane.b32.xlu1 %v6307_v61, %s5826_s18  ;;  %5526 = vrot.lane.b32.xlu0 %v6303_v60, %s5825_s17 }
0x18aa   :  { %5721 = vpow2.f32 %v3357_v35 }
0x18ab   :  { %5723 = vpow2.f32 %v3355_v34 }
0x18ad   :  { %5536 = vrot.lane.b32.xlu1 %v6303_v60, %s5826_s18 }
0x18b1   :  { %3555 = vrot.lane.b32.xlu1 %v6297_v59, %s5827_s19 }
0x18b4   :  { %v5722_v1 = vpop.eup %5721 }
0x18b5   :  { %v3368_v58 = vsel %vm396_vm6, %v5722_v1, 0.0  ;;  %v5724_v2 = vpop.eup %5723 }
0x18b6   :  { %v3365_v3 = vsel %vm396_vm6, %v5724_v2, 0.0 }
0x18c8   :  { %3369 = vadd.xlane.f32.xlu0 %v3368_v58 }
0x18d5   :  { %3366 = vadd.xlane.f32.xlu1 %v3365_v3 }
0x18de   :  { %3553 = vrot.lane.b32.xlu0 %v6291_v56, %s5827_s19 }
0x18e2   :  { %3644 = vrot.lane.b32.xlu0 %v6289_v43, %s5827_s19 }
0x18e6   :  { %3646 = vrot.lane.b32.xlu1 %v6293_v57, %s5827_s19 }
0x1920   :  { %v3364_v59 = vpop.xlane.xlu0 %3363 }
0x1921   :  { %5725 = vrcp.f32 %v3364_v59  ;;  %v3361_v5 = vpop.xlane.xlu1 %3360 }
0x1922   :  { %5727 = vrcp.f32 %v3361_v5 }
0x1924   :  { %v5527_v4 = vpop.permute.xlu0 %5526 }
0x1925   :  { %v5529_v6 = vunpack.i.h.bf16 %v5527_v4  ;;  %v5528_v23 = vunpack.i.l.bf16 %v5527_v4  ;;  %v5522_v10 = vpop.permute.xlu1 %5521 }
0x1926   :  { %v5524_v14 = vunpack.i.h.bf16 %v5522_v10  ;;  %v5523_v7 = vunpack.i.l.bf16 %v5522_v10 }
0x1927   :  { %v5315_v12 = vpack.c.bf16 %v5529_v6, %v5528_v23 }
0x1928   :  { %v5311_v13 = vpack.c.bf16 %v5524_v14, %v5523_v7 }
0x1929   :  { %v5532_v18 = vpop.permute.xlu1 %5531  ;;  %5316 = vmatprep.subr.bf16.mxu0 %v5315_v12 }
0x192a   :  { %v5534_v56 = vunpack.i.h.bf16 %v5532_v18  ;;  %v5533_v19 = vunpack.i.l.bf16 %v5532_v18  ;;  %5312 = vmatprep.subr.bf16.mxu1 %v5311_v13  ;;  %5318 = vmatpush3.bf16.msra.mxu0 %v5315_v12 }
0x192b   :  { %v5726_v43 = vpop.eup %5725  ;;  %5314 = vmatpush3.bf16.msra.mxu1 %v5311_v13 }
0x192c   :  { %v5728_v57 = vpop.eup %5727  ;;  %v5319_v20 = vpack.c.bf16 %v5534_v56, %v5533_v19  ;;  %v3376_v36 = vmul.f32 %v5726_v43, %v5718_v44 }
0x192d   :  { %v5537_v24 = vpop.permute.xlu1 %5536  ;;  %v3375_v25 = vmul.f32 %v5728_v57, %v5720_v45 }
0x192e   :  { %v5539_v28 = vunpack.i.h.bf16 %v5537_v24  ;;  %v5538_v26 = vunpack.i.l.bf16 %v5537_v24  ;;  %5321 = vmatprep.subr.msk.bf16.mxu1 %vm5975_vm5, %v5319_v20 }
0x192f   :  { %5108 = vmatprep.mubr.msk.f32.mxu1 %vm396_vm6, %v3375_v25 }
0x1930   :  { %v5325_v32 = vpack.c.bf16 %v5539_v28, %v5538_v26  ;;  %5109 = vmatmul.mubr.msk.f32.vlgmr.msra.gmra.mrb[32].mxu1 %vm396_vm6, %v3376_v36 }
0x1931   :  { %v3556_v45 = vpop.permute.xlu1 %3555 }
0x1932   :  { %5327 = vmatprep.subr.msk.bf16.mxu0 %vm5975_vm5, %v5325_v32 }
0x1934   :  { %5324 = vmatpush3.bf16.xpose.msk.msra.mxu1 %vm5975_vm5, %v5319_v20 }
0x1955   :  { %v3370_v40 = vpop.xlane.xlu0 %3369 }
0x1956   :  { %5729 = vrcp.f32 %v3370_v40 }
0x1959   :  { %v3554_v50 = vpop.permute.xlu0 %3553 }
0x195a   :  { %5122 = vmatprep.mubr.msk.f32.mxu1 %vm223_vm4, %v3554_v50 }
0x195b   :  { %5123 = vmatmul.mubr.msk.f32.vlgmr.msra.gmra.mrb[34].mxu1 %vm223_vm4, %v3556_v45 }
0x195d   :  { %v3645_v35 = vpop.permute.xlu0 %3644 }
0x1960   :  { %v5730_v51 = vpop.eup %5729 }
0x1961   :  { %v3378_v30 = vmul.f32 %v5730_v51, %v5722_v1 }
0x1962   :  { %v3367_v44 = vpop.xlane.xlu1 %3366 }
0x1963   :  { %5731 = vrcp.f32 %v3367_v44 }
0x1966   :  { %v3647_v42 = vpop.permute.xlu1 %3646 }
0x196d   :  { %v5732_v33 = vpop.eup %5731 }
0x196e   :  { %v3377_v54 = vmul.f32 %v5732_v33, %v5724_v2 }
0x1970   :  { %5115 = vmatprep.mubr.msk.f32.mxu0 %vm396_vm6, %v3377_v54 }
0x1971   :  { %5116 = vmatmul.mubr.msk.f32.vlgmr.msra.gmra.mrb[44].mxu0 %vm396_vm6, %v3378_v30 }
0x1972   :  { %5330 = vmatpush3.bf16.xpose.msk.msra.mxu0 %vm5975_vm5, %v5325_v32  ;;  %5129 = vmatprep.mubr.msk.f32.mxu0 %vm223_vm4, %v3645_v35 }
0x1979   :  { %5130 = vmatmul.mubr.msk.f32.vlgmr.msra.gmra.mrb[46].mxu0 %vm223_vm4, %v3647_v42 }
0x1a03   :  { %v5110_v34 = vpop.f32.mrb[32].mxu1 }
0x1a04   :  { %v3457_v58 = vpop.f32.mrb[33].mxu1 }
0x1a05   :  { %v5560_v3 = vpack.i.bf16 %v5110_v34, %v3457_v58 }
0x1a2e   :  { %v5124_v59 = vpop.f32.mrb[34].mxu1 }
0x1a2f   :  { %v3635_v5 = vpop.f32.mrb[35].mxu1  ;;  %v3738_v1 = vsel %vm396_vm6, %v5124_v59, -inf }
0x1a30   :  { %3739 = vmax.xlane.f32.xlu1 %v3738_v1  ;;  %v3735_v2 = vsel %vm396_vm6, %v3635_v5, -inf }
0x1a31   :  { %3736 = vmax.xlane.f32.xlu0 %v3735_v2 }
0x1a44   :  { %v5117_v4 = vpop.f32.mrb[44].mxu0 }
0x1a45   :  { %v3544_v6 = vpop.f32.mrb[45].mxu0 }
0x1a46   :  { %v5565_v38 = vpack.i.bf16 %v5117_v4, %v3544_v6  ;;  %v5597_v6 = vld [vmem:[%s6610_s3 + $0x10] sm:$0xff]  }
0x1a4c   :  { %v5131_v23 = vpop.f32.mrb[46].mxu0 }
0x1a4d   :  { %v3726_v10 = vpop.f32.mrb[47].mxu0  ;;  %v3744_v7 = vsel %vm396_vm6, %v5131_v23, -inf }
0x1a4e   :  { %v3741_v14 = vsel %vm396_vm6, %v3726_v10, -inf }
0x1a4f   :  { %3742 = vmax.xlane.f32.xlu0 %v3741_v14 }
0x1a53   :  { %3745 = vmax.xlane.f32.xlu0 %v3744_v7 }
0x1abd   :  { %v3740_v12 = vpop.xlane.xlu1 %3739 }
0x1abe   :  { %v3748_v13 = vsub.f32 %v5124_v59, %v3740_v12  ;;  %v3737_v18 = vpop.xlane.xlu0 %3736 }
0x1abf   :  { %v3747_v56 = vsub.f32 %v3635_v5, %v3737_v18 }
0x1ac0   :  { %v3753_v19 = vmul.f32 1.442695, %v3748_v13 }
0x1ac1   :  { %v3751_v43 = vmul.f32 1.442695, %v3747_v56 }
0x1ac2   :  { %5733 = vpow2.f32 %v3753_v19 }
0x1ac3   :  { %5735 = vpow2.f32 %v3751_v43 }
0x1acc   :  { %v5734_v57 = vpop.eup %5733 }
0x1acd   :  { %v5736_v20 = vpop.eup %5735  ;;  %v3762_v24 = vsel %vm396_vm6, %v5734_v57, 0.0 }
0x1ace   :  { %3763 = vadd.xlane.f32.xlu0 %v3762_v24  ;;  %v3759_v25 = vsel %vm396_vm6, %v5736_v20, 0.0 }
0x1acf   :  { %3760 = vadd.xlane.f32.xlu1 %v3759_v25 }
0x1adc   :  { %v3743_v36 = vpop.xlane.xlu0 %3742 }
0x1add   :  { %v3749_v28 = vsub.f32 %v3726_v10, %v3743_v36 }
0x1adf   :  { %v3755_v26 = vmul.f32 1.442695, %v3749_v28 }
0x1ae0   :  { %v3746_v32 = vpop.xlane.xlu0 %3745 }
0x1ae1   :  { %5737 = vpow2.f32 %v3755_v26  ;;  %v3750_v40 = vsub.f32 %v5131_v23, %v3746_v32 }
0x1ae3   :  { %v3757_v50 = vmul.f32 1.442695, %v3750_v40 }
0x1ae5   :  { %5739 = vpow2.f32 %v3757_v50 }
0x1aeb   :  { %v5738_v45 = vpop.eup %5737 }
0x1aec   :  { %v3765_v44 = vsel %vm396_vm6, %v5738_v45, 0.0 }
0x1aed   :  { %3766 = vadd.xlane.f32.xlu1 %v3765_v44 }
0x1aef   :  { %v5740_v51 = vpop.eup %5739 }
0x1af0   :  { %v3768_v33 = vsel %vm396_vm6, %v5740_v51, 0.0 }
0x1af1   :  { %3769 = vadd.xlane.f32.xlu0 %v3768_v33 }
0x1afe   :  { %5541 = vrot.lane.b32.xlu1 %v6307_v61, %s5828_s8 }
0x1b02   :  { %5551 = vrot.lane.b32.xlu1 %v5550_v17, %s5829_s21 }
0x1b06   :  { %5556 = vrot.lane.b32.xlu1 %v5555_v9, %s5829_s21 }
0x1b07   :  { %5546 = vrot.lane.b32.xlu0 %v6303_v60, %s5828_s8 }
0x1b0a   :  { %5566 = vrot.lane.b32.xlu1 %v5565_v38, %s5830_s22  ;;  %v5598_v38 = vld [vmem:[%s6610_s3 + $0x18] sm:$0xff]  }
0x1b0b   :  { %5561 = vrot.lane.b32.xlu0 %v5560_v3, %s5830_s22 }
0x1b5b   :  { %v3764_v11 = vpop.xlane.xlu0 %3763 }
0x1b5c   :  { %v3761_v54 = vpop.xlane.xlu1 %3760 }
0x1b5d   :  { %5741 = vrcp.f32 %v3761_v54 }
0x1b5e   :  { %5743 = vrcp.f32 %v3764_v11 }
0x1b67   :  { %v5742_v61 = vpop.eup %5741 }
0x1b68   :  { %v3775_v30 = vmul.f32 %v5742_v61, %v5736_v20  ;;  %v5744_v35 = vpop.eup %5743 }
0x1b69   :  { %v3776_v59 = vmul.f32 %v5744_v35, %v5734_v57 }
0x1b6a   :  { %5136 = vmatprep.mubr.msk.f32.mxu1 %vm396_vm6, %v3775_v30 }
0x1b7a   :  { %v3767_v15 = vpop.xlane.xlu1 %3766 }
0x1b7b   :  { %5745 = vrcp.f32 %v3767_v15 }
0x1b7e   :  { %v5542_v17 = vpop.permute.xlu1 %5541  ;;  %v3770_v31 = vpop.xlane.xlu0 %3769 }
0x1b7f   :  { %v5544_v8 = vunpack.i.h.bf16 %v5542_v17  ;;  %v5543_v9 = vunpack.i.l.bf16 %v5542_v17  ;;  %5747 = vrcp.f32 %v3770_v31 }
0x1b81   :  { %v5331_v60 = vpack.c.bf16 %v5544_v8, %v5543_v9 }
0x1b82   :  { %v5547_v42 = vpop.permute.xlu0 %5546  ;;  %v5552_v18 = vpop.permute.xlu1 %5551 }
0x1b83   :  { %v5549_v34 = vunpack.i.h.bf16 %v5547_v42  ;;  %v5548_v58 = vunpack.i.l.bf16 %v5547_v42  ;;  %5332 = vmatprep.subr.bf16.mxu1 %v5331_v60  ;;  %v5554_v43 = vunpack.i.h.bf16 %v5552_v18  ;;  %v5553_v57 = vunpack.i.l.bf16 %v5552_v18 }
0x1b84   :  { %5334 = vmatpush3.bf16.msra.mxu1 %v5331_v60 }
0x1b85   :  { %v5746_v3 = vpop.eup %5745  ;;  %v5335_v5 = vpack.c.bf16 %v5549_v34, %v5548_v58  ;;  %5146 = vmatprep.subr.bf16.mxu1 %v5597_v6  ;;  %v4002_v28 = vsel %vm223_vm4, %v6367_v46, %v5554_v43  ;;  %v4001_v26 = vsel %vm223_vm4, %v6369_v47, %v5553_v57 }
0x1b86   :  { %v3777_v1 = vmul.f32 %v5746_v3, %v5738_v45  ;;  %v5557_v56 = vpop.permute.xlu1 %5556  ;;  %v5562_v19 = vpop.permute.xlu0 %5561 }
0x1b87   :  { %5137 = vmatmul.mubr.msk.f32.vlgmr.msra.gmra.mrb[36].mxu1 %vm396_vm6, %v3776_v59  ;;  %5336 = vmatprep.subr.bf16.mxu0 %v5335_v5  ;;  %v5564_v20 = vunpack.i.h.bf16 %v5562_v19  ;;  %v5563_v24 = vunpack.i.l.bf16 %v5562_v19  ;;  %v5559_v50 = vunpack.i.h.bf16 %v5557_v56  ;;  %v5558_v45 = vunpack.i.l.bf16 %v5557_v56 }
0x1b88   :  { %5338 = vmatpush3.bf16.msra.mxu0 %v5335_v5  ;;  %5143 = vmatprep.mubr.msk.f32.mxu0 %vm396_vm6, %v3777_v1 }
0x1b89   :  { %v5748_v2 = vpop.eup %5747  ;;  %5147 = vmatpush3.bf16.msra.mxu1 %v5597_v6  ;;  %v4006_v44 = vsel %vm396_vm6, %v4002_v28, %v5564_v20  ;;  %v4004_v46 = vsel %vm223_vm4, %v6371_v48, %v5559_v50  ;;  %v4003_v47 = vsel %vm223_vm4, %v6373_v49, %v5558_v45  ;;  %v4094_v48 = vrot.slane %v6285_v29, %v1955_v0  ;;  %v5599_v50 = vld [vmem:[%s6611_s4 + $0x10] sm:$0xff]   ;;  %v5600_v45 = vld [vmem:[%s6611_s4 + $0x18] sm:$0xff]  }
0x1b8a   :  { %v3778_v4 = vmul.f32 %v5748_v2, %v5740_v51  ;;  %5148 = vmatprep.subr.bf16.mxu1 %v5598_v38  ;;  %v5567_v25 = vpop.permute.xlu1 %5566  ;;  %v4005_v51 = vsel %vm396_vm6, %v4001_v26, %v5563_v24  ;;  %5154 = vmatprep.subr.bf16.mxu0 %v5599_v50 }
0x1b8b   :  { %v5569_v33 = vunpack.i.h.bf16 %v5567_v25  ;;  %v5568_v54 = vunpack.i.l.bf16 %v5567_v25 }
0x1b8c   :  { %5144 = vmatmul.mubr.msk.f32.vlgmr.msra.gmra.mrb[48].mxu0 %vm396_vm6, %v3778_v4 }
0x1b8d   :  { %5149 = vmatpush3.bf16.msra.mxu1 %v5598_v38  ;;  %v4007_v8 = vsel %vm396_vm6, %v4003_v47, %v5568_v54  ;;  %v4008_v9 = vsel %vm396_vm6, %v4004_v46, %v5569_v33  ;;  %5155 = vmatpush3.bf16.msra.mxu0 %v5599_v50 }
0x1b8e   :  { %5156 = vmatprep.subr.bf16.mxu0 %v5600_v45 }
0x1b91   :  { %5157 = vmatpush3.bf16.msra.mxu0 %v5600_v45 }
0x1c5a   :  { %v5138_v23 = vpop.f32.mrb[36].mxu1 }
0x1c5b   :  { %v3857_v10 = vpop.f32.mrb[37].mxu1 }
0x1c5c   :  { %v5570_v14 = vpack.i.bf16 %v5138_v23, %v3857_v10 }
0x1c5e   :  { %5571 = vrot.lane.b32.xlu0 %v5570_v14, %s5831_s27 }
0x1c5f   :  { %v5145_v7 = vpop.f32.mrb[48].mxu0 }
0x1c60   :  { %v3944_v12 = vpop.f32.mrb[49].mxu0 }
0x1c61   :  { %v5575_v13 = vpack.i.bf16 %v5145_v7, %v3944_v12 }
0x1c63   :  { %5576 = vrot.lane.b32.xlu1 %v5575_v13, %s5831_s27 }
0x1cd0   :  { %v5572_v36 = vpop.permute.xlu0 %5571 }
0x1cd1   :  { %v5574_v32 = vunpack.i.h.bf16 %v5572_v36  ;;  %v5573_v40 = vunpack.i.l.bf16 %v5572_v36 }
0x1cd3   :  { %v4009_v61 = vsel %vm1871_vm7, %v4005_v51, %v5573_v40  ;;  %v4010_v30 = vsel %vm1871_vm7, %v4006_v44, %v5574_v32  ;;  %v5601_v44 = vld [vmem:[%s6612_s5 + $0x20] sm:$0xff]   ;;  %v5602_v51 = vld [vmem:[%s6612_s5 + $0x28] sm:$0xff]  }
0x1cd4   :  { %v4018_v11 = vpack.c.bf16 %v4010_v30, %v4009_v61  ;;  %5162 = vmatprep.subr.bf16.mxu1 %v5601_v44 }
0x1cd5   :  { %v5577_v15 = vpop.permute.xlu1 %5576 }
0x1cd6   :  { %v5579_v17 = vunpack.i.h.bf16 %v5577_v15  ;;  %v5578_v31 = vunpack.i.l.bf16 %v5577_v15  ;;  %5150 = vmatprep.mubr.msk.bf16.mxu1 %vm161_vm3, %v4018_v11 }
0x1cd8   :  { %v4012_v60 = vsel %vm1871_vm7, %v4008_v9, %v5579_v17  ;;  %v4011_v35 = vsel %vm1871_vm7, %v4007_v8, %v5578_v31 }
0x1cd9   :  { %v4019_v42 = vpack.c.bf16 %v4012_v60, %v4011_v35  ;;  %v6547_v60 = vld [vmem:[%s6613_s6 + $0x8] sm:$0xff] }
0x1cda   :  { %v4154_v35 = vrot.slane %v6547_v60, %v2016_v63 }
0x1cdb   :  { %5151 = vmatmul.mubr.msk.bf16.vlgmr.msra.gmra.mrb[40].mxu1 %vm161_vm3, %v4019_v42 }
0x1cdc   :  { %5163 = vmatpush3.bf16.msra.mxu1 %v5601_v44 }
0x1cdd   :  { %5164 = vmatprep.subr.bf16.mxu1 %v5602_v51 }
0x1ce0   :  { %5165 = vmatpush3.bf16.msra.mxu1 %v5602_v51 }
0x1dae   :  { %v5152_v34 = vpop.f32.mrb[40].mxu1 }
0x1daf   :  { %v4072_v49 = vpop.f32.mrb[41].mxu1  ;;  %v4089_v58 = vadd.f32 %v5152_v34, %v6275_v55 }
0x1db0   :  { %v4087_v3 = vadd.f32 %v4072_v49, %v6268_v52  ;;  %v5153_v59 = vpop.f32.mrb[42].mxu1 }
0x1db1   :  { %v4075_v5 = vpop.f32.mrb[43].mxu1  ;;  %v4097_v4 = vadd.f32 %v4094_v48, %v4089_v58  ;;  %v4090_v6 = vadd.f32 %v5153_v59, %v6277_v62 }
0x1db2   :  { %v4095_v1 = vadd.f32 %v4094_v48, %v4087_v3  ;;  %v4088_v2 = vadd.f32 %v4075_v5, %v6270_v53  ;;  %v4162_v3 = vrot.slane %v6547_v60, %v2024_v41  ;;  %v5603_v41 = vld [vmem:[%s6612_s5 + $0x30] sm:$0xff]  }
0x1db3   :  { %v4098_v0 = vadd.f32 %v4094_v48, %v4090_v6  ;;  %v4105_v55 = vsel %vm161_vm3, %v4097_v4, 0.0  ;;  %5166 = vmatprep.subr.bf16.mxu1 %v5603_v41 }
0x1db4   :  { %v4096_v38 = vadd.f32 %v4094_v48, %v4088_v2  ;;  %v4099_v23 = vsel %vm161_vm3, %v4095_v1, 0.0  ;;  %5167 = vmatpush3.bf16.msra.mxu1 %v5603_v41 }
0x1db5   :  { %4100 = vadd.xlane.f32.xlu0 %v4099_v23  ;;  %v4108_v52 = vsel %vm161_vm3, %v4098_v0, 0.0 }
0x1db6   :  { %v4102_v10 = vsel %vm161_vm3, %v4096_v38, 0.0 }
0x1db7   :  { %4103 = vadd.xlane.f32.xlu1 %v4102_v10 }
0x1db9   :  { %4106 = vadd.xlane.f32.xlu0 %v4105_v55 }
0x1dbd   :  { %4109 = vadd.xlane.f32.xlu0 %v4108_v52 }
0x1e42   :  { %v4101_v29 = vpop.xlane.xlu0 %4100 }
0x1e43   :  { %v4111_v14 = vmul.f32 0.03125, %v4101_v29  ;;  %v5604_v29 = vld [vmem:[%s6612_s5 + $0x38] sm:$0xff]  }
0x1e44   :  { %v4104_v53 = vpop.xlane.xlu1 %4103  ;;  %5168 = vmatprep.subr.bf16.mxu1 %v5604_v29 }
0x1e45   :  { %v4115_v7 = vsub.f32 %v4095_v1, %v4111_v14  ;;  %v4112_v12 = vmul.f32 0.03125, %v4104_v53  ;;  %5169 = vmatpush3.bf16.msra.mxu1 %v5604_v29  ;;  %v4177_v14 = vrot.slane %v6547_v60, %v2038_v16  ;;  %v4263_v16 = vrot.slane %v6547_v60, %v2123_v39 }
0x1e46   :  { %v4107_v62 = vpop.xlane.xlu0 %4106 }
0x1e47   :  { %v4116_v13 = vsub.f32 %v4096_v38, %v4112_v12  ;;  %v4113_v18 = vmul.f32 0.03125, %v4107_v62  ;;  %v4119_v56 = vmul.f32 %v4115_v7, %v4115_v7 }
0x1e49   :  { %v4117_v19 = vsub.f32 %v4097_v4, %v4113_v18  ;;  %v4123_v43 = vsel %vm161_vm3, %v4119_v56, 0.0  ;;  %v4120_v57 = vmul.f32 %v4116_v13, %v4116_v13 }
0x1e4a   :  { %v4110_v20 = vpop.xlane.xlu0 %4109  ;;  %4124 = vadd.xlane.f32.xlu1 %v4123_v43 }
0x1e4b   :  { %v4114_v24 = vmul.f32 0.03125, %v4110_v20  ;;  %v4126_v25 = vsel %vm161_vm3, %v4120_v57, 0.0  ;;  %v4121_v36 = vmul.f32 %v4117_v19, %v4117_v19 }
0x1e4c   :  { %4127 = vadd.xlane.f32.xlu0 %v4126_v25 }
0x1e4d   :  { %v4118_v28 = vsub.f32 %v4098_v0, %v4114_v24  ;;  %v4129_v26 = vsel %vm161_vm3, %v4121_v36, 0.0 }
0x1e4e   :  { %4130 = vadd.xlane.f32.xlu1 %v4129_v26 }
0x1e4f   :  { %v4122_v32 = vmul.f32 %v4118_v28, %v4118_v28 }
0x1e51   :  { %v4132_v40 = vsel %vm161_vm3, %v4122_v32, 0.0 }
0x1e52   :  { %4133 = vadd.xlane.f32.xlu0 %v4132_v40 }
0x1ed7   :  { %v4125_v33 = vpop.xlane.xlu1 %4124 }
0x1ed8   :  { %v4135_v54 = vmul.f32 0.03125, %v4125_v33 }
0x1ed9   :  { %v4128_v61 = vpop.xlane.xlu0 %4127 }
0x1eda   :  { %v4139_v30 = vadd.f32 1e-05, %v4135_v54  ;;  %v4136_v11 = vmul.f32 0.03125, %v4128_v61 }
0x1edb   :  { %v4131_v15 = vpop.xlane.xlu1 %4130 }
0x1edc   :  { %5749 = vrsqrt.f32 %v4139_v30  ;;  %v4140_v46 = vadd.f32 1e-05, %v4136_v11  ;;  %v4137_v47 = vmul.f32 0.03125, %v4131_v15 }
0x1ede   :  { %5751 = vrsqrt.f32 %v4140_v46  ;;  %v4141_v17 = vadd.f32 1e-05, %v4137_v47 }
0x1edf   :  { %v4134_v31 = vpop.xlane.xlu0 %4133 }
0x1ee0   :  { %5753 = vrsqrt.f32 %v4141_v17  ;;  %v4138_v8 = vmul.f32 0.03125, %v4134_v31 }
0x1ee2   :  { %v4142_v9 = vadd.f32 1e-05, %v4138_v8 }
0x1ee4   :  { %5755 = vrsqrt.f32 %v4142_v9 }
0x1ee6   :  { %v5750_v42 = vpop.eup %5749 }
0x1ee7   :  { %v4147_v34 = vmul.f32 %v5750_v42, %v4115_v7 }
0x1ee8   :  { %v5752_v48 = vpop.eup %5751 }
0x1ee9   :  { %v4148_v49 = vmul.f32 %v5752_v48, %v4116_v13  ;;  %v4155_v58 = vmul.f32 %v4154_v35, %v4147_v34 }
0x1eea   :  { %v5754_v59 = vpop.eup %5753 }
0x1eeb   :  { %v4149_v5 = vmul.f32 %v5754_v59, %v4117_v19  ;;  %v4156_v1 = vmul.f32 %v4154_v35, %v4148_v49  ;;  %v4163_v2 = vadd.f32 %v4162_v3, %v4155_v58 }
0x1eed   :  { %v4164_v4 = vadd.f32 %v4162_v3, %v4156_v1  ;;  %v4157_v38 = vmul.f32 %v4154_v35, %v4149_v5 }
0x1eee   :  { %v5756_v6 = vpop.eup %5755 }
0x1eef   :  { %v4150_v23 = vmul.f32 %v5756_v6, %v4118_v28  ;;  %v4172_v10 = vpack.c.bf16 %v4164_v4, %v4163_v2  ;;  %v4165_v63 = vadd.f32 %v4162_v3, %v4157_v38 }
0x1ef1   :  { %v4158_v0 = vmul.f32 %v4154_v35, %v4150_v23  ;;  %5158 = vmatprep.mubr.msk.bf16.mxu0 %vm161_vm3, %v4172_v10  ;;  %v5832_v10 = vmov 0.0  }
0x1ef2   :  { %5174 = vmatprep.subr.mxu0 %v5832_v10 }
0x1ef3   :  { %v4166_v55 = vadd.f32 %v4162_v3, %v4158_v0  ;;  %v4437_v0 = vld [vmem:[#allocation2] sm:$0x1] }
0x1ef5   :  { %v4173_v52 = vpack.c.bf16 %v4166_v55, %v4165_v63 }
0x1ef7   :  { %5159 = vmatmul.mubr.msk.bf16.vlgmr.msra.gmra.mrb[52].mxu0 %vm161_vm3, %v4173_v52 }
0x1ef8   :  { %5176 = vmatprep.mubr.msk.f32.mxu0 %vm5833_vm9, %v5832_v10 }
0x1fca   :  { %v5160_v53 = vpop.f32.mrb[52].mxu0 }
0x1fcb   :  { %v4239_v7 = vadd.f32 %v5160_v53, %v4177_v14  ;;  %v4230_v12 = vpop.f32.mrb[53].mxu0 }
0x1fcc   :  { %v4231_v62 = vadd.f32 %v4230_v12, %v4177_v14  ;;  %v5161_v13 = vpop.f32.mrb[54].mxu0 }
0x1fcd   :  { %v4242_v18 = vadd.f32 %v5161_v13, %v4177_v14  ;;  %v4233_v56 = vpop.f32.mrb[55].mxu0  ;;  %v4247_v43 = vmax.f32 %v4239_v7, 0.0 }
0x1fce   :  { %v4234_v19 = vadd.f32 %v4233_v56, %v4177_v14  ;;  %v4245_v20 = vmax.f32 %v4231_v62, 0.0 }
0x1fcf   :  { %v4248_v57 = vmax.f32 %v4242_v18, 0.0 }
0x1fd0   :  { %v4246_v24 = vmax.f32 %v4234_v19, 0.0  ;;  %v4402_v19 = vrot.slane %v6547_v60, %v2263_v27 }
0x1fd1   :  { %v4259_v25 = vpack.c.bf16 %v4248_v57, %v4247_v43  ;;  %v4410_v57 = vrot.slane %v6547_v60, %v2271_v37 }
0x1fd2   :  { %v4258_v36 = vpack.c.bf16 %v4246_v24, %v4245_v20 }
0x1fd4   :  { %5170 = vmatprep.mubr.msk.bf16.mxu1 %vm2149_vm8, %v4258_v36 }
0x1fd5   :  { %5171 = vmatmul.mubr.msk.bf16.vlgmr.msra.gmra.mrb[44].mxu1 %vm2149_vm8, %v4259_v25 }
0x20a8   :  { %v5172_v28 = vpop.f32.mrb[44].mxu1 }
0x20a9   :  { %v4328_v26 = vpop.f32.mrb[45].mxu1  ;;  %v4337_v32 = vadd.f32 %v5172_v28, %v4263_v16 }
0x20aa   :  { %v4329_v40 = vadd.f32 %v4328_v26, %v4263_v16  ;;  %v5173_v50 = vpop.f32.mrb[46].mxu1 }
0x20ab   :  { %v4331_v45 = vpop.f32.mrb[47].mxu1  ;;  %v4340_v51 = vadd.f32 %v5173_v50, %v4263_v16  ;;  %v4345_v54 = vadd.f32 %v4337_v32, %v4165_v63  ;;  %v5834_v63 = vmov 0  }
0x20ac   :  { %v4343_v44 = vadd.f32 %v4329_v40, %v4163_v2  ;;  %v4332_v33 = vadd.f32 %v4331_v45, %v4263_v16  ;;  %5580 = vset.pattern.permute.xlu1 %v5834_v63  ;;  %5581 = vset.pattern.permute.xlu0 %v5834_v63 }
0x20ad   :  { %v4346_v11 = vadd.f32 %v4340_v51, %v4166_v55  ;;  %v4353_v39 = vsel %vm161_vm3, %v4345_v54, 0.0 }
0x20ae   :  { %v4344_v61 = vadd.f32 %v4332_v33, %v4164_v4  ;;  %v4347_v30 = vsel %vm161_vm3, %v4343_v44, 0.0 }
0x20af   :  { %4348 = vadd.xlane.f32.xlu1 %v4347_v30  ;;  %v4356_v46 = vsel %vm161_vm3, %v4346_v11, 0.0 }
0x20b0   :  { %v4350_v15 = vsel %vm161_vm3, %v4344_v61, 0.0 }
0x20b1   :  { %4351 = vadd.xlane.f32.xlu0 %v4350_v15 }
0x20b3   :  { %4354 = vadd.xlane.f32.xlu1 %v4353_v39 }
0x20b5   :  { %4357 = vadd.xlane.f32.xlu0 %v4356_v46 }
0x213c   :  { %v4349_v47 = vpop.xlane.xlu1 %4348 }
0x213d   :  { %v4359_v17 = vmul.f32 0.03125, %v4349_v47 }
0x213e   :  { %v4352_v31 = vpop.xlane.xlu0 %4351 }
0x213f   :  { %v4363_v8 = vsub.f32 %v4343_v44, %v4359_v17  ;;  %v4360_v9 = vmul.f32 0.03125, %v4352_v31 }
0x2140   :  { %v4355_v35 = vpop.xlane.xlu1 %4354 }
0x2141   :  { %v4364_v42 = vsub.f32 %v4344_v61, %v4360_v9  ;;  %v4361_v34 = vmul.f32 0.03125, %v4355_v35  ;;  %v4367_v48 = vmul.f32 %v4363_v8, %v4363_v8 }
0x2142   :  { %v4358_v49 = vpop.xlane.xlu0 %4357 }
0x2143   :  { %v4365_v58 = vsub.f32 %v4345_v54, %v4361_v34  ;;  %v4362_v3 = vmul.f32 0.03125, %v4358_v49  ;;  %v4371_v59 = vsel %vm161_vm3, %v4367_v48, 0.0  ;;  %v4368_v5 = vmul.f32 %v4364_v42, %v4364_v42 }
0x2144   :  { %4372 = vadd.xlane.f32.xlu1 %v4371_v59 }
0x2145   :  { %v4366_v1 = vsub.f32 %v4346_v11, %v4362_v3  ;;  %v4374_v2 = vsel %vm161_vm3, %v4368_v5, 0.0  ;;  %v4369_v4 = vmul.f32 %v4365_v58, %v4365_v58  ;;  %v4436_v3 = vld [vmem:[%s6614_s7] sm:$0x1] }
0x2146   :  { %4375 = vadd.xlane.f32.xlu0 %v4374_v2 }
0x2147   :  { %v4377_v6 = vsel %vm161_vm3, %v4369_v4, 0.0  ;;  %v4370_v38 = vmul.f32 %v4366_v1, %v4366_v1 }
0x2148   :  { %4378 = vadd.xlane.f32.xlu1 %v4377_v6 }
0x2149   :  { %v4380_v23 = vsel %vm161_vm3, %v4370_v38, 0.0 }
0x214a   :  { %4381 = vadd.xlane.f32.xlu0 %v4380_v23 }
0x2159   :  { %4440 = vperm.xlu1 %5580, %v4437_v0  }
0x21d1   :  { %v4373_v55 = vpop.xlane.xlu1 %4372 }
0x21d2   :  { %v4383_v52 = vmul.f32 0.03125, %v4373_v55 }
0x21d3   :  { %v4376_v41 = vpop.xlane.xlu0 %4375 }
0x21d4   :  { %v4387_v29 = vadd.f32 1e-05, %v4383_v52  ;;  %v4384_v14 = vmul.f32 0.03125, %v4376_v41 }
0x21d5   :  { %v4379_v53 = vpop.xlane.xlu1 %4378 }
0x21d6   :  { %5757 = vrsqrt.f32 %v4387_v29  ;;  %v4388_v7 = vadd.f32 1e-05, %v4384_v14  ;;  %v4385_v12 = vmul.f32 0.03125, %v4379_v53 }
0x21d7   :  { %v4382_v62 = vpop.xlane.xlu0 %4381 }
0x21d8   :  { %5759 = vrsqrt.f32 %v4388_v7  ;;  %v4389_v13 = vadd.f32 1e-05, %v4385_v12  ;;  %v4386_v18 = vmul.f32 0.03125, %v4382_v62 }
0x21d9   :  { %v4441_v59 = vpop.permute.xlu1 %4440 }
0x21da   :  { %5761 = vrsqrt.f32 %v4389_v13  ;;  %v4390_v56 = vadd.f32 1e-05, %v4386_v18  ;;  %v4446_v5 = vrot.slane %v4441_v59, %v5940_v22 }
0x21dc   :  { %5763 = vrsqrt.f32 %v4390_v56 }
0x21e0   :  { %v5758_v43 = vpop.eup %5757 }
0x21e1   :  { %v4395_v20 = vmul.f32 %v5758_v43, %v4363_v8 }
0x21e2   :  { %v5760_v24 = vpop.eup %5759 }
0x21e3   :  { %v4403_v25 = vmul.f32 %v4402_v19, %v4395_v20  ;;  %v4396_v36 = vmul.f32 %v5760_v24, %v4364_v42 }
0x21e4   :  { %v5762_v16 = vpop.eup %5761 }
0x21e5   :  { %v4411_v28 = vadd.f32 %v4410_v57, %v4403_v25  ;;  %v4404_v26 = vmul.f32 %v4402_v19, %v4396_v36  ;;  %v4397_v32 = vmul.f32 %v5762_v16, %v4365_v58 }
0x21e6   :  { %v5764_v40 = vpop.eup %5763 }
0x21e7   :  { %v4412_v50 = vadd.f32 %v4410_v57, %v4404_v26  ;;  %v4405_v45 = vmul.f32 %v4402_v19, %v4397_v32  ;;  %v4398_v44 = vmul.f32 %v5764_v40, %v4366_v1  ;;  %v4415_v27 = vsel %vm161_vm3, %v4411_v28, 0.0 }
0x21e9   :  { %v4413_v51 = vadd.f32 %v4410_v57, %v4405_v45  ;;  %v4406_v33 = vmul.f32 %v4402_v19, %v4398_v44  ;;  %v4416_v21 = vsel %vm161_vm3, %v4412_v50, 0.0 }
0x21ea   :  { %v4417_v54 = vadd.f32 %v4416_v21, %v4415_v27 }
0x21eb   :  { %v4414_v37 = vadd.f32 %v4410_v57, %v4406_v33  ;;  %v4424_v61 = vsel %vm161_vm3, %v4413_v51, 0.0 }
0x21ec   :  { %v4418_v60 = vrot.slane %v4417_v54, 4 }
0x21ed   :  { %v4425_v30 = vsel %vm161_vm3, %v4414_v37, 0.0 }
0x21ee   :  { %v4419_v11 = vadd.f32 %v4418_v60, %v4417_v54  ;;  %v4426_v15 = vadd.f32 %v4425_v30, %v4424_v61 }
0x21f0   :  { %v4420_v39 = vrot.slane %v4419_v11, 2  ;;  %v4427_v46 = vrot.slane %v4426_v15, 4 }
0x21f2   :  { %v4421_v47 = vadd.f32 %v4420_v39, %v4419_v11  ;;  %v4428_v17 = vadd.f32 %v4427_v46, %v4426_v15 }
0x21f4   :  { %v4422_v31 = vrot.slane %v4421_v47, 1  ;;  %v4429_v8 = vrot.slane %v4428_v17, 2 }
0x21f6   :  { %v4430_v9 = vadd.f32 %v4429_v8, %v4428_v17  ;;  %v4423_v35 = vadd.f32 %v4422_v31, %v4421_v47 }
0x21f8   :  { %v4431_v42 = vrot.slane %v4430_v9, 1  ;;  %v4434_v48 = vmul.f32 0.0625, %v4423_v35 }
0x21fa   :  { %v4432_v34 = vadd.f32 %v4431_v42, %v4430_v9 }
0x21fc   :  { %v4435_v49 = vmul.f32 0.0625, %v4432_v34 }
0x21fe   :  { %v4450_v58 = vsel %vm4449_vm10, %v4435_v49, %v4434_v48 }
0x21ff   :  { %5175 = vmatpush3.xpose.msk.msra.mxu0 %vm161_vm3, %v4450_v58 }
0x2202   :  { %5177 = vmatmul.mubr.msk.f32.vlgmr.msra.gmra.mrb[50].mxu0 %vm161_vm3, %v4436_v3 }
0x22d5   :  { %v4522_v1 = vpop.f32.mrb[50].mxu0 }
0x22d6   :  { %v4523_v2 = vadd.f32 %v4522_v1, %v4446_v5  ;;  %v5178_v4 = vpop.f32.mrb[51].mxu0 }
0x22d8   :  { %4527 = vst.msk [vmem:[#allocation6] sm:$0x1] %vm4526_vm11, %v4523_v2 }
0x22d9   :  { %5800 = shalt.err (!%p5797_p12)
}
0x22da   :  { %s5801_s23 = scalar_lea.hbm %s6616_s9, 16 }
0x22db   :  { %p5802_p13 = scmp.ne.s32.totalorder %s6616_s9, %s5801_s23  ;;  %p5805_p0 = scmp.lt.u32.totalorder %s5801_s23, %s6616_s9 }
0x22dd   :  { %p5807_p1 = pnand %p5805_p0, %p5802_p13 }
0x22df   :  { %5810 = shalt.err (!%p5807_p1)
}
0x22e0   :  { %4537 = dma.vmem_to_hbm [thread:$0]  %s4535_s29, 16, %s6616_s9, [#allocation5]  }
0x22e1   :  { %5813 = dma.done.wait [#allocation5], 16  }
0x22e2   :  { %5814 = vsyncadd [#allocation5], 4294967280 }
0x22e3   :  { %4541 = vsyncpa [#allocation4], 1 }
0x22e4   :  { %4542 = vsyncpa [#allocation5], 1 }

</bundles_post_ra>
